<compile_context>
chip_gen: v7x
topology: tpu7x:2x2x1
jax: 0.10.0
libtpu: 0.0.40
codegen_flags: <defaults>
</compile_context>

<pallas_src>
import functools

import jax
import jax.numpy as jnp
from jax.experimental import pallas as pl
from jax.experimental.pallas import tpu as pltpu


def _layer_norm(x, g, b, eps=1e-5):
    mu = jnp.mean(x, axis=-1, keepdims=True)
    var = jnp.mean((x - mu) ** 2, axis=-1, keepdims=True)
    return (x - mu) * jax.lax.rsqrt(var + eps) * g + b


# ---------------------------------------------------------------------------
# The fused kernel: grid=(depth,), activation resident in VMEM scratch h_ref.
# ---------------------------------------------------------------------------
def vit_fused_kernel(patches_ref, wp_ref, bp_ref, cls_ref, pos_ref, hblk_ref,
                     wqkv_ref, bqkv_ref, wo_ref, bo_ref,
                     g1_ref, bn1_ref, w1_ref, b1_ref, w2_ref, b2_ref,
                     g2_ref, bn2_ref, gn_ref, bn_ref,
                     out_ref, h_ref, *, num_heads, B, P, TP, PR0):
    d = pl.program_id(0)
    E = wp_ref.shape[1]
    D = E // num_heads
    scale = 1.0 / float(D) ** 0.5

    # ---- grid step 0: patch embedding + cls token + positional embedding ----
    @pl.when(d == 0)
    def _():
        h_ref[...] = jnp.zeros_like(h_ref)                 # zero pad rows too
        # one stacked (B*P, pd) @ (pd, E) matmul, no per-batch dot loop
        emb = jnp.dot(patches_ref[...], wp_ref[...],
                      preferred_element_type=jnp.float32) + bp_ref[...]
        pos = pos_ref[...]                                 # (T, E)
        cls_row = cls_ref[...] + pos[0:1, :]               # (1, E)
        body_pos = pos[1:, :]                              # (P, E)
        for a in range(B):                                 # aligned static stores
            h_ref[pl.ds(a * TP, 1), :] = cls_row
            h_ref[pl.ds(a * TP + PR0, P), :] = emb[a * P:(a + 1) * P, :] + body_pos

    h = h_ref[...]                                         # (B*TP, E), resident

    # ---- fused QKV projection: one stacked matmul against (E, 3E) ----
    qkv = jnp.dot(h, wqkv_ref[0], preferred_element_type=jnp.float32) + bqkv_ref[0]
    q = qkv[:, :E]
    k = qkv[:, E:2 * E]
    v = qkv[:, 2 * E:]

    # Block-diagonal head matrix (hoisted: built once in the wrapper).
    # (q*k_s) @ head_blk gives per-head scores replicated across that head's D
    # lanes, so attention stays lane-dense with no per-head slicing/reshape.
    head_blk = hblk_ref[...]

    # NOTE: the PyTorch reference feeds batch-first (B,T,E) into a seq-first
    # nn.MultiheadAttention, so attention runs across the batch axis B for every
    # token/head.  Enumerate the B key-batches by rotating the flat (B*TP, E)
    # K/V streams in whole-batch strides (pltpu.roll -> XLU); row a*TP+t of the
    # rotation holds some batch b at token t, so pad rows only ever meet pad
    # rows.  Streaming (online) softmax: only m / den / acc stay live.
    m = None
    den = None
    acc = None
    for sft in range(B):
        if sft == 0:
            k_s, v_s = k, v
        else:
            k_s = pltpu.roll(k, shift=sft * TP, axis=0)
            v_s = pltpu.roll(v, shift=sft * TP, axis=0)
        s = jnp.dot(q * k_s, head_blk, preferred_element_type=jnp.float32) * scale
        if sft == 0:
            m = s
            den = jnp.ones_like(s)                         # exp(s - m) == 1
            acc = v_s
        else:
            m_new = jnp.maximum(m, s)
            alpha = jnp.exp(m - m_new)
            p = jnp.exp(s - m_new)
            den = alpha * den + p
            acc = alpha * acc + p * v_s
            m = m_new
    # normalize once; default (non-approx) reciprocal keeps 1e-3 agreement.
    o = acc * pl.reciprocal(den)                           # (B*TP, E)

    attn = jnp.dot(o, wo_ref[0], preferred_element_type=jnp.float32) + bo_ref[0]
    y = _layer_norm(h + attn, g1_ref[0], bn1_ref[0])

    # ---- FFN: stacked (B*TP, E) matmuls ----
    hid = jnp.maximum(
        jnp.dot(y, w1_ref[0], preferred_element_type=jnp.float32) + b1_ref[0], 0.0)
    f = jnp.dot(hid, w2_ref[0], preferred_element_type=jnp.float32) + b2_ref[0]
    h_new = _layer_norm(y + f, g2_ref[0], bn2_ref[0])

    h_ref[...] = h_new                                     # stays in VMEM for layer d+1

    # ---- last grid step: final LayerNorm on the cls rows only -> (B, E) ----
    @pl.when(d == pl.num_programs(0) - 1)
    def _():
        cls_rows = jnp.concatenate(
            [h_new[a * TP:a * TP + 1, :] for a in range(B)], axis=0)   # (B, E)
        out_ref[...] = _layer_norm(cls_rows, gn_ref[...], bn_ref[...])


# ---------------------------------------------------------------------------
# Glue: patch extraction, parameter init / stacking, full forward
# ---------------------------------------------------------------------------
def reshape_to_patches(x, patch_size):
    B, G, _ = x.shape
    p = patch_size
    x = x.reshape(B, G // p, p, G // p, p)
    x = x.transpose(0, 1, 3, 2, 4)
    return x.reshape(B, -1, p * p)


def init_params(key, *, patch_dim, embed_dim, ff_dim, num_patches, depth):
    keys = jax.random.split(key, 4 + depth)

    def lin(k, fi, fo):
        return jax.random.normal(k, (fi, fo), jnp.float32) * 0.02

    params = {
        'wp': lin(keys[0], patch_dim, embed_dim),
        'bp': jnp.zeros((1, embed_dim), jnp.float32),
        'cls': jax.random.normal(keys[1], (1, embed_dim), jnp.float32),
        'pos': jax.random.normal(keys[2], (num_patches + 1, embed_dim), jnp.float32),
        'gn': jnp.ones((1, embed_dim), jnp.float32),
        'bn': jnp.zeros((1, embed_dim), jnp.float32),
        'layers': [],
    }
    for d in range(depth):
        lk = jax.random.split(keys[4 + d], 6)
        params['layers'].append({
            'wq': lin(lk[0], embed_dim, embed_dim), 'bq': jnp.zeros((1, embed_dim), jnp.float32),
            'wk': lin(lk[1], embed_dim, embed_dim), 'bk': jnp.zeros((1, embed_dim), jnp.float32),
            'wv': lin(lk[2], embed_dim, embed_dim), 'bv': jnp.zeros((1, embed_dim), jnp.float32),
            'wo': lin(lk[3], embed_dim, embed_dim), 'bo': jnp.zeros((1, embed_dim), jnp.float32),
            'g1': jnp.ones((1, embed_dim), jnp.float32), 'bn1': jnp.zeros((1, embed_dim), jnp.float32),
            'w1': lin(lk[4], embed_dim, ff_dim), 'b1': jnp.zeros((1, ff_dim), jnp.float32),
            'w2': lin(lk[5], ff_dim, embed_dim), 'b2': jnp.zeros((1, embed_dim), jnp.float32),
            'g2': jnp.ones((1, embed_dim), jnp.float32), 'bn2': jnp.zeros((1, embed_dim), jnp.float32),
        })
    return params


def stack_layer_params(layers):
    wqkv = jnp.stack([jnp.concatenate([lp['wq'], lp['wk'], lp['wv']], axis=1)
                      for lp in layers])                   # (depth, E, 3E)
    bqkv = jnp.stack([jnp.concatenate([lp['bq'], lp['bk'], lp['bv']], axis=1)
                      for lp in layers])                   # (depth, 1, 3E)
    names = ('wo', 'bo', 'g1', 'bn1', 'w1', 'b1', 'w2', 'b2', 'g2', 'bn2')
    return (wqkv, bqkv) + tuple(jnp.stack([lp[n] for lp in layers]) for n in names)


def _full_spec(shape):
    return pl.BlockSpec(shape, lambda d: tuple(0 for _ in shape))


def _per_layer_spec(shape):
    return pl.BlockSpec((1,) + shape[1:],
                        lambda d: (d,) + tuple(0 for _ in shape[1:]))


@functools.partial(jax.jit, static_argnames=("patch_size", "num_heads"))
def transformer_encoder_forward(x, params, *, patch_size, num_heads):
    patches = reshape_to_patches(x, patch_size)            # (B, P, pd)
    B, P, pd = patches.shape
    E = params['wp'].shape[1]
    depth = len(params['layers'])
    assert E % num_heads == 0
    D = E // num_heads

    PR0 = 8                                                # patch rows start (8-aligned)
    TP = PR0 + ((P + 7) // 8) * 8                          # padded rows per batch
    patches_flat = patches.reshape(B * P, pd)
    stacked = stack_layer_params(params['layers'])

    # Block-diagonal head matrix, built once (grid-invariant kernel input).
    hr = jnp.arange(E)[:, None] // D
    hc = jnp.arange(E)[None, :] // D
    head_blk = (hr == hc).astype(jnp.float32)              # (E, E)

    in_specs = [
        _full_spec((B * P, pd)),                           # patches
        _full_spec(params['wp'].shape),                    # wp
        _full_spec((1, E)),                                # bp
        _full_spec((1, E)),                                # cls
        _full_spec(params['pos'].shape),                   # pos
        _full_spec((E, E)),                                # head_blk
    ] + [_per_layer_spec(s.shape) for s in stacked] + [
        _full_spec((1, E)),                                # gn
        _full_spec((1, E)),                                # bn
    ]

    kernel = functools.partial(vit_fused_kernel, num_heads=num_heads,
                               B=B, P=P, TP=TP, PR0=PR0)

    return pl.pallas_call(
        kernel,
        out_shape=jax.ShapeDtypeStruct((B, E), jnp.float32),
        grid_spec=pltpu.PrefetchScalarGridSpec(
            num_scalar_prefetch=0,
            grid=(depth,),
            in_specs=in_specs,
            out_specs=pl.BlockSpec((B, E), lambda d: (0, 0)),
            scratch_shapes=[pltpu.VMEM((B * TP, E), jnp.float32)],
        ),
        compiler_params=pltpu.CompilerParams(
            dimension_semantics=("arbitrary",),             # depth is sequential
            vmem_limit_bytes=48 * 1024 * 1024),             # explicit headroom (<=v7x 64MiB)
    )(patches_flat, params['wp'], params['bp'], params['cls'], params['pos'],
      head_blk, *stacked, params['gn'], params['bn'])


# Pure-JAX reference (mirrors the PyTorch semantics, incl. attention over batch axis)
def reference_forward(x, params, *, patch_size, num_heads):
    B, _, _ = x.shape
    E = params['wp'].shape[1]
    patches = reshape_to_patches(x, patch_size)
    h = patches @ params['wp'] + params['bp']
    cls = jnp.broadcast_to(params['cls'][None], (B, 1, E))
    h = jnp.concatenate([cls, h], axis=1) + params['pos'][None]

    def ln(z, g, b, eps=1e-5):
        mu = z.mean(-1, keepdims=True)
        var = ((z - mu) ** 2).mean(-1, keepdims=True)
        return (z - mu) * jax.lax.rsqrt(var + eps) * g + b

    for lp in params['layers']:
        T = h.shape[1]
        H = num_heads
        D = E // H
        q = (h @ lp['wq'] + lp['bq']).reshape(B, T, H, D)
        k = (h @ lp['wk'] + lp['bk']).reshape(B, T, H, D)
        v = (h @ lp['wv'] + lp['bv']).reshape(B, T, H, D)
        s = jnp.einsum('athd,bthd->thab', q, k) * (1.0 / (float(D) ** 0.5))
        p = jax.nn.softmax(s, axis=-1)
        o = jnp.einsum('thab,bthd->athd', p, v).reshape(B, T, E)
        attn = o @ lp['wo'] + lp['bo']
        h = ln(h + attn, lp['g1'], lp['bn1'])
        f = jnp.maximum(h @ lp['w1'] + lp['b1'], 0.0) @ lp['w2'] + lp['b2']
        h = ln(h + f, lp['g2'], lp['bn2'])
    h = ln(h, params['gn'], params['bn'])
    return h[:, 0]


if __name__ == "__main__":
    GRID, PATCH, EMBED, HEADS, DEPTH, FF = 16, 2, 32, 4, 2, 64
    BATCH = 2
    NUM_PATCHES = (GRID // PATCH) ** 2

    key = jax.random.PRNGKey(0)
    kx, kp = jax.random.split(key)
    x = jax.random.normal(kx, (BATCH, GRID, GRID), jnp.float32)
    params = init_params(kp, patch_dim=PATCH * PATCH, embed_dim=EMBED,
                         ff_dim=FF, num_patches=NUM_PATCHES, depth=DEPTH)

    out = transformer_encoder_forward(x, params, patch_size=PATCH, num_heads=HEADS)
    out = jax.block_until_ready(out)

    ref = reference_forward(x, params, patch_size=PATCH, num_heads=HEADS)
    assert out.shape == (BATCH, EMBED), out.shape
    assert bool(jnp.all(jnp.isfinite(out)))
    assert bool(jnp.allclose(out, ref, atol=1e-3, rtol=1e-3)), "mismatch vs reference"

    print("KERNEL_OK")
</pallas_src>

<mosaic_0001>
module attributes {stable_mosaic.version = 11 : i64} {
  func.func @vit_fused_kernel(%arg0: i32, %arg1: memref<128x4xf32, #tpu.memory_space<vmem>>, %arg2: memref<4x32xf32, #tpu.memory_space<vmem>>, %arg3: memref<1x32xf32, #tpu.memory_space<vmem>>, %arg4: memref<1x32xf32, #tpu.memory_space<vmem>>, %arg5: memref<65x32xf32, #tpu.memory_space<vmem>>, %arg6: memref<32x32xf32, #tpu.memory_space<vmem>>, %arg7: memref<1x32x96xf32, #tpu.memory_space<vmem>>, %arg8: memref<1x1x96xf32, #tpu.memory_space<vmem>>, %arg9: memref<1x32x32xf32, #tpu.memory_space<vmem>>, %arg10: memref<1x1x32xf32, #tpu.memory_space<vmem>>, %arg11: memref<1x1x32xf32, #tpu.memory_space<vmem>>, %arg12: memref<1x1x32xf32, #tpu.memory_space<vmem>>, %arg13: memref<1x32x64xf32, #tpu.memory_space<vmem>>, %arg14: memref<1x1x64xf32, #tpu.memory_space<vmem>>, %arg15: memref<1x64x32xf32, #tpu.memory_space<vmem>>, %arg16: memref<1x1x32xf32, #tpu.memory_space<vmem>>, %arg17: memref<1x1x32xf32, #tpu.memory_space<vmem>>, %arg18: memref<1x1x32xf32, #tpu.memory_space<vmem>>, %arg19: memref<1x32xf32, #tpu.memory_space<vmem>>, %arg20: memref<1x32xf32, #tpu.memory_space<vmem>>, %arg21: memref<2x32xf32, #tpu.memory_space<vmem>>, %arg22: memref<144x32xf32, #tpu.memory_space<vmem>>) attributes {dimension_semantics = [#tpu.dimension_semantics<arbitrary>], iteration_bounds = array<i64: 2>, scalar_prefetch = 0 : i64, scratch_operands = 1 : i64, tpu.core_type = #tpu.core_type<tc>, window_params = [{pipeline_mode = #tpu.pipeline_mode<synchronous>, transform_indices = @transform_0, window_bounds = array<i64: 128, 4>}, {pipeline_mode = #tpu.pipeline_mode<synchronous>, transform_indices = @transform_1, window_bounds = array<i64: 4, 32>}, {pipeline_mode = #tpu.pipeline_mode<synchronous>, transform_indices = @transform_2, window_bounds = array<i64: 1, 32>}, {pipeline_mode = #tpu.pipeline_mode<synchronous>, transform_indices = @transform_3, window_bounds = array<i64: 1, 32>}, {pipeline_mode = #tpu.pipeline_mode<synchronous>, transform_indices = @transform_4, window_bounds = array<i64: 65, 32>}, {pipeline_mode = #tpu.pipeline_mode<synchronous>, transform_indices = @transform_5, window_bounds = array<i64: 32, 32>}, {transform_indices = @transform_6, window_bounds = array<i64: 1, 32, 96>}, {transform_indices = @transform_7, window_bounds = array<i64: 1, 1, 96>}, {transform_indices = @transform_8, window_bounds = array<i64: 1, 32, 32>}, {transform_indices = @transform_9, window_bounds = array<i64: 1, 1, 32>}, {transform_indices = @transform_10, window_bounds = array<i64: 1, 1, 32>}, {transform_indices = @transform_11, window_bounds = array<i64: 1, 1, 32>}, {transform_indices = @transform_12, window_bounds = array<i64: 1, 32, 64>}, {transform_indices = @transform_13, window_bounds = array<i64: 1, 1, 64>}, {transform_indices = @transform_14, window_bounds = array<i64: 1, 64, 32>}, {transform_indices = @transform_15, window_bounds = array<i64: 1, 1, 32>}, {transform_indices = @transform_16, window_bounds = array<i64: 1, 1, 32>}, {transform_indices = @transform_17, window_bounds = array<i64: 1, 1, 32>}, {pipeline_mode = #tpu.pipeline_mode<synchronous>, transform_indices = @transform_18, window_bounds = array<i64: 1, 32>}, {pipeline_mode = #tpu.pipeline_mode<synchronous>, transform_indices = @transform_19, window_bounds = array<i64: 1, 32>}, {pipeline_mode = #tpu.pipeline_mode<synchronous>, transform_indices = @transform_20, window_bounds = array<i64: 2, 32>}]} {
    %c0_i32 = arith.constant 0 : i32
    %0 = arith.cmpi eq, %arg0, %c0_i32 : i32
    %1 = arith.extui %0 : i1 to i32
    %c0_i32_0 = arith.constant 0 : i32
    %2 = arith.cmpi ne, %1, %c0_i32_0 : i32
    scf.if %2 {
      %cst_63 = arith.constant 0.000000e+00 : f32
      %119 = vector.broadcast %cst_63 : f32 to vector<144x32xf32>
      %c0_64 = arith.constant 0 : index
      %c0_65 = arith.constant 0 : index
      %120 = vector.load %arg22[%c0_64, %c0_65] : memref<144x32xf32, #tpu.memory_space<vmem>>, vector<144x32xf32>
      tpu.vector_store %arg22[%c0_64, %c0_65], %119 {strides = array<i32>} : memref<144x32xf32, #tpu.memory_space<vmem>>, vector<144x32xf32>,
      %c0_66 = arith.constant 0 : index
      %c0_67 = arith.constant 0 : index
      %121 = vector.load %arg1[%c0_66, %c0_67] : memref<128x4xf32, #tpu.memory_space<vmem>>, vector<128x4xf32>
      %c0_68 = arith.constant 0 : index
      %c0_69 = arith.constant 0 : index
      %122 = vector.load %arg2[%c0_68, %c0_69] : memref<4x32xf32, #tpu.memory_space<vmem>>, vector<4x32xf32>
      %cst_70 = arith.constant dense<0.000000e+00> : vector<128x32xf32>
      %123 = tpu.matmul %121, %122, %cst_70 {dimension_numbers = #tpu.dot_dimension_numbers<[1], [0], [0], [1], [0, 0, 1, 1], [], []>} : vector<128x4xf32>, vector<4x32xf32>, vector<128x32xf32> -> vector<128x32xf32>
      %c0_71 = arith.constant 0 : index
      %c0_72 = arith.constant 0 : index
      %124 = vector.load %arg3[%c0_71, %c0_72] : memref<1x32xf32, #tpu.memory_space<vmem>>, vector<1x32xf32>
      %125 = vector.broadcast %124 : vector<1x32xf32> to vector<128x32xf32>
      %126 = arith.addf %123, %125 : vector<128x32xf32>
      %c0_73 = arith.constant 0 : index
      %c0_74 = arith.constant 0 : index
      %127 = vector.load %arg5[%c0_73, %c0_74] : memref<65x32xf32, #tpu.memory_space<vmem>>, vector<65x32xf32>
      %c0_75 = arith.constant 0 : index
      %c0_76 = arith.constant 0 : index
      %128 = vector.load %arg4[%c0_75, %c0_76] : memref<1x32xf32, #tpu.memory_space<vmem>>, vector<1x32xf32>
      %129 = vector.extract_strided_slice %127 {offsets = [0, 0], sizes = [1, 32], strides = [1, 1]} : vector<65x32xf32> to vector<1x32xf32>
      %130 = arith.addf %128, %129 : vector<1x32xf32>
      %131 = vector.extract_strided_slice %127 {offsets = [1, 0], sizes = [64, 32], strides = [1, 1]} : vector<65x32xf32> to vector<64x32xf32>
      %c0_77 = arith.constant 0 : index
      %c0_78 = arith.constant 0 : index
      %132 = vector.load %arg22[%c0_77, %c0_78] : memref<144x32xf32, #tpu.memory_space<vmem>>, vector<1x32xf32>
      tpu.vector_store %arg22[%c0_77, %c0_78], %130 {strides = array<i32>} : memref<144x32xf32, #tpu.memory_space<vmem>>, vector<1x32xf32>,
      %133 = vector.extract_strided_slice %126 {offsets = [0, 0], sizes = [64, 32], strides = [1, 1]} : vector<128x32xf32> to vector<64x32xf32>
      %134 = arith.addf %133, %131 : vector<64x32xf32>
      %c8 = arith.constant 8 : index
      %c0_79 = arith.constant 0 : index
      %135 = vector.load %arg22[%c8, %c0_79] : memref<144x32xf32, #tpu.memory_space<vmem>>, vector<64x32xf32>
      tpu.vector_store %arg22[%c8, %c0_79], %134 {strides = array<i32>} : memref<144x32xf32, #tpu.memory_space<vmem>>, vector<64x32xf32>,
      %c72 = arith.constant 72 : index
      %c0_80 = arith.constant 0 : index
      %136 = vector.load %arg22[%c72, %c0_80] : memref<144x32xf32, #tpu.memory_space<vmem>>, vector<1x32xf32>
      tpu.vector_store %arg22[%c72, %c0_80], %130 {strides = array<i32>} : memref<144x32xf32, #tpu.memory_space<vmem>>, vector<1x32xf32>,
      %137 = vector.extract_strided_slice %126 {offsets = [64, 0], sizes = [64, 32], strides = [1, 1]} : vector<128x32xf32> to vector<64x32xf32>
      %138 = arith.addf %137, %131 : vector<64x32xf32>
      %c80 = arith.constant 80 : index
      %c0_81 = arith.constant 0 : index
      %139 = vector.load %arg22[%c80, %c0_81] : memref<144x32xf32, #tpu.memory_space<vmem>>, vector<64x32xf32>
      tpu.vector_store %arg22[%c80, %c0_81], %138 {strides = array<i32>} : memref<144x32xf32, #tpu.memory_space<vmem>>, vector<64x32xf32>,
    } else {
    }
    %c0 = arith.constant 0 : index
    %c0_1 = arith.constant 0 : index
    %3 = vector.load %arg22[%c0, %c0_1] : memref<144x32xf32, #tpu.memory_space<vmem>>, vector<144x32xf32>
    %c0_2 = arith.constant 0 : index
    %c0_3 = arith.constant 0 : index
    %c0_4 = arith.constant 0 : index
    %4 = vector.load %arg7[%c0_2, %c0_3, %c0_4] : memref<1x32x96xf32, #tpu.memory_space<vmem>>, vector<1x32x96xf32>
    %5 = vector.shape_cast %4 : vector<1x32x96xf32> to vector<32x96xf32>
    %cst = arith.constant dense<0.000000e+00> : vector<144x96xf32>
    %6 = tpu.matmul %3, %5, %cst {dimension_numbers = #tpu.dot_dimension_numbers<[1], [0], [0], [1], [0, 0, 1, 1], [], []>} : vector<144x32xf32>, vector<32x96xf32>, vector<144x96xf32> -> vector<144x96xf32>
    %c0_5 = arith.constant 0 : index
    %c0_6 = arith.constant 0 : index
    %c0_7 = arith.constant 0 : index
    %7 = vector.load %arg8[%c0_5, %c0_6, %c0_7] : memref<1x1x96xf32, #tpu.memory_space<vmem>>, vector<1x1x96xf32>
    %8 = vector.shape_cast %7 : vector<1x1x96xf32> to vector<1x96xf32>
    %9 = vector.broadcast %8 : vector<1x96xf32> to vector<144x96xf32>
    %10 = arith.addf %6, %9 : vector<144x96xf32>
    %11 = vector.extract_strided_slice %10 {offsets = [0, 0], sizes = [144, 32], strides = [1, 1]} : vector<144x96xf32> to vector<144x32xf32>
    %12 = vector.extract_strided_slice %10 {offsets = [0, 32], sizes = [144, 32], strides = [1, 1]} : vector<144x96xf32> to vector<144x32xf32>
    %13 = vector.extract_strided_slice %10 {offsets = [0, 64], sizes = [144, 32], strides = [1, 1]} : vector<144x96xf32> to vector<144x32xf32>
    %c0_8 = arith.constant 0 : index
    %c0_9 = arith.constant 0 : index
    %14 = vector.load %arg6[%c0_8, %c0_9] : memref<32x32xf32, #tpu.memory_space<vmem>>, vector<32x32xf32>
    %15 = arith.mulf %11, %12 : vector<144x32xf32>
    %cst_10 = arith.constant dense<0.000000e+00> : vector<144x32xf32>
    %16 = tpu.matmul %15, %14, %cst_10 {dimension_numbers = #tpu.dot_dimension_numbers<[1], [0], [0], [1], [0, 0, 1, 1], [], []>} : vector<144x32xf32>, vector<32x32xf32>, vector<144x32xf32> -> vector<144x32xf32>
    %cst_11 = arith.constant 0.353553385 : f32
    %17 = vector.broadcast %cst_11 : f32 to vector<144x32xf32>
    %18 = arith.mulf %16, %17 : vector<144x32xf32>
    %cst_12 = arith.constant 1.000000e+00 : f32
    %19 = vector.broadcast %cst_12 : f32 to vector<144x32xf32>
    %c72_i32 = arith.constant 72 : i32
    %20 = tpu.dynamic_rotate %12 by %c72_i32 dim 0 : vector<144x32xf32>, i32 -> vector<144x32xf32>
    %c72_i32_13 = arith.constant 72 : i32
    %21 = tpu.dynamic_rotate %13 by %c72_i32_13 dim 0 : vector<144x32xf32>, i32 -> vector<144x32xf32>
    %22 = arith.mulf %11, %20 : vector<144x32xf32>
    %cst_14 = arith.constant dense<0.000000e+00> : vector<144x32xf32>
    %23 = tpu.matmul %22, %14, %cst_14 {dimension_numbers = #tpu.dot_dimension_numbers<[1], [0], [0], [1], [0, 0, 1, 1], [], []>} : vector<144x32xf32>, vector<32x32xf32>, vector<144x32xf32> -> vector<144x32xf32>
    %cst_15 = arith.constant 0.353553385 : f32
    %24 = vector.broadcast %cst_15 : f32 to vector<144x32xf32>
    %25 = arith.mulf %23, %24 : vector<144x32xf32>
    %26 = arith.maximumf %18, %25 : vector<144x32xf32>
    %27 = arith.subf %18, %26 : vector<144x32xf32>
    %28 = math.exp %27 : vector<144x32xf32>
    %29 = arith.subf %25, %26 : vector<144x32xf32>
    %30 = math.exp %29 : vector<144x32xf32>
    %31 = arith.mulf %28, %19 : vector<144x32xf32>
    %32 = arith.addf %31, %30 : vector<144x32xf32>
    %33 = arith.mulf %28, %13 : vector<144x32xf32>
    %34 = arith.mulf %30, %21 : vector<144x32xf32>
    %35 = arith.addf %33, %34 : vector<144x32xf32>
    %36 = tpu.reciprocal %32 : vector<144x32xf32> -> vector<144x32xf32>
    %37 = arith.mulf %35, %36 : vector<144x32xf32>
    %c0_16 = arith.constant 0 : index
    %c0_17 = arith.constant 0 : index
    %c0_18 = arith.constant 0 : index
    %38 = vector.load %arg9[%c0_16, %c0_17, %c0_18] : memref<1x32x32xf32, #tpu.memory_space<vmem>>, vector<1x32x32xf32>
    %39 = vector.shape_cast %38 : vector<1x32x32xf32> to vector<32x32xf32>
    %cst_19 = arith.constant dense<0.000000e+00> : vector<144x32xf32>
    %40 = tpu.matmul %37, %39, %cst_19 {dimension_numbers = #tpu.dot_dimension_numbers<[1], [0], [0], [1], [0, 0, 1, 1], [], []>} : vector<144x32xf32>, vector<32x32xf32>, vector<144x32xf32> -> vector<144x32xf32>
    %c0_20 = arith.constant 0 : index
    %c0_21 = arith.constant 0 : index
    %c0_22 = arith.constant 0 : index
    %41 = vector.load %arg10[%c0_20, %c0_21, %c0_22] : memref<1x1x32xf32, #tpu.memory_space<vmem>>, vector<1x1x32xf32>
    %42 = vector.shape_cast %41 : vector<1x1x32xf32> to vector<1x32xf32>
    %43 = vector.broadcast %42 : vector<1x32xf32> to vector<144x32xf32>
    %44 = arith.addf %40, %43 : vector<144x32xf32>
    %45 = arith.addf %3, %44 : vector<144x32xf32>
    %c0_23 = arith.constant 0 : index
    %c0_24 = arith.constant 0 : index
    %c0_25 = arith.constant 0 : index
    %46 = vector.load %arg11[%c0_23, %c0_24, %c0_25] : memref<1x1x32xf32, #tpu.memory_space<vmem>>, vector<1x1x32xf32>
    %47 = vector.shape_cast %46 : vector<1x1x32xf32> to vector<1x32xf32>
    %c0_26 = arith.constant 0 : index
    %c0_27 = arith.constant 0 : index
    %c0_28 = arith.constant 0 : index
    %48 = vector.load %arg12[%c0_26, %c0_27, %c0_28] : memref<1x1x32xf32, #tpu.memory_space<vmem>>, vector<1x1x32xf32>
    %49 = vector.shape_cast %48 : vector<1x1x32xf32> to vector<1x32xf32>
    %cst_29 = arith.constant dense<0.000000e+00> : vector<144xf32>
    %50 = vector.multi_reduction <add>, %45, %cst_29 [1] : vector<144x32xf32> to vector<144xf32>
    %51 = vector.shape_cast %50 : vector<144xf32> to vector<144x1xf32>
    %cst_30 = arith.constant 3.200000e+01 : f32
    %52 = vector.broadcast %cst_30 : f32 to vector<144x1xf32>
    %53 = arith.divf %51, %52 : vector<144x1xf32>
    %54 = vector.broadcast %53 : vector<144x1xf32> to vector<144x32xf32>
    %55 = arith.subf %45, %54 : vector<144x32xf32>
    %56 = arith.mulf %55, %55 : vector<144x32xf32>
    %cst_31 = arith.constant dense<0.000000e+00> : vector<144xf32>
    %57 = vector.multi_reduction <add>, %56, %cst_31 [1] : vector<144x32xf32> to vector<144xf32>
    %58 = vector.shape_cast %57 : vector<144xf32> to vector<144x1xf32>
    %cst_32 = arith.constant 3.200000e+01 : f32
    %59 = vector.broadcast %cst_32 : f32 to vector<144x1xf32>
    %60 = arith.divf %58, %59 : vector<144x1xf32>
    %61 = vector.broadcast %53 : vector<144x1xf32> to vector<144x32xf32>
    %62 = arith.subf %45, %61 : vector<144x32xf32>
    %cst_33 = arith.constant 9.99999974E-6 : f32
    %63 = vector.broadcast %cst_33 : f32 to vector<144x1xf32>
    %64 = arith.addf %60, %63 : vector<144x1xf32>
    %65 = math.rsqrt %64 : vector<144x1xf32>
    %66 = vector.broadcast %65 : vector<144x1xf32> to vector<144x32xf32>
    %67 = arith.mulf %62, %66 : vector<144x32xf32>
    %68 = vector.broadcast %47 : vector<1x32xf32> to vector<144x32xf32>
    %69 = arith.mulf %67, %68 : vector<144x32xf32>
    %70 = vector.broadcast %49 : vector<1x32xf32> to vector<144x32xf32>
    %71 = arith.addf %69, %70 : vector<144x32xf32>
    %c0_34 = arith.constant 0 : index
    %c0_35 = arith.constant 0 : index
    %c0_36 = arith.constant 0 : index
    %72 = vector.load %arg13[%c0_34, %c0_35, %c0_36] : memref<1x32x64xf32, #tpu.memory_space<vmem>>, vector<1x32x64xf32>
    %73 = vector.shape_cast %72 : vector<1x32x64xf32> to vector<32x64xf32>
    %cst_37 = arith.constant dense<0.000000e+00> : vector<144x64xf32>
    %74 = tpu.matmul %71, %73, %cst_37 {dimension_numbers = #tpu.dot_dimension_numbers<[1], [0], [0], [1], [0, 0, 1, 1], [], []>} : vector<144x32xf32>, vector<32x64xf32>, vector<144x64xf32> -> vector<144x64xf32>
    %c0_38 = arith.constant 0 : index
    %c0_39 = arith.constant 0 : index
    %c0_40 = arith.constant 0 : index
    %75 = vector.load %arg14[%c0_38, %c0_39, %c0_40] : memref<1x1x64xf32, #tpu.memory_space<vmem>>, vector<1x1x64xf32>
    %76 = vector.shape_cast %75 : vector<1x1x64xf32> to vector<1x64xf32>
    %77 = vector.broadcast %76 : vector<1x64xf32> to vector<144x64xf32>
    %78 = arith.addf %74, %77 : vector<144x64xf32>
    %cst_41 = arith.constant 0.000000e+00 : f32
    %79 = vector.broadcast %cst_41 : f32 to vector<144x64xf32>
    %80 = arith.maximumf %78, %79 : vector<144x64xf32>
    %c0_42 = arith.constant 0 : index
    %c0_43 = arith.constant 0 : index
    %c0_44 = arith.constant 0 : index
    %81 = vector.load %arg15[%c0_42, %c0_43, %c0_44] : memref<1x64x32xf32, #tpu.memory_space<vmem>>, vector<1x64x32xf32>
    %82 = vector.shape_cast %81 : vector<1x64x32xf32> to vector<64x32xf32>
    %cst_45 = arith.constant dense<0.000000e+00> : vector<144x32xf32>
    %83 = tpu.matmul %80, %82, %cst_45 {dimension_numbers = #tpu.dot_dimension_numbers<[1], [0], [0], [1], [0, 0, 1, 1], [], []>} : vector<144x64xf32>, vector<64x32xf32>, vector<144x32xf32> -> vector<144x32xf32>
    %c0_46 = arith.constant 0 : index
    %c0_47 = arith.constant 0 : index
    %c0_48 = arith.constant 0 : index
    %84 = vector.load %arg16[%c0_46, %c0_47, %c0_48] : memref<1x1x32xf32, #tpu.memory_space<vmem>>, vector<1x1x32xf32>
    %85 = vector.shape_cast %84 : vector<1x1x32xf32> to vector<1x32xf32>
    %86 = vector.broadcast %85 : vector<1x32xf32> to vector<144x32xf32>
    %87 = arith.addf %83, %86 : vector<144x32xf32>
    %88 = arith.addf %71, %87 : vector<144x32xf32>
    %c0_49 = arith.constant 0 : index
    %c0_50 = arith.constant 0 : index
    %c0_51 = arith.constant 0 : index
    %89 = vector.load %arg17[%c0_49, %c0_50, %c0_51] : memref<1x1x32xf32, #tpu.memory_space<vmem>>, vector<1x1x32xf32>
    %90 = vector.shape_cast %89 : vector<1x1x32xf32> to vector<1x32xf32>
    %c0_52 = arith.constant 0 : index
    %c0_53 = arith.constant 0 : index
    %c0_54 = arith.constant 0 : index
    %91 = vector.load %arg18[%c0_52, %c0_53, %c0_54] : memref<1x1x32xf32, #tpu.memory_space<vmem>>, vector<1x1x32xf32>
    %92 = vector.shape_cast %91 : vector<1x1x32xf32> to vector<1x32xf32>
    %cst_55 = arith.constant dense<0.000000e+00> : vector<144xf32>
    %93 = vector.multi_reduction <add>, %88, %cst_55 [1] : vector<144x32xf32> to vector<144xf32>
    %94 = vector.shape_cast %93 : vector<144xf32> to vector<144x1xf32>
    %cst_56 = arith.constant 3.200000e+01 : f32
    %95 = vector.broadcast %cst_56 : f32 to vector<144x1xf32>
    %96 = arith.divf %94, %95 : vector<144x1xf32>
    %97 = vector.broadcast %96 : vector<144x1xf32> to vector<144x32xf32>
    %98 = arith.subf %88, %97 : vector<144x32xf32>
    %99 = arith.mulf %98, %98 : vector<144x32xf32>
    %cst_57 = arith.constant dense<0.000000e+00> : vector<144xf32>
    %100 = vector.multi_reduction <add>, %99, %cst_57 [1] : vector<144x32xf32> to vector<144xf32>
    %101 = vector.shape_cast %100 : vector<144xf32> to vector<144x1xf32>
    %cst_58 = arith.constant 3.200000e+01 : f32
    %102 = vector.broadcast %cst_58 : f32 to vector<144x1xf32>
    %103 = arith.divf %101, %102 : vector<144x1xf32>
    %104 = vector.broadcast %96 : vector<144x1xf32> to vector<144x32xf32>
    %105 = arith.subf %88, %104 : vector<144x32xf32>
    %cst_59 = arith.constant 9.99999974E-6 : f32
    %106 = vector.broadcast %cst_59 : f32 to vector<144x1xf32>
    %107 = arith.addf %103, %106 : vector<144x1xf32>
    %108 = math.rsqrt %107 : vector<144x1xf32>
    %109 = vector.broadcast %108 : vector<144x1xf32> to vector<144x32xf32>
    %110 = arith.mulf %105, %109 : vector<144x32xf32>
    %111 = vector.broadcast %90 : vector<1x32xf32> to vector<144x32xf32>
    %112 = arith.mulf %110, %111 : vector<144x32xf32>
    %113 = vector.broadcast %92 : vector<1x32xf32> to vector<144x32xf32>
    %114 = arith.addf %112, %113 : vector<144x32xf32>
    %c0_60 = arith.constant 0 : index
    %c0_61 = arith.constant 0 : index
    %115 = vector.load %arg22[%c0_60, %c0_61] : memref<144x32xf32, #tpu.memory_space<vmem>>, vector<144x32xf32>
    tpu.vector_store %arg22[%c0_60, %c0_61], %114 {strides = array<i32>} : memref<144x32xf32, #tpu.memory_space<vmem>>, vector<144x32xf32>,
    %c1_i32 = arith.constant 1 : i32
    %116 = arith.cmpi eq, %arg0, %c1_i32 : i32
    %117 = arith.extui %116 : i1 to i32
    %c0_i32_62 = arith.constant 0 : i32
    %118 = arith.cmpi ne, %117, %c0_i32_62 : i32
    scf.if %118 {
      %119 = vector.extract_strided_slice %114 {offsets = [0, 0], sizes = [1, 32], strides = [1, 1]} : vector<144x32xf32> to vector<1x32xf32>
      %120 = vector.extract_strided_slice %114 {offsets = [72, 0], sizes = [1, 32], strides = [1, 1]} : vector<144x32xf32> to vector<1x32xf32>
      %121 = tpu.concatenate %119, %120 in 0 : vector<1x32xf32>, vector<1x32xf32> -> vector<2x32xf32>
      %c0_63 = arith.constant 0 : index
      %c0_64 = arith.constant 0 : index
      %122 = vector.load %arg19[%c0_63, %c0_64] : memref<1x32xf32, #tpu.memory_space<vmem>>, vector<1x32xf32>
      %c0_65 = arith.constant 0 : index
      %c0_66 = arith.constant 0 : index
      %123 = vector.load %arg20[%c0_65, %c0_66] : memref<1x32xf32, #tpu.memory_space<vmem>>, vector<1x32xf32>
      %cst_67 = arith.constant dense<0.000000e+00> : vector<2xf32>
      %124 = vector.multi_reduction <add>, %121, %cst_67 [1] : vector<2x32xf32> to vector<2xf32>
      %125 = vector.shape_cast %124 : vector<2xf32> to vector<2x1xf32>
      %cst_68 = arith.constant 3.200000e+01 : f32
      %126 = vector.broadcast %cst_68 : f32 to vector<2x1xf32>
      %127 = arith.divf %125, %126 : vector<2x1xf32>
      %128 = vector.broadcast %127 : vector<2x1xf32> to vector<2x32xf32>
      %129 = arith.subf %121, %128 : vector<2x32xf32>
      %130 = arith.mulf %129, %129 : vector<2x32xf32>
      %cst_69 = arith.constant dense<0.000000e+00> : vector<2xf32>
      %131 = vector.multi_reduction <add>, %130, %cst_69 [1] : vector<2x32xf32> to vector<2xf32>
      %132 = vector.shape_cast %131 : vector<2xf32> to vector<2x1xf32>
      %cst_70 = arith.constant 3.200000e+01 : f32
      %133 = vector.broadcast %cst_70 : f32 to vector<2x1xf32>
      %134 = arith.divf %132, %133 : vector<2x1xf32>
      %135 = vector.broadcast %127 : vector<2x1xf32> to vector<2x32xf32>
      %136 = arith.subf %121, %135 : vector<2x32xf32>
      %cst_71 = arith.constant 9.99999974E-6 : f32
      %137 = vector.broadcast %cst_71 : f32 to vector<2x1xf32>
      %138 = arith.addf %134, %137 : vector<2x1xf32>
      %139 = math.rsqrt %138 : vector<2x1xf32>
      %140 = vector.broadcast %139 : vector<2x1xf32> to vector<2x32xf32>
      %141 = arith.mulf %136, %140 : vector<2x32xf32>
      %142 = vector.broadcast %122 : vector<1x32xf32> to vector<2x32xf32>
      %143 = arith.mulf %141, %142 : vector<2x32xf32>
      %144 = vector.broadcast %123 : vector<1x32xf32> to vector<2x32xf32>
      %145 = arith.addf %143, %144 : vector<2x32xf32>
      %c0_72 = arith.constant 0 : index
      %c0_73 = arith.constant 0 : index
      %146 = vector.load %arg21[%c0_72, %c0_73] : memref<2x32xf32, #tpu.memory_space<vmem>>, vector<2x32xf32>
      tpu.vector_store %arg21[%c0_72, %c0_73], %145 {strides = array<i32>} : memref<2x32xf32, #tpu.memory_space<vmem>>, vector<2x32xf32>,
    } else {
    }
    return
  }
  func.func @transform_0(%arg0: i32) -> (i32, i32) {
    %c0_i32 = arith.constant 0 : i32
    %c0_i32_0 = arith.constant 0 : i32
    %c0_i32_1 = arith.constant 0 : i32
    return %c0_i32, %c0_i32_0 : i32, i32
  }
  func.func @transform_1(%arg0: i32) -> (i32, i32) {
    %c0_i32 = arith.constant 0 : i32
    %c0_i32_0 = arith.constant 0 : i32
    %c0_i32_1 = arith.constant 0 : i32
    return %c0_i32, %c0_i32_0 : i32, i32
  }
  func.func @transform_2(%arg0: i32) -> (i32, i32) {
    %c0_i32 = arith.constant 0 : i32
    %c0_i32_0 = arith.constant 0 : i32
    %c0_i32_1 = arith.constant 0 : i32
    return %c0_i32, %c0_i32_0 : i32, i32
  }
  func.func @transform_3(%arg0: i32) -> (i32, i32) {
    %c0_i32 = arith.constant 0 : i32
    %c0_i32_0 = arith.constant 0 : i32
    %c0_i32_1 = arith.constant 0 : i32
    return %c0_i32, %c0_i32_0 : i32, i32
  }
  func.func @transform_4(%arg0: i32) -> (i32, i32) {
    %c0_i32 = arith.constant 0 : i32
    %c0_i32_0 = arith.constant 0 : i32
    %c0_i32_1 = arith.constant 0 : i32
    return %c0_i32, %c0_i32_0 : i32, i32
  }
  func.func @transform_5(%arg0: i32) -> (i32, i32) {
    %c0_i32 = arith.constant 0 : i32
    %c0_i32_0 = arith.constant 0 : i32
    %c0_i32_1 = arith.constant 0 : i32
    return %c0_i32, %c0_i32_0 : i32, i32
  }
  func.func @transform_6(%arg0: i32) -> (i32, i32, i32) {
    %c0_i32 = arith.constant 0 : i32
    %c0_i32_0 = arith.constant 0 : i32
    %c0_i32_1 = arith.constant 0 : i32
    return %arg0, %c0_i32, %c0_i32_0 : i32, i32, i32
  }
  func.func @transform_7(%arg0: i32) -> (i32, i32, i32) {
    %c0_i32 = arith.constant 0 : i32
    %c0_i32_0 = arith.constant 0 : i32
    %c0_i32_1 = arith.constant 0 : i32
    return %arg0, %c0_i32, %c0_i32_0 : i32, i32, i32
  }
  func.func @transform_8(%arg0: i32) -> (i32, i32, i32) {
    %c0_i32 = arith.constant 0 : i32
    %c0_i32_0 = arith.constant 0 : i32
    %c0_i32_1 = arith.constant 0 : i32
    return %arg0, %c0_i32, %c0_i32_0 : i32, i32, i32
  }
  func.func @transform_9(%arg0: i32) -> (i32, i32, i32) {
    %c0_i32 = arith.constant 0 : i32
    %c0_i32_0 = arith.constant 0 : i32
    %c0_i32_1 = arith.constant 0 : i32
    return %arg0, %c0_i32, %c0_i32_0 : i32, i32, i32
  }
  func.func @transform_10(%arg0: i32) -> (i32, i32, i32) {
    %c0_i32 = arith.constant 0 : i32
    %c0_i32_0 = arith.constant 0 : i32
    %c0_i32_1 = arith.constant 0 : i32
    return %arg0, %c0_i32, %c0_i32_0 : i32, i32, i32
  }
  func.func @transform_11(%arg0: i32) -> (i32, i32, i32) {
    %c0_i32 = arith.constant 0 : i32
    %c0_i32_0 = arith.constant 0 : i32
    %c0_i32_1 = arith.constant 0 : i32
    return %arg0, %c0_i32, %c0_i32_0 : i32, i32, i32
  }
  func.func @transform_12(%arg0: i32) -> (i32, i32, i32) {
    %c0_i32 = arith.constant 0 : i32
    %c0_i32_0 = arith.constant 0 : i32
    %c0_i32_1 = arith.constant 0 : i32
    return %arg0, %c0_i32, %c0_i32_0 : i32, i32, i32
  }
  func.func @transform_13(%arg0: i32) -> (i32, i32, i32) {
    %c0_i32 = arith.constant 0 : i32
    %c0_i32_0 = arith.constant 0 : i32
    %c0_i32_1 = arith.constant 0 : i32
    return %arg0, %c0_i32, %c0_i32_0 : i32, i32, i32
  }
  func.func @transform_14(%arg0: i32) -> (i32, i32, i32) {
    %c0_i32 = arith.constant 0 : i32
    %c0_i32_0 = arith.constant 0 : i32
    %c0_i32_1 = arith.constant 0 : i32
    return %arg0, %c0_i32, %c0_i32_0 : i32, i32, i32
  }
  func.func @transform_15(%arg0: i32) -> (i32, i32, i32) {
    %c0_i32 = arith.constant 0 : i32
    %c0_i32_0 = arith.constant 0 : i32
    %c0_i32_1 = arith.constant 0 : i32
    return %arg0, %c0_i32, %c0_i32_0 : i32, i32, i32
  }
  func.func @transform_16(%arg0: i32) -> (i32, i32, i32) {
    %c0_i32 = arith.constant 0 : i32
    %c0_i32_0 = arith.constant 0 : i32
    %c0_i32_1 = arith.constant 0 : i32
    return %arg0, %c0_i32, %c0_i32_0 : i32, i32, i32
  }
  func.func @transform_17(%arg0: i32) -> (i32, i32, i32) {
    %c0_i32 = arith.constant 0 : i32
    %c0_i32_0 = arith.constant 0 : i32
    %c0_i32_1 = arith.constant 0 : i32
    return %arg0, %c0_i32, %c0_i32_0 : i32, i32, i32
  }
  func.func @transform_18(%arg0: i32) -> (i32, i32) {
    %c0_i32 = arith.constant 0 : i32
    %c0_i32_0 = arith.constant 0 : i32
    %c0_i32_1 = arith.constant 0 : i32
    return %c0_i32, %c0_i32_0 : i32, i32
  }
  func.func @transform_19(%arg0: i32) -> (i32, i32) {
    %c0_i32 = arith.constant 0 : i32
    %c0_i32_0 = arith.constant 0 : i32
    %c0_i32_1 = arith.constant 0 : i32
    return %c0_i32, %c0_i32_0 : i32, i32
  }
  func.func @transform_20(%arg0: i32) -> (i32, i32) {
    %c0_i32 = arith.constant 0 : i32
    %c0_i32_0 = arith.constant 0 : i32
    %c0_i32_1 = arith.constant 0 : i32
    return %c0_i32, %c0_i32_0 : i32, i32
  }
}

</mosaic_0001>

<bundles_post_ra>
// kernel: transformer_encoder_forward.1
= control target key start
LH: loop header
LB: loop body
LE: loop exit
PB: predicated region body
PF: predicated region fallthrough
CT: control target
= control target key end

     0   :  { %s6124_s0 = inlined_call_operand.vmem [shape: f32[128,4], index: 0, kind: input, shape index: {}]   ;;  %s6125_s1 = inlined_call_operand.vmem [shape: f32[4,32], index: 1, kind: input, shape index: {}]   ;;  %s6126_s2 = inlined_call_operand.vmem [shape: f32[1,32], index: 2, kind: input, shape index: {}]   ;;  %s6127_s3 = inlined_call_operand.vmem [shape: f32[1,32], index: 3, kind: input, shape index: {}]   ;;  %s6128_s4 = inlined_call_operand.vmem [shape: f32[65,32], index: 4, kind: input, shape index: {}]   ;;  %s6129_s5 = inlined_call_operand.vmem [shape: f32[32,32], index: 5, kind: input, shape index: {}]   ;;  %s6130_s6 = inlined_call_operand.vmem [shape: f32[2,32,96], index: 6, kind: input, shape index: {}]   ;;  %s6131_s7 = inlined_call_operand.vmem [shape: f32[2,1,96], index: 7, kind: input, shape index: {}]   ;;  %s6132_s8 = inlined_call_operand.vmem [shape: f32[2,32,32], index: 8, kind: input, shape index: {}]   ;;  %s6133_s9 = inlined_call_operand.vmem [shape: f32[2,1,32], index: 9, kind: input, shape index: {}]   ;;  %s6134_s10 = inlined_call_operand.vmem [shape: f32[2,1,32], index: 10, kind: input, shape index: {}]   ;;  %s6135_s11 = inlined_call_operand.vmem [shape: f32[2,1,32], index: 11, kind: input, shape index: {}]   ;;  %s6136_s12 = inlined_call_operand.vmem [shape: f32[2,32,64], index: 12, kind: input, shape index: {}]   ;;  %s6137_s13 = inlined_call_operand.vmem [shape: f32[2,1,64], index: 13, kind: input, shape index: {}]   ;;  %s6138_s14 = inlined_call_operand.vmem [shape: f32[2,64,32], index: 14, kind: input, shape index: {}]   ;;  %s6139_s15 = inlined_call_operand.vmem [shape: f32[2,1,32], index: 15, kind: input, shape index: {}]   ;;  %s6140_s16 = inlined_call_operand.vmem [shape: f32[2,1,32], index: 16, kind: input, shape index: {}]   ;;  %s6141_s17 = inlined_call_operand.vmem [shape: f32[2,1,32], index: 17, kind: input, shape index: {}]   ;;  %s6142_s18 = inlined_call_operand.vmem [shape: f32[1,32], index: 18, kind: input, shape index: {}]   ;;  %s6143_s19 = inlined_call_operand.vmem [shape: f32[1,32], index: 19, kind: input, shape index: {}]   ;;  %s6144_s20 = inlined_call_operand.hbm [shape: f32[2,32], index: 20, kind: output, shape index: {}]  }
   0x1   :  { %6150 = sst [smem:[#allocation8_spill]] %s6124_s0 }
   0x2   :  { %6151 = sst [smem:[#allocation9_spill]] %s6125_s1 }
   0x3   :  { %6152 = sst [smem:[#allocation10_spill]] %s6126_s2 }
   0x4   :  { %6153 = sst [smem:[#allocation11_spill]] %s6127_s3 }
   0x5   :  { %6154 = sst [smem:[#allocation12_spill]] %s6128_s4 }
   0x6   :  { %6155 = sst [smem:[#allocation13_spill]] %s6130_s6 }
   0x7   :  { %6156 = sst [smem:[#allocation14_spill]] %s6132_s8 }
   0x8   :  { %6157 = sst [smem:[#allocation15_spill]] %s6142_s18 }
   0x9   :  { %6158 = sst [smem:[#allocation16_spill]] %s6143_s19 }
   0xa   :  { %6159 = sst [smem:[#allocation17_spill]] %s6144_s20 }
   0xb   :  { %25 = vsyncpa [#allocation4], 0  ;;  %s4685_s1 = smov 0  }
   0xc LB: > { %6160 = sst [smem:[#allocation6_spill]] %s4574_s1  ;;  %s4691_s22 = sadd.s32 4294967295, %s4574_s1   ;;  %s4574_s1 = sphi %s4685_s1, %s31_s1  }
   0xd   : > { %p3710_p0 = scmp.ge.s32.totalorder %s4574_s1, 1  ;;  %p652_p1 = scmp.lt.s32.totalorder %s4574_s1, 3 }
   0xf   : > { %p653_p2 = pnand %p3710_p0, %p652_p1 }
  0x11   : > { %656 = sbr.rel (%p653_p2) target bundleno = 2556 (0x9fc), region = 100 }
  0x18   : > { %p744_p3 = scmp.lt.s32.totalorder %s4691_s22, 1  ;;  %s6161_s6 = sld [smem:[#allocation13_spill]] }
  0x19   : > { %s6162_s8 = sld [smem:[#allocation14_spill]]  ;;  %p3719_p4 = scmp.ne.s32.totalorder %s4691_s22, 0 }
  0x1a   : > { %s4697_s23 = scalar_select %p744_p3, %s4691_s22, 1 }
  0x1b   : > { %791 = sbr.rel (%p3719_p4) target bundleno = 268 (0x10c), region = 104  ;;  %s6164_s0 = sld [smem:[#allocation9_spill]] (!%p3719_p4)  ;;  %vm884_vm0 = vcmask (!%p3719_p4), 1043456   ;;  %vm835_vm1 = vcmask (!%p3719_p4), 31744   ;;  %vm792_vm2 = vcmask (!%p3719_p4), 261120   ;;  %v4576_v7 = vmov (!%p3719_p4), 0.0  }
  0x1c   : > { %s3861_s24 = sshll.u32 %s4697_s23, 5  ;;  %s781_s2 = scalar_lea.vmem %s6139_s15, %s4697_s23  ;;  %795 = vst.msk [vmem:[#allocation2 + $0x10] sm:$0xff] (!%p3719_p4), %vm792_vm2, %v4576_v7  ;;  %793 = vst.msk [vmem:[#allocation2] sm:$0xff] (!%p3719_p4), %vm792_vm2, %v4576_v7  ;;  %vm1044_vm3 = vcmask (!%p3719_p4), 253952   ;;  %vm1055_vm4 = vcmask (!%p3719_p4), 1046528  }
  0x1d   : > { %s784_s26 = scalar_lea.vmem %s6140_s16, %s4697_s23  ;;  %s6165_s19 = sld [smem:[#allocation8_spill]] (!%p3719_p4)  ;;  %794 = vst.msk [vmem:[#allocation2 + $0x8] sm:$0xff] (!%p3719_p4), %vm792_vm2, %v4576_v7  ;;  %796 = vst.msk [vmem:[#allocation2 + $0x18] sm:$0xff] (!%p3719_p4), %vm792_vm2, %v4576_v7 }
  0x1e   : > { %s4707_s28 = scalar_lea.vmem %s6161_s6, %s3861_s24  ;;  %s4729_s6 = scalar_lea.vmem %s6136_s12, %s3861_s24  ;;  %797 = vst.msk [vmem:[#allocation2 + $0x20] sm:$0xff] (!%p3719_p4), %vm792_vm2, %v4576_v7  ;;  %798 = vst.msk [vmem:[#allocation2 + $0x28] sm:$0xff] (!%p3719_p4), %vm792_vm2, %v4576_v7 }
  0x1f   : > { %s4712_s30 = scalar_lea.vmem %s6162_s8, %s3861_s24  ;;  %s773_s8 = scalar_lea.vmem %s6137_s13, %s4697_s23  ;;  %799 = vst.msk [vmem:[#allocation2 + $0x30] sm:$0xff] (!%p3719_p4), %vm792_vm2, %v4576_v7  ;;  %800 = vst.msk [vmem:[#allocation2 + $0x38] sm:$0xff] (!%p3719_p4), %vm792_vm2, %v4576_v7 }
  0x20   : > { %6163 = sst [smem:[#allocation7_spill]] %s4712_s30  ;;  %s3864_s30 = sshll.u32 %s4697_s23, 6  ;;  %801 = vst.msk [vmem:[#allocation2 + $0x40] sm:$0xff] (!%p3719_p4), %vm792_vm2, %v4576_v7  ;;  %802 = vst.msk [vmem:[#allocation2 + $0x48] sm:$0xff] (!%p3719_p4), %vm792_vm2, %v4576_v7 }
  0x21   : > { %s4739_s1 = scalar_lea.vmem %s6138_s14, %s3864_s30  ;;  %v827_v0 = vld [vmem:[%s6164_s0] sm:$0xf] (!%p3719_p4)  ;;  %803 = vst.msk [vmem:[#allocation2 + $0x50] sm:$0xff] (!%p3719_p4), %vm792_vm2, %v4576_v7  ;;  %804 = vst.msk [vmem:[#allocation2 + $0x58] sm:$0xff] (!%p3719_p4), %vm792_vm2, %v4576_v7  ;;  %s6166_s18 = sld [smem:[#allocation12_spill]] (!%p3719_p4) }
  0x22   : > { %4018 = vmatprep.subr.msk.mxu0 %vm884_vm0, %v827_v0  ;;  %4318 = vmatprep.subr.msk.mxu1 %vm884_vm0, %v827_v0  ;;  %805 = vst.msk [vmem:[#allocation2 + $0x60] sm:$0xff] %vm792_vm2, %v4576_v7  ;;  %806 = vst.msk [vmem:[#allocation2 + $0x68] sm:$0xff] %vm792_vm2, %v4576_v7  ;;  %s6167_s3 = sld [smem:[#allocation11_spill]]  ;;  %s6168_s25 = sld [smem:[#allocation10_spill]] }
  0x23   : > { %v811_v1 = vld [vmem:[%s6165_s19] sm:$0xff]  ;;  %v812_v3 = vld [vmem:[%s6165_s19 + $0x8] sm:$0xff]  ;;  %4019 = vmatpush3.msk.msra.mxu0 %vm884_vm0, %v827_v0  ;;  %4319 = vmatpush3.msk.msra.mxu1 %vm884_vm0, %v827_v0  ;;  %v813_v5 = vld [vmem:[%s6165_s19 + $0x10] sm:$0xff]  ;;  %807 = vst.msk [vmem:[#allocation2 + $0x70] sm:$0xff] %vm792_vm2, %v4576_v7 }
  0x24   : > { %v819_v2 = vld [vmem:[%s6165_s19 + $0x40] sm:$0xff]  ;;  %v820_v4 = vld [vmem:[%s6165_s19 + $0x48] sm:$0xff]  ;;  %v821_v6 = vld [vmem:[%s6165_s19 + $0x50] sm:$0xff]  ;;  %808 = vst.msk [vmem:[#allocation2 + $0x78] sm:$0xff] %vm792_vm2, %v4576_v7  ;;  %4020 = vmatprep.mubr.msk.f32.mxu0 %vm835_vm1, %v811_v1 }
  0x25   : > { %809 = vst.msk [vmem:[#allocation2 + $0x80] sm:$0xff] %vm792_vm2, %v4576_v7  ;;  %810 = vst.msk [vmem:[#allocation2 + $0x88] sm:$0xff] %vm792_vm2, %v4576_v7  ;;  %4032 = vmatprep.mubr.msk.f32.mxu1 %vm835_vm1, %v819_v2  ;;  %4021 = vmatmul.mubr.msk.f32.vlgmr.msra.gmra.mrb[0].mxu0 %vm835_vm1, %v812_v3  ;;  %v814_v8 = vld [vmem:[%s6165_s19 + $0x18] sm:$0xff]  ;;  %v815_v10 = vld [vmem:[%s6165_s19 + $0x20] sm:$0xff] }
  0x26   : > { %4033 = vmatmul.mubr.msk.f32.vlgmr.msra.gmra.mrb[0].mxu1 %vm835_vm1, %v820_v4  ;;  %4023 = vmatprep.mubr.msk.f32.mxu0 %vm835_vm1, %v813_v5  ;;  %v822_v9 = vld [vmem:[%s6165_s19 + $0x58] sm:$0xff]  ;;  %v823_v11 = vld [vmem:[%s6165_s19 + $0x60] sm:$0xff]  ;;  %v816_v12 = vld [vmem:[%s6165_s19 + $0x28] sm:$0xff] }
  0x27   : > { %4035 = vmatprep.mubr.msk.f32.mxu1 %vm835_vm1, %v821_v6  ;;  %v824_v13 = vld [vmem:[%s6165_s19 + $0x68] sm:$0xff]  ;;  %v817_v14 = vld [vmem:[%s6165_s19 + $0x30] sm:$0xff]  ;;  %v818_v16 = vld [vmem:[%s6165_s19 + $0x38] sm:$0xff] }
  0x28   : > { %v825_v15 = vld [vmem:[%s6165_s19 + $0x70] sm:$0xff]  ;;  %v826_v17 = vld [vmem:[%s6165_s19 + $0x78] sm:$0xff]  ;;  %v1033_v18 = vld [vmem:[%s6166_s18] sm:$0xff] }
  0x29   : > { %4024 = vmatmul.mubr.msk.f32.gmra.mrb[2].mxu0 %vm835_vm1, %v814_v8  ;;  %v1042_v19 = vld [vmem:[%s6167_s3] sm:$0x1]  ;;  %v1034_v21 = vld [vmem:[%s6166_s18 + $0x8] sm:$0xff]  ;;  %v1035_v22 = vld [vmem:[%s6166_s18 + $0x10] sm:$0xff]  ;;  %v1056_v25 = vrot.slane %v1033_v18, 1 }
  0x2a   : > { %4036 = vmatmul.mubr.msk.f32.gmra.mrb[2].mxu1 %vm835_vm1, %v822_v9  ;;  %4026 = vmatprep.mubr.msk.f32.mxu0 %vm835_vm1, %v815_v10  ;;  %v1043_v20 = vadd.f32 %v1042_v19, %v1033_v18  ;;  %v1057_v23 = vrot.slane %v1034_v21, 1  ;;  %v1059_v24 = vrot.slane %v1035_v22, 1  ;;  %v1036_v26 = vld [vmem:[%s6166_s18 + $0x18] sm:$0xff]  ;;  %v1037_v27 = vld [vmem:[%s6166_s18 + $0x20] sm:$0xff]  ;;  %v1038_v34 = vld [vmem:[%s6166_s18 + $0x28] sm:$0xff] }
  0x2b   : > { %4038 = vmatprep.mubr.msk.f32.mxu1 %vm835_vm1, %v823_v11  ;;  %v4860_v28 = vld [vmem:[%s6168_s25] ss:$0 sm:$0xff]  ;;  %v1061_v32 = vrot.slane %v1036_v26, 1  ;;  %v1063_v33 = vrot.slane %v1037_v27, 1  ;;  %v4869_v35 = vld [vmem:[%s6166_s18 + $0x30] sm:$0xff]  ;;  %v1065_v45 = vrot.slane %v1038_v34, 1 }
  0x2c   : > { %1045 = vst.msk [vmem:[#allocation2] sm:$0x1] %vm1044_vm3, %v1043_v20  ;;  %1097 = vst.msk [vmem:[#allocation2 + $0x48] sm:$0x1] %vm1044_vm3, %v1043_v20  ;;  %v1060_v30 = vsel %vm1055_vm4, %v1057_v23, %v1059_v24  ;;  %v1058_v39 = vsel %vm1055_vm4, %v1056_v25, %v1057_v23  ;;  %v1067_v46 = vrot.slane %v4869_v35, 1  ;;  %v1040_v57 = vld [vmem:[%s6166_s18 + $0x38] sm:$0xff] }
  0x2d   : > { %4027 = vmatmul.mubr.msk.f32.gmra.mrb[4].mxu0 %vm835_vm1, %v816_v12  ;;  %v1064_v50 = vsel %vm1055_vm4, %v1061_v32, %v1063_v33  ;;  %v1062_v55 = vsel %vm1055_vm4, %v1059_v24, %v1061_v32  ;;  %v1041_v58 = vld [vmem:[%s6166_s18 + $0x40] sm:$0x1]  ;;  %v1069_v4 = vrot.slane %v1040_v57, 1  ;;  %v1066_v9 = vsel %vm1055_vm4, %v1063_v33, %v1065_v45 }
  0x2e   : > { %4039 = vmatmul.mubr.msk.f32.gmra.mrb[4].mxu1 %vm835_vm1, %v824_v13  ;;  %4029 = vmatprep.mubr.msk.f32.mxu0 %vm835_vm1, %v817_v14  ;;  %v1068_v63 = vsel %vm1055_vm4, %v1065_v45, %v1067_v46  ;;  %v1071_v5 = vrot.slane %v1041_v58, 1 }
  0x2f   : > { %4041 = vmatprep.mubr.msk.f32.mxu1 %vm835_vm1, %v825_v15  ;;  %v1070_v23 = vsel %vm1055_vm4, %v1067_v46, %v1069_v4 }
  0x30   : > { %v1072_v18 = vsel %vm1055_vm4, %v1069_v4, %v1071_v5 }
  0x31   : > { %4030 = vmatmul.mubr.msk.f32.gmra.mrb[6].mxu0 %vm835_vm1, %v818_v16 }
  0x32   : > { %4042 = vmatmul.mubr.msk.f32.gmra.mrb[6].mxu1 %vm835_vm1, %v826_v17 }
  0xf8   : > { %v4022_v29 = vpop.f32.mrb[0].mxu0 }
  0xf9   : > { %v4034_v31 = vpop.f32.mrb[0].mxu1  ;;  %v960_v36 = vadd.f32 %v4022_v29, %v4860_v28  ;;  %v954_v38 = vpop.f32.mrb[1].mxu0 }
  0xfa   : > { %v1000_v37 = vadd.f32 %v4034_v31, %v4860_v28  ;;  %v994_v40 = vpop.f32.mrb[1].mxu1  ;;  %v955_v41 = vadd.f32 %v4860_v28, %v954_v38 }
  0xfb   : > { %v995_v42 = vadd.f32 %v4860_v28, %v994_v40  ;;  %v1082_v43 = vadd.f32 %v1060_v30, %v960_v36 }
  0xfc   : > { %v1099_v44 = vadd.f32 %v1060_v30, %v1000_v37  ;;  %v1081_v47 = vadd.f32 %v1058_v39, %v955_v41  ;;  %v4025_v49 = vpop.f32.mrb[2].mxu0 }
  0xfd   : > { %v1098_v48 = vadd.f32 %v1058_v39, %v995_v42  ;;  %v4037_v51 = vpop.f32.mrb[2].mxu1  ;;  %1090 = vst.msk [vmem:[#allocation2 + $0x10] sm:$0xff] %vm792_vm2, %v1082_v43  ;;  %v970_v52 = vadd.f32 %v4025_v49, %v4860_v28  ;;  %v964_v54 = vpop.f32.mrb[3].mxu0 }
  0xfe   : > { %1107 = vst.msk [vmem:[#allocation2 + $0x58] sm:$0xff] %vm792_vm2, %v1099_v44  ;;  %v1010_v53 = vadd.f32 %v4037_v51, %v4860_v28  ;;  %v1004_v56 = vpop.f32.mrb[3].mxu1  ;;  %1089 = vst.msk [vmem:[#allocation2 + $0x8] sm:$0xff] %vm792_vm2, %v1081_v47  ;;  %v965_v59 = vadd.f32 %v4860_v28, %v964_v54 }
  0xff   : > { %1106 = vst.msk [vmem:[#allocation2 + $0x50] sm:$0xff] %vm792_vm2, %v1098_v48  ;;  %v1005_v60 = vadd.f32 %v4860_v28, %v1004_v56  ;;  %v1084_v61 = vadd.f32 %v1064_v50, %v970_v52 }
 0x100   : > { %v1101_v62 = vadd.f32 %v1064_v50, %v1010_v53  ;;  %v1083_v0 = vadd.f32 %v1062_v55, %v965_v59  ;;  %v4028_v2 = vpop.f32.mrb[4].mxu0 }
 0x101   : > { %v1100_v1 = vadd.f32 %v1062_v55, %v1005_v60  ;;  %v4040_v3 = vpop.f32.mrb[4].mxu1  ;;  %1092 = vst.msk [vmem:[#allocation2 + $0x20] sm:$0xff] %vm792_vm2, %v1084_v61  ;;  %v980_v6 = vadd.f32 %v4028_v2, %v4860_v28  ;;  %v974_v8 = vpop.f32.mrb[5].mxu0 }
 0x102   : > { %1109 = vst.msk [vmem:[#allocation2 + $0x68] sm:$0xff] %vm792_vm2, %v1101_v62  ;;  %v1020_v7 = vadd.f32 %v4040_v3, %v4860_v28  ;;  %v1014_v10 = vpop.f32.mrb[5].mxu1  ;;  %1091 = vst.msk [vmem:[#allocation2 + $0x18] sm:$0xff] %vm792_vm2, %v1083_v0  ;;  %v975_v11 = vadd.f32 %v4860_v28, %v974_v8 }
 0x103   : > { %1108 = vst.msk [vmem:[#allocation2 + $0x60] sm:$0xff] %vm792_vm2, %v1100_v1  ;;  %v1015_v12 = vadd.f32 %v4860_v28, %v1014_v10  ;;  %v1086_v13 = vadd.f32 %v1068_v63, %v980_v6 }
 0x104   : > { %v1103_v14 = vadd.f32 %v1068_v63, %v1020_v7  ;;  %v1085_v15 = vadd.f32 %v1066_v9, %v975_v11  ;;  %v4031_v17 = vpop.f32.mrb[6].mxu0 }
 0x105   : > { %v1102_v16 = vadd.f32 %v1066_v9, %v1015_v12  ;;  %v4043_v19 = vpop.f32.mrb[6].mxu1  ;;  %1094 = vst.msk [vmem:[#allocation2 + $0x30] sm:$0xff] %vm792_vm2, %v1086_v13  ;;  %v990_v20 = vadd.f32 %v4031_v17, %v4860_v28  ;;  %v984_v22 = vpop.f32.mrb[7].mxu0 }
 0x106   : > { %1111 = vst.msk [vmem:[#allocation2 + $0x78] sm:$0xff] %vm792_vm2, %v1103_v14  ;;  %v1030_v21 = vadd.f32 %v4043_v19, %v4860_v28  ;;  %v1024_v24 = vpop.f32.mrb[7].mxu1  ;;  %1093 = vst.msk [vmem:[#allocation2 + $0x28] sm:$0xff] %vm792_vm2, %v1085_v15  ;;  %v985_v25 = vadd.f32 %v4860_v28, %v984_v22 }
 0x107   : > { %1110 = vst.msk [vmem:[#allocation2 + $0x70] sm:$0xff] %vm792_vm2, %v1102_v16  ;;  %v1025_v26 = vadd.f32 %v4860_v28, %v1024_v24  ;;  %v1088_v27 = vadd.f32 %v1072_v18, %v990_v20 }
 0x108   : > { %v1105_v29 = vadd.f32 %v1072_v18, %v1030_v21  ;;  %v1087_v30 = vadd.f32 %v1070_v23, %v985_v25 }
 0x109   : > { %v1104_v31 = vadd.f32 %v1070_v23, %v1025_v26  ;;  %1096 = vst.msk [vmem:[#allocation2 + $0x40] sm:$0xff] %vm792_vm2, %v1088_v27 }
 0x10a   : > { %1113 = vst.msk [vmem:[#allocation2 + $0x88] sm:$0xff] %vm792_vm2, %v1105_v29  ;;  %1095 = vst.msk [vmem:[#allocation2 + $0x38] sm:$0xff] %vm792_vm2, %v1087_v30 }
 0x10b   : > { %1112 = vst.msk [vmem:[#allocation2 + $0x80] sm:$0xff] %vm792_vm2, %v1104_v31 }
 0x10c PF: > { %v1132_v32 = vld [vmem:[%s4707_s28] sm:$0xff]  ;;  %v1133_v33 = vld [vmem:[%s4707_s28 + $0x8] sm:$0xff]  ;;  %v1134_v28 = vld [vmem:[%s4707_s28 + $0x10] sm:$0xff]  ;;  %vm1143_vm5 = vcmask 261120   ;;  %s6169_s20 = scalar_lea.vmem %s6131_s7, %s4697_s23  ;;  %s4578_s3 = smov 64   ;;  %vm2983_vm6 = vcmask 523264  }
 0x10d   : > { %v4262_v34 = vpack.c.bf16 %v1133_v33, %v1132_v32  ;;  %v1135_v35 = vld [vmem:[%s4707_s28 + $0x18] sm:$0xff]  ;;  %v1114_v36 = vld [vmem:[#allocation2] sm:$0xff]  ;;  %v1116_v39 = vld [vmem:[#allocation2 + $0x10] sm:$0xff]  ;;  %s4577_s28 = smov 96   ;;  %s6170_s25 = sld [smem:[#allocation7_spill]] }
 0x10e   : > { %v4266_v37 = vpack.c.bf16 %v1135_v35, %v1134_v28  ;;  %4052 = vmatprep.mubr.msk.f32.mxu0 %vm1143_vm5, %v1114_v36  ;;  %v1115_v38 = vld [vmem:[#allocation2 + $0x8] sm:$0xff]  ;;  %v1117_v40 = vld [vmem:[#allocation2 + $0x18] sm:$0xff]  ;;  %v1128_v51 = vld [vmem:[#allocation2 + $0x70] sm:$0xff]  ;;  %s6171_s4 = scalar_lea.vmem %s6133_s9, %s4697_s23  ;;  %s6172_s0 = scalar_lea.vmem %s6134_s10, %s4697_s23 }
 0x10f   : > { %4263 = vmatprep.subr.bf16.mxu0 %v4262_v34  ;;  %v1118_v41 = vld [vmem:[#allocation2 + $0x20] sm:$0xff]  ;;  %v1119_v42 = vld [vmem:[#allocation2 + $0x28] sm:$0xff]  ;;  %v1129_v52 = vld [vmem:[#allocation2 + $0x78] sm:$0xff]  ;;  %p3854_p5 = scmp.ne.s32.totalorder %s4691_s22, 1 }
 0x110   : > { %4265 = vmatpush3.bf16.msra.mxu0 %v4262_v34  ;;  %v1120_v43 = vld [vmem:[#allocation2 + $0x30] sm:$0xff]  ;;  %v1353_v55 = vld [vmem:[%s6129_s5] sm:$0xff]  ;;  %v1354_v56 = vld [vmem:[%s6129_s5 + $0x8] sm:$0xff]  ;;  %vm3520_vm7 = vcmask (!%p3854_p5), 1040384   ;;  %vm3524_vm8 = vcmask (!%p3854_p5), 254976   ;;  %s6176_s30 = sld [smem:[#allocation16_spill]] (!%p3854_p5) }
 0x111   : > { %4267 = vmatprep.subr.bf16.mxu0 %v4266_v37  ;;  %v1121_v44 = vld [vmem:[#allocation2 + $0x38] sm:$0xff]  ;;  %v1122_v45 = vld [vmem:[#allocation2 + $0x40] sm:$0xff]  ;;  %v1123_v46 = vld [vmem:[#allocation2 + $0x48] sm:$0xff]  ;;  %v4270_v57 = vpack.c.bf16 %v1354_v56, %v1353_v55 }
 0x112   : > { %v1124_v47 = vld [vmem:[#allocation2 + $0x50] sm:$0xff]  ;;  %v1125_v48 = vld [vmem:[#allocation2 + $0x58] sm:$0xff]  ;;  %v1130_v53 = vld [vmem:[#allocation2 + $0x80] sm:$0xff] }
 0x113   : > { %v1126_v49 = vld [vmem:[#allocation2 + $0x60] sm:$0xff]  ;;  %v1127_v50 = vld [vmem:[#allocation2 + $0x68] sm:$0xff]  ;;  %4271 = vmatprep.subr.bf16.mxu1 %v4270_v57  ;;  %v1355_v58 = vld [vmem:[%s6129_s5 + $0x10] sm:$0xff] }
 0x114   : > { %4269 = vmatpush3.bf16.msra.mxu0 %v4266_v37  ;;  %v1131_v54 = vld [vmem:[#allocation2 + $0x88] sm:$0xff]  ;;  %4273 = vmatpush3.bf16.msra.mxu1 %v4270_v57  ;;  %v1356_v59 = vld [vmem:[%s6129_s5 + $0x18] sm:$0xff]  ;;  %v3738_v61 = vld [vmem:[%s6169_s20] ss:$0 sm:$0xff]  ;;  %s6173_s20 = scalar_lea.vmem %s6135_s11, %s4697_s23 }
 0x115   : > { %4279 = vmatprep.subr.bf16.mxu0 %v4270_v57  ;;  %v4274_v60 = vpack.c.bf16 %v1356_v59, %v1355_v58 }
 0x117   : > { %4053 = vmatmul.mubr.msk.f32.vlgmr.msra.gmra.mrb[0].mxu0 %vm1143_vm5, %v1115_v38  ;;  %4275 = vmatprep.subr.bf16.mxu1 %v4274_v60 }
 0x118   : > { %4055 = vmatprep.mubr.msk.f32.mxu0 %vm1143_vm5, %v1116_v39  ;;  %4281 = vmatpush3.bf16.msra.mxu0 %v4270_v57 }
 0x119   : > { %4283 = vmatprep.subr.bf16.mxu0 %v4274_v60  ;;  %4277 = vmatpush3.bf16.msra.mxu1 %v4274_v60 }
 0x11b   : > { %4056 = vmatmul.mubr.msk.f32.gmra.mrb[2].mxu0 %vm1143_vm5, %v1117_v40 }
 0x11c   : > { %4058 = vmatprep.mubr.msk.f32.mxu0 %vm1143_vm5, %v1118_v41  ;;  %4285 = vmatpush3.bf16.msra.mxu0 %v4274_v60 }
 0x11f   : > { %4059 = vmatmul.mubr.msk.f32.gmra.mrb[4].mxu0 %vm1143_vm5, %v1119_v42 }
 0x120   : > { %4061 = vmatprep.mubr.msk.f32.mxu0 %vm1143_vm5, %v1120_v43 }
 0x123   : > { %4062 = vmatmul.mubr.msk.f32.gmra.mrb[6].mxu0 %vm1143_vm5, %v1121_v44 }
 0x124   : > { %4064 = vmatprep.mubr.msk.f32.mxu0 %vm1143_vm5, %v1122_v45 }
 0x127   : > { %4065 = vmatmul.mubr.msk.f32.gmra.mrb[8].mxu0 %vm1143_vm5, %v1123_v46 }
 0x128   : > { %4067 = vmatprep.mubr.msk.f32.mxu0 %vm1143_vm5, %v1124_v47 }
 0x12b   : > { %4068 = vmatmul.mubr.msk.f32.gmra.mrb[10].mxu0 %vm1143_vm5, %v1125_v48 }
 0x12c   : > { %4070 = vmatprep.mubr.msk.f32.mxu0 %vm1143_vm5, %v1126_v49 }
 0x12f   : > { %4071 = vmatmul.mubr.msk.f32.gmra.mrb[12].mxu0 %vm1143_vm5, %v1127_v50 }
 0x130   : > { %4073 = vmatprep.mubr.msk.f32.mxu0 %vm1143_vm5, %v1128_v51 }
 0x133   : > { %4074 = vmatmul.mubr.msk.f32.gmra.mrb[14].mxu0 %vm1143_vm5, %v1129_v52 }
 0x134   : > { %4076 = vmatprep.mubr.msk.f32.mxu0 %vm1143_vm5, %v1130_v53 }
 0x137   : > { %4077 = vmatmul.mubr.msk.f32.gmra.mrb[16].mxu0 %vm1143_vm5, %v1131_v54 }
 0x1ea   : > { %v4054_v62 = vpop.f32.mrb[0].mxu0 }
 0x1eb   : > { %v4956_v63 = vadd.f32 %v4054_v62, %v3738_v61  ;;  %v1264_v0 = vpop.f32.mrb[1].mxu0 }
 0x1ec   : > { %v4958_v1 = vadd.f32 %v3738_v61, %v1264_v0 }
 0x1ed   : > { %1377 = vrot.lane.b32.xlu1 %v4956_v63, %s4577_s28 }
 0x1ee   : > { %v4057_v2 = vpop.f32.mrb[2].mxu0  ;;  %1375 = vrot.lane.b32.xlu0 %v4958_v1, %s4577_s28 }
 0x1ef   : > { %v4964_v3 = vadd.f32 %v4057_v2, %v3738_v61  ;;  %v1274_v4 = vpop.f32.mrb[3].mxu0 }
 0x1f0   : > { %v4968_v7 = vadd.f32 %v3738_v61, %v1274_v4 }
 0x1f2   : > { %v4060_v5 = vpop.f32.mrb[4].mxu0  ;;  %1381 = vrot.lane.b32.xlu0 %v4964_v3, %s4577_s28 }
 0x1f3   : > { %v1284_v6 = vpop.f32.mrb[5].mxu0  ;;  %v4982_v17 = vadd.f32 %v4060_v5, %v3738_v61 }
 0x1f4   : > { %v4972_v10 = vadd.f32 %v3738_v61, %v1284_v6 }
 0x1f6   : > { %v4063_v8 = vpop.f32.mrb[6].mxu0  ;;  %1379 = vrot.lane.b32.xlu0 %v4968_v7, %s4577_s28 }
 0x1f7   : > { %v1294_v9 = vpop.f32.mrb[7].mxu0  ;;  %v4998_v25 = vadd.f32 %v4063_v8, %v3738_v61 }
 0x1f8   : > { %v4990_v21 = vadd.f32 %v3738_v61, %v1294_v9 }
 0x1fa   : > { %v4066_v11 = vpop.f32.mrb[8].mxu0  ;;  %1383 = vrot.lane.b32.xlu0 %v4972_v10, %s4577_s28 }
 0x1fb   : > { %v4976_v12 = vadd.f32 %v4066_v11, %v3738_v61  ;;  %v1304_v13 = vpop.f32.mrb[9].mxu0 }
 0x1fc   : > { %v5006_v30 = vadd.f32 %v3738_v61, %v1304_v13 }
 0x1fe   : > { %v4069_v14 = vpop.f32.mrb[10].mxu0  ;;  %1393 = vrot.lane.b32.xlu0 %v4976_v12, %s4577_s28 }
 0x1ff   : > { %v4980_v15 = vadd.f32 %v4069_v14, %v3738_v61  ;;  %v1314_v16 = vpop.f32.mrb[11].mxu0 }
 0x200   : > { %v4988_v19 = vadd.f32 %v3738_v61, %v1314_v16 }
 0x201   : > { %1397 = vrot.lane.b32.xlu1 %v4980_v15, %s4577_s28 }
 0x202   : > { %1385 = vrot.lane.b32.xlu0 %v4982_v17, %s4577_s28  ;;  %v4072_v18 = vpop.f32.mrb[12].mxu0 }
 0x203   : > { %v1324_v20 = vpop.f32.mrb[13].mxu0  ;;  %v4992_v22 = vadd.f32 %v4072_v18, %v3738_v61 }
 0x204   : > { %v5004_v27 = vadd.f32 %v3738_v61, %v1324_v20 }
 0x205   : > { %1395 = vrot.lane.b32.xlu1 %v4988_v19, %s4577_s28 }
 0x206   : > { %1387 = vrot.lane.b32.xlu0 %v4990_v21, %s4577_s28  ;;  %v4075_v23 = vpop.f32.mrb[14].mxu0 }
 0x207   : > { %v1334_v24 = vpop.f32.mrb[15].mxu0  ;;  %v5008_v31 = vadd.f32 %v4075_v23, %v3738_v61 }
 0x208   : > { %v5017_v32 = vadd.f32 %v3738_v61, %v1334_v24 }
 0x209   : > { %1401 = vrot.lane.b32.xlu1 %v4992_v22, %s4577_s28 }
 0x20a   : > { %1389 = vrot.lane.b32.xlu0 %v4998_v25, %s4577_s28  ;;  %v4078_v26 = vpop.f32.mrb[16].mxu0 }
 0x20b   : > { %v1344_v29 = vpop.f32.mrb[17].mxu0  ;;  %v5027_v28 = vadd.f32 %v4078_v26, %v3738_v61 }
 0x20c   : > { %v5019_v33 = vadd.f32 %v3738_v61, %v1344_v29  ;;  %v2210_v29 = vld [vmem:[%s6170_s25 + $0x18] sm:$0xff] }
 0x20d   : > { %1399 = vrot.lane.b32.xlu1 %v5004_v27, %s4577_s28 }
 0x20e   : > { %1391 = vrot.lane.b32.xlu0 %v5006_v30, %s4577_s28 }
 0x211   : > { %1405 = vrot.lane.b32.xlu1 %v5008_v31, %s4577_s28 }
 0x212   : > { %1674 = vrot.lane.b32.xlu0 %v4958_v1, %s4578_s3 }
 0x215   : > { %1403 = vrot.lane.b32.xlu1 %v5017_v32, %s4577_s28 }
 0x216   : > { %1676 = vrot.lane.b32.xlu0 %v4956_v63, %s4578_s3 }
 0x219   : > { %1407 = vrot.lane.b32.xlu1 %v5019_v33, %s4577_s28 }
 0x21a   : > { %1678 = vrot.lane.b32.xlu0 %v4968_v7, %s4578_s3 }
 0x21d   : > { %1409 = vrot.lane.b32.xlu1 %v5027_v28, %s4577_s28 }
 0x21e   : > { %1680 = vrot.lane.b32.xlu0 %v4964_v3, %s4578_s3 }
 0x221   : > { %1692 = vrot.lane.b32.xlu1 %v4976_v12, %s4578_s3 }
 0x222   : > { %1682 = vrot.lane.b32.xlu0 %v4972_v10, %s4578_s3 }
 0x225   : > { %1694 = vrot.lane.b32.xlu1 %v4988_v19, %s4578_s3 }
 0x226   : > { %1684 = vrot.lane.b32.xlu0 %v4982_v17, %s4578_s3 }
 0x229   : > { %1696 = vrot.lane.b32.xlu1 %v4980_v15, %s4578_s3 }
 0x22a   : > { %1686 = vrot.lane.b32.xlu0 %v4990_v21, %s4578_s3 }
 0x22d   : > { %1698 = vrot.lane.b32.xlu1 %v5004_v27, %s4578_s3 }
 0x22e   : > { %1688 = vrot.lane.b32.xlu0 %v4998_v25, %s4578_s3 }
 0x231   : > { %1700 = vrot.lane.b32.xlu1 %v4992_v22, %s4578_s3 }
 0x232   : > { %1690 = vrot.lane.b32.xlu0 %v5006_v30, %s4578_s3 }
 0x235   : > { %1702 = vrot.lane.b32.xlu1 %v5017_v32, %s4578_s3 }
 0x239   : > { %1704 = vrot.lane.b32.xlu1 %v5008_v31, %s4578_s3 }
 0x23d   : > { %1706 = vrot.lane.b32.xlu1 %v5019_v33, %s4578_s3 }
 0x241   : > { %1708 = vrot.lane.b32.xlu1 %v5027_v28, %s4578_s3 }
 0x25f   : > { %v5046_v34 = vpop.permute.xlu1 %1377 }
 0x260   : > { %v5048_v35 = vpop.permute.xlu0 %1375  ;;  %v1430_v37 = vmul.f32 %v5046_v34, %v4956_v63 }
 0x261   : > { %v1429_v36 = vmul.f32 %v5048_v35, %v4958_v1  ;;  %v1737_v16 = vmul.f32 %v5048_v35, %v4976_v12 }
 0x263   : > { %4087 = vmatprep.mubr.msk.f32.mxu1 %vm1143_vm5, %v1429_v36 }
 0x264   : > { %4088 = vmatmul.mubr.msk.f32.vlgmr.msra.gmra.mrb[0].mxu1 %vm1143_vm5, %v1430_v37  ;;  %v5056_v38 = vpop.permute.xlu0 %1381 }
 0x265   : > { %v1432_v41 = vmul.f32 %v5056_v38, %v4964_v3  ;;  %v1740_v20 = vmul.f32 %v5056_v38, %v5004_v27 }
 0x268   : > { %v5058_v39 = vpop.permute.xlu0 %1379 }
 0x269   : > { %v1431_v40 = vmul.f32 %v5058_v39, %v4968_v7 }
 0x26b   : > { %4090 = vmatprep.mubr.msk.f32.mxu1 %vm1143_vm5, %v1431_v40 }
 0x26c   : > { %4091 = vmatmul.mubr.msk.f32.gmra.mrb[2].mxu1 %vm1143_vm5, %v1432_v41  ;;  %v5066_v42 = vpop.permute.xlu0 %1383 }
 0x26d   : > { %v1433_v43 = vmul.f32 %v5066_v42, %v4972_v10 }
 0x26f   : > { %4093 = vmatprep.mubr.msk.f32.mxu1 %vm1143_vm5, %v1433_v43 }
 0x270   : > { %v1394_v44 = vpop.permute.xlu0 %1393 }
 0x271   : > { %v1728_v45 = vmul.f32 %v1394_v44, %v4958_v1  ;;  %v1438_v62 = vmul.f32 %v1394_v44, %v4976_v12  ;;  %v1739_v12 = vmul.f32 %v5058_v39, %v4980_v15 }
 0x273   : > { %v1398_v46 = vpop.permute.xlu1 %1397  ;;  %4122 = vmatprep.mubr.msk.f32.mxu0 %vm1143_vm5, %v1728_v45 }
 0x274   : > { %v1386_v47 = vpop.permute.xlu0 %1385  ;;  %v1730_v52 = vmul.f32 %v1398_v46, %v4968_v7  ;;  %v1440_v1 = vmul.f32 %v1398_v46, %v4980_v15 }
 0x275   : > { %v1434_v48 = vmul.f32 %v1386_v47, %v4982_v17 }
 0x277   : > { %v1396_v49 = vpop.permute.xlu1 %1395  ;;  %4094 = vmatmul.mubr.msk.f32.gmra.mrb[4].mxu1 %vm1143_vm5, %v1434_v48 }
 0x278   : > { %v1729_v50 = vmul.f32 %v1396_v49, %v4956_v63  ;;  %v1388_v51 = vpop.permute.xlu0 %1387  ;;  %v1439_v63 = vmul.f32 %v1396_v49, %v4988_v19 }
 0x279   : > { %v1435_v53 = vmul.f32 %v1388_v51, %v4990_v21  ;;  %v1743_v15 = vmul.f32 %v1388_v51, %v5008_v31 }
 0x27a   : > { %4123 = vmatmul.mubr.msk.f32.vlgmr.msra.gmra.mrb[18].mxu0 %vm1143_vm5, %v1729_v50 }
 0x27b   : > { %v1402_v54 = vpop.permute.xlu1 %1401  ;;  %4096 = vmatprep.mubr.msk.f32.mxu1 %vm1143_vm5, %v1435_v53  ;;  %4125 = vmatprep.mubr.msk.f32.mxu0 %vm1143_vm5, %v1730_v52 }
 0x27c   : > { %v1390_v55 = vpop.permute.xlu0 %1389  ;;  %v1732_v60 = vmul.f32 %v1402_v54, %v4972_v10  ;;  %v1442_v6 = vmul.f32 %v1402_v54, %v4992_v22 }
 0x27d   : > { %v1436_v56 = vmul.f32 %v1390_v55, %v4998_v25  ;;  %v1744_v23 = vmul.f32 %v1390_v55, %v5019_v33 }
 0x27f   : > { %v1400_v57 = vpop.permute.xlu1 %1399  ;;  %4097 = vmatmul.mubr.msk.f32.gmra.mrb[6].mxu1 %vm1143_vm5, %v1436_v56 }
 0x280   : > { %v1731_v58 = vmul.f32 %v1400_v57, %v4964_v3  ;;  %v1392_v59 = vpop.permute.xlu0 %1391  ;;  %v1441_v2 = vmul.f32 %v1400_v57, %v5004_v27  ;;  %v2209_v27 = vld [vmem:[%s6170_s25 + $0x10] sm:$0xff] }
 0x281   : > { %v1437_v61 = vmul.f32 %v1392_v59, %v5006_v30  ;;  %v1745_v24 = vmul.f32 %v1392_v59, %v5027_v28 }
 0x282   : > { %4126 = vmatmul.mubr.msk.f32.gmra.mrb[20].mxu0 %vm1143_vm5, %v1731_v58 }
 0x283   : > { %v1406_v0 = vpop.permute.xlu1 %1405  ;;  %4099 = vmatprep.mubr.msk.f32.mxu1 %vm1143_vm5, %v1437_v61  ;;  %4128 = vmatprep.mubr.msk.f32.mxu0 %vm1143_vm5, %v1732_v60 }
 0x284   : > { %4100 = vmatmul.mubr.msk.f32.gmra.mrb[8].mxu1 %vm1143_vm5, %v1438_v62  ;;  %v1734_v5 = vmul.f32 %v1406_v0, %v4990_v21  ;;  %v1444_v10 = vmul.f32 %v1406_v0, %v5008_v31  ;;  %v1742_v21 = vmul.f32 %v1386_v47, %v5017_v32  ;;  %v5142_v61 = vpop.permute.xlu0 %1674 }
 0x285   : > { %4102 = vmatprep.mubr.msk.f32.mxu1 %vm1143_vm5, %v1439_v63 }
 0x287   : > { %v1404_v3 = vpop.permute.xlu1 %1403 }
 0x288   : > { %v1733_v4 = vmul.f32 %v1404_v3, %v4982_v17  ;;  %4103 = vmatmul.mubr.msk.f32.gmra.mrb[10].mxu1 %vm1143_vm5, %v1440_v1  ;;  %v1443_v7 = vmul.f32 %v1404_v3, %v5017_v32  ;;  %v1738_v17 = vmul.f32 %v5046_v34, %v4988_v19  ;;  %v1741_v19 = vmul.f32 %v5066_v42, %v4992_v22  ;;  %v2207_v22 = vld [vmem:[%s6170_s25] sm:$0xff] }
 0x289   : > { %4105 = vmatprep.mubr.msk.f32.mxu1 %vm1143_vm5, %v1441_v2 }
 0x28a   : > { %4129 = vmatmul.mubr.msk.f32.gmra.mrb[22].mxu0 %vm1143_vm5, %v1733_v4 }
 0x28b   : > { %v1408_v8 = vpop.permute.xlu1 %1407  ;;  %4131 = vmatprep.mubr.msk.f32.mxu0 %vm1143_vm5, %v1734_v5 }
 0x28c   : > { %v1735_v9 = vmul.f32 %v1408_v8, %v4998_v25  ;;  %4106 = vmatmul.mubr.msk.f32.gmra.mrb[12].mxu1 %vm1143_vm5, %v1442_v6  ;;  %v1445_v11 = vmul.f32 %v1408_v8, %v5019_v33  ;;  %v2208_v25 = vld [vmem:[%s6170_s25 + $0x8] sm:$0xff] }
 0x28d   : > { %4108 = vmatprep.mubr.msk.f32.mxu1 %vm1143_vm5, %v1443_v7  ;;  %v4286_v26 = vpack.c.bf16 %v2208_v25, %v2207_v22 }
 0x28e   : > { %4132 = vmatmul.mubr.msk.f32.gmra.mrb[24].mxu0 %vm1143_vm5, %v1735_v9 }
 0x28f   : > { %v1410_v13 = vpop.permute.xlu1 %1409  ;;  %4287 = vmatprep.subr.bf16.mxu1 %v4286_v26 }
 0x290   : > { %v1736_v14 = vmul.f32 %v1410_v13, %v5006_v30  ;;  %4109 = vmatmul.mubr.msk.f32.gmra.mrb[14].mxu1 %vm1143_vm5, %v1444_v10  ;;  %v1446_v18 = vmul.f32 %v1410_v13, %v5027_v28  ;;  %v4290_v30 = vpack.c.bf16 %v2210_v29, %v2209_v27 }
 0x291   : > { %4111 = vmatprep.mubr.msk.f32.mxu1 %vm1143_vm5, %v1445_v11  ;;  %4289 = vmatpush3.bf16.msra.mxu1 %v4286_v26 }
 0x292   : > { %4134 = vmatprep.mubr.msk.f32.mxu0 %vm1143_vm5, %v1736_v14  ;;  %4291 = vmatprep.subr.bf16.mxu1 %v4290_v30 }
 0x293   : > { %4135 = vmatmul.mubr.msk.f32.gmra.mrb[26].mxu0 %vm1143_vm5, %v1737_v16  ;;  %v5144_v0 = vpop.permute.xlu1 %1692 }
 0x294   : > { %4112 = vmatmul.mubr.msk.f32.gmra.mrb[16].mxu1 %vm1143_vm5, %v1446_v18  ;;  %4137 = vmatprep.mubr.msk.f32.mxu0 %vm1143_vm5, %v1738_v17 }
 0x295   : > { %4293 = vmatpush3.bf16.msra.mxu1 %v4290_v30 }
 0x297   : > { %4138 = vmatmul.mubr.msk.f32.gmra.mrb[28].mxu0 %vm1143_vm5, %v1739_v12 }
 0x298   : > { %4140 = vmatprep.mubr.msk.f32.mxu0 %vm1143_vm5, %v1740_v20  ;;  %v5152_v20 = vpop.permute.xlu0 %1676 }
 0x29b   : > { %4141 = vmatmul.mubr.msk.f32.gmra.mrb[30].mxu0 %vm1143_vm5, %v1741_v19 }
 0x29c   : > { %4143 = vmatprep.mubr.msk.f32.mxu0 %vm1143_vm5, %v1742_v21 }
 0x29f   : > { %4144 = vmatmul.mubr.msk.f32.gmra.mrb[32].mxu0 %vm1143_vm5, %v1743_v15 }
 0x2a0   : > { %4146 = vmatprep.mubr.msk.f32.mxu0 %vm1143_vm5, %v1744_v23  ;;  %v5156_v23 = vpop.permute.xlu1 %1694 }
 0x2a3   : > { %4147 = vmatmul.mubr.msk.f32.gmra.mrb[34].mxu0 %vm1143_vm5, %v1745_v24 }
 0x337   : > { %v4089_v31 = vpop.f32.mrb[0].mxu1 }
 0x338   : > { %v1567_v32 = vpop.f32.mrb[1].mxu1  ;;  %v1657_v28 = vmul.f32 0.35355338, %v4089_v31 }
 0x339   : > { %v1656_v40 = vmul.f32 0.35355338, %v1567_v32 }
 0x33f   : > { %v4092_v33 = vpop.f32.mrb[2].mxu1 }
 0x340   : > { %v1577_v34 = vpop.f32.mrb[3].mxu1  ;;  %v1659_v55 = vmul.f32 0.35355338, %v4092_v33 }
 0x341   : > { %v1658_v58 = vmul.f32 0.35355338, %v1577_v34 }
 0x34a   : > { %v4095_v35 = vpop.f32.mrb[4].mxu1 }
 0x34b   : > { %v1587_v36 = vpop.f32.mrb[5].mxu1  ;;  %v1661_v2 = vmul.f32 0.35355338, %v4095_v35 }
 0x34c   : > { %v1660_v3 = vmul.f32 0.35355338, %v1587_v36 }
 0x34d   : > { %v4124_v37 = vpop.f32.mrb[18].mxu0 }
 0x34e   : > { %v1956_v38 = vmul.f32 0.35355338, %v4124_v37  ;;  %v1866_v39 = vpop.f32.mrb[19].mxu0 }
 0x34f   : > { %v1955_v41 = vmul.f32 0.35355338, %v1866_v39 }
 0x350   : > { %v1974_v42 = vmax.f32 %v1657_v28, %v1956_v38 }
 0x351   : > { %v1973_v43 = vmax.f32 %v1656_v40, %v1955_v41 }
 0x352   : > { %v1992_v44 = vsub.f32 %v1657_v28, %v1974_v42  ;;  %v2046_v45 = vsub.f32 %v1956_v38, %v1974_v42  ;;  %v4098_v46 = vpop.f32.mrb[6].mxu1 }
 0x353   : > { %v1991_v47 = vsub.f32 %v1656_v40, %v1973_v43  ;;  %v2045_v48 = vsub.f32 %v1955_v41, %v1973_v43  ;;  %v1597_v49 = vpop.f32.mrb[7].mxu1  ;;  %v5146_v6 = vmul.f32 0.35355338, %v4098_v46 }
 0x354   : > { %v2011_v50 = vmul.f32 1.442695, %v1992_v44  ;;  %v2065_v51 = vmul.f32 1.442695, %v2046_v45  ;;  %v5148_v7 = vmul.f32 0.35355338, %v1597_v49 }
 0x355   : > { %v2009_v52 = vmul.f32 1.442695, %v1991_v47  ;;  %v2063_v53 = vmul.f32 1.442695, %v2045_v48  ;;  %v4127_v54 = vpop.f32.mrb[20].mxu0  ;;  %v5172_v48 = vpop.permute.xlu0 %1678 }
 0x356   : > { %4338 = vpow2.f32 %v2011_v50  ;;  %v1958_v56 = vmul.f32 0.35355338, %v4127_v54  ;;  %v1876_v57 = vpop.f32.mrb[21].mxu0 }
 0x357   : > { %4340 = vpow2.f32 %v2065_v51  ;;  %v1957_v59 = vmul.f32 0.35355338, %v1876_v57  ;;  %v4101_v60 = vpop.f32.mrb[8].mxu1 }
 0x358   : > { %4342 = vpow2.f32 %v2009_v52  ;;  %v1976_v62 = vmax.f32 %v1659_v55, %v1958_v56  ;;  %v1607_v63 = vpop.f32.mrb[9].mxu1  ;;  %v5150_v14 = vmul.f32 0.35355338, %v4101_v60 }
 0x359   : > { %4344 = vpow2.f32 %v2063_v53  ;;  %v1975_v1 = vmax.f32 %v1658_v58, %v1957_v59  ;;  %v5154_v19 = vmul.f32 0.35355338, %v1607_v63  ;;  %v5178_v53 = vpop.permute.xlu1 %1696 }
 0x35a   : > { %v1994_v4 = vsub.f32 %v1659_v55, %v1976_v62  ;;  %v2048_v5 = vsub.f32 %v1958_v56, %v1976_v62 }
 0x35b   : > { %v1993_v8 = vsub.f32 %v1658_v58, %v1975_v1  ;;  %v2047_v9 = vsub.f32 %v1957_v59, %v1975_v1  ;;  %v4104_v10 = vpop.f32.mrb[10].mxu1 }
 0x35c   : > { %v2015_v11 = vmul.f32 1.442695, %v1994_v4  ;;  %v2069_v13 = vmul.f32 1.442695, %v2048_v5  ;;  %v1617_v18 = vpop.f32.mrb[11].mxu1 }
 0x35d   : > { %v2013_v16 = vmul.f32 1.442695, %v1993_v8  ;;  %v2067_v17 = vmul.f32 1.442695, %v2047_v9  ;;  %v4130_v12 = vpop.f32.mrb[22].mxu0 }
 0x35e   : > { %4346 = vpow2.f32 %v2015_v11  ;;  %v1960_v21 = vmul.f32 0.35355338, %v4130_v12  ;;  %v1886_v15 = vpop.f32.mrb[23].mxu0  ;;  %v5158_v24 = vmul.f32 0.35355338, %v4104_v10  ;;  %v5197_v12 = vpop.permute.xlu0 %1680 }
 0x35f   : > { %4348 = vpow2.f32 %v2069_v13  ;;  %v1959_v22 = vmul.f32 0.35355338, %v1886_v15  ;;  %v4107_v25 = vpop.f32.mrb[12].mxu1  ;;  %v5160_v27 = vmul.f32 0.35355338, %v1617_v18 }
 0x360   : > { %v4339_v26 = vpop.eup %4338  ;;  %4350 = vpow2.f32 %v2013_v16  ;;  %v1978_v29 = vmax.f32 %v1661_v2, %v1960_v21  ;;  %v5162_v30 = vmul.f32 0.35355338, %v4107_v25  ;;  %v1627_v31 = vpop.f32.mrb[13].mxu1 }
 0x361   : > { %v4341_v32 = vpop.eup %4340  ;;  %v2118_v33 = vmul.f32 %v4339_v26, %v5152_v20  ;;  %4352 = vpow2.f32 %v2067_v17  ;;  %v1977_v34 = vmax.f32 %v1660_v3, %v1959_v22  ;;  %v5165_v35 = vmul.f32 0.35355338, %v1627_v31  ;;  %v4133_v36 = vpop.f32.mrb[24].mxu0 }
 0x362   : > { %v5167_v37 = vpop.eup %4342  ;;  %v2100_v28 = vadd.f32 %v4341_v32, %v4339_v26  ;;  %v2136_v38 = vmul.f32 %v4341_v32, %v5156_v23  ;;  %v1996_v39 = vsub.f32 %v1661_v2, %v1978_v29  ;;  %v2050_v40 = vsub.f32 %v1960_v21, %v1978_v29  ;;  %v1896_v41 = vpop.f32.mrb[25].mxu0 }
 0x363   : > { %v5170_v42 = vpop.eup %4344  ;;  %v1995_v43 = vsub.f32 %v1660_v3, %v1977_v34  ;;  %v2049_v44 = vsub.f32 %v1959_v22, %v1977_v34  ;;  %v1962_v45 = vmul.f32 0.35355338, %v4133_v36  ;;  %v1961_v46 = vmul.f32 0.35355338, %v1896_v41  ;;  %v4110_v47 = vpop.f32.mrb[14].mxu1 }
 0x364   : > { %v5174_v49 = vadd.f32 %v2136_v38, %v2118_v33  ;;  %4354 = vrcp.f32 %v2100_v28  ;;  %v2099_v50 = vadd.f32 %v5170_v42, %v5167_v37  ;;  %v2019_v51 = vmul.f32 1.442695, %v1996_v39  ;;  %v1637_v52 = vpop.f32.mrb[15].mxu1  ;;  %v5203_v26 = vpop.permute.xlu1 %1698 }
 0x365   : > { %v2073_v54 = vmul.f32 1.442695, %v2050_v40  ;;  %v2017_v55 = vmul.f32 1.442695, %v1995_v43  ;;  %v2071_v56 = vmul.f32 1.442695, %v2049_v44  ;;  %v1980_v57 = vmax.f32 %v5146_v6, %v1962_v45 }
 0x366   : > { %4356 = vrcp.f32 %v2099_v50  ;;  %v1979_v58 = vmax.f32 %v5148_v7, %v1961_v46  ;;  %v5182_v59 = vmul.f32 0.35355338, %v4110_v47  ;;  %v5184_v60 = vmul.f32 0.35355338, %v1637_v52  ;;  %v4136_v62 = vpop.f32.mrb[26].mxu0 }
 0x367   : > { %4358 = vpow2.f32 %v2019_v51  ;;  %v1998_v63 = vsub.f32 %v5146_v6, %v1980_v57  ;;  %v2052_v1 = vsub.f32 %v1962_v45, %v1980_v57  ;;  %v1964_v2 = vmul.f32 0.35355338, %v4136_v62  ;;  %v4113_v3 = vpop.f32.mrb[16].mxu1  ;;  %v1906_v4 = vpop.f32.mrb[27].mxu0 }
 0x368   : > { %v5187_v5 = vpop.eup %4346  ;;  %4360 = vpow2.f32 %v2073_v54  ;;  %v1997_v8 = vsub.f32 %v5148_v7, %v1979_v58  ;;  %v2051_v9 = vsub.f32 %v1961_v46, %v1979_v58  ;;  %v5190_v10 = vmul.f32 0.35355338, %v4113_v3  ;;  %v1647_v11 = vpop.f32.mrb[17].mxu1 }
 0x369   : > { %v5192_v13 = vpop.eup %4348  ;;  %4362 = vpow2.f32 %v2017_v55  ;;  %v2023_v16 = vmul.f32 1.442695, %v1998_v63  ;;  %v2077_v17 = vmul.f32 1.442695, %v2052_v1  ;;  %v1982_v6 = vmax.f32 %v5150_v14, %v1964_v2  ;;  %v5217_v54 = vpop.permute.xlu0 %1682 }
 0x36a   : > { %v5195_v18 = vpop.eup %4350  ;;  %v2102_v21 = vadd.f32 %v5192_v13, %v5187_v5  ;;  %4364 = vpow2.f32 %v2071_v56  ;;  %v2021_v7 = vmul.f32 1.442695, %v1997_v8  ;;  %v2075_v15 = vmul.f32 1.442695, %v2051_v9  ;;  %v4139_v22 = vpop.f32.mrb[28].mxu0 }
 0x36b   : > { %v5201_v25 = vpop.eup %4352  ;;  %4366 = vpow2.f32 %v2023_v16  ;;  %v2000_v29 = vsub.f32 %v5150_v14, %v1982_v6  ;;  %v2054_v31 = vsub.f32 %v1964_v2, %v1982_v6  ;;  %v1963_v32 = vmul.f32 0.35355338, %v1906_v4  ;;  %v1916_v33 = vpop.f32.mrb[29].mxu0 }
 0x36c   : > { %4368 = vrcp.f32 %v2102_v21  ;;  %v2101_v34 = vadd.f32 %v5201_v25, %v5195_v18  ;;  %v5208_v36 = vmul.f32 0.35355338, %v1647_v11  ;;  %v1966_v28 = vmul.f32 0.35355338, %v4139_v22  ;;  %v5223_v62 = vpop.permute.xlu1 %1700 }
 0x36d   : > { %4370 = vpow2.f32 %v2077_v17  ;;  %v2027_v38 = vmul.f32 1.442695, %v2000_v29  ;;  %v2081_v39 = vmul.f32 1.442695, %v2054_v31  ;;  %v1981_v40 = vmax.f32 %v5154_v19, %v1963_v32 }
 0x36e   : > { %v4355_v41 = vpop.eup %4354  ;;  %4372 = vrcp.f32 %v2101_v34  ;;  %v1984_v43 = vmax.f32 %v5158_v24, %v1966_v28  ;;  %v1965_v14 = vmul.f32 0.35355338, %v1916_v33  ;;  %v4142_v44 = vpop.f32.mrb[30].mxu0  ;;  %v2117_v45 = vmul.f32 %v5167_v37, %v5142_v61 }
 0x36f   : > { %4374 = vpow2.f32 %v2021_v7  ;;  %v1999_v46 = vsub.f32 %v5154_v19, %v1981_v40  ;;  %v2053_v47 = vsub.f32 %v1963_v32, %v1981_v40  ;;  %v1968_v50 = vmul.f32 0.35355338, %v4142_v44  ;;  %v1926_v51 = vpop.f32.mrb[31].mxu0  ;;  %v5242_v33 = vpop.permute.xlu0 %1684 }
 0x370   : > { %v5215_v52 = vpop.eup %4356  ;;  %4376 = vpow2.f32 %v2075_v15  ;;  %v2002_v55 = vsub.f32 %v5158_v24, %v1984_v43  ;;  %v2056_v56 = vsub.f32 %v1966_v28, %v1984_v43  ;;  %v1983_v57 = vmax.f32 %v5160_v27, %v1965_v14  ;;  %v5249_v40 = vpop.permute.xlu1 %1702 }
 0x371   : > { %v5221_v58 = vpop.eup %4358  ;;  %4378 = vpow2.f32 %v2027_v38  ;;  %v2025_v37 = vmul.f32 1.442695, %v1999_v46  ;;  %v2079_v19 = vmul.f32 1.442695, %v2053_v47  ;;  %v1986_v63 = vmax.f32 %v5162_v30, %v1968_v50 }
 0x372   : > { %v5226_v1 = vpop.eup %4360  ;;  %4380 = vpow2.f32 %v2081_v39  ;;  %v2031_v2 = vmul.f32 1.442695, %v2002_v55  ;;  %v2085_v3 = vmul.f32 1.442695, %v2056_v56  ;;  %v2001_v4 = vsub.f32 %v5160_v27, %v1983_v57  ;;  %v4145_v24 = vpop.f32.mrb[32].mxu0 }
 0x373   : > { %v5229_v8 = vpop.eup %4362  ;;  %v2104_v9 = vadd.f32 %v5226_v1, %v5221_v58  ;;  %4382 = vpow2.f32 %v2025_v37  ;;  %v2055_v11 = vsub.f32 %v1965_v14, %v1983_v57  ;;  %v2004_v16 = vsub.f32 %v5162_v30, %v1986_v63  ;;  %v1936_v17 = vpop.f32.mrb[33].mxu0 }
 0x374   : > { %v5234_v6 = vpop.eup %4364  ;;  %4384 = vpow2.f32 %v2079_v19  ;;  %v2029_v21 = vmul.f32 1.442695, %v2001_v4  ;;  %v2058_v7 = vsub.f32 %v1968_v50, %v1986_v63  ;;  %v1967_v15 = vmul.f32 0.35355338, %v1926_v51 }
 0x375   : > { %v5236_v22 = vpop.eup %4366  ;;  %4386 = vrcp.f32 %v2104_v9  ;;  %v2103_v27 = vadd.f32 %v5234_v6, %v5229_v8  ;;  %v2083_v29 = vmul.f32 1.442695, %v2055_v11  ;;  %v2035_v31 = vmul.f32 1.442695, %v2004_v16 }
 0x376   : > { %v5240_v32 = vpop.eup %4368  ;;  %4388 = vpow2.f32 %v2031_v2  ;;  %v2089_v30 = vmul.f32 1.442695, %v2058_v7  ;;  %v1985_v34 = vmax.f32 %v5165_v35, %v1967_v15  ;;  %v2135_v28 = vmul.f32 %v5170_v42, %v5144_v0  ;;  %v4148_v38 = vpop.f32.mrb[34].mxu0 }
 0x377   : > { %v5247_v39 = vpop.eup %4370  ;;  %4390 = vrcp.f32 %v2103_v27  ;;  %v1970_v43 = vmul.f32 0.35355338, %v4145_v24  ;;  %v2190_v14 = vmul.f32 %v4355_v41, %v5174_v49  ;;  %v1969_v44 = vmul.f32 0.35355338, %v1936_v17  ;;  %v1946_v46 = vpop.f32.mrb[35].mxu0 }
 0x378   : > { %v5252_v47 = vpop.eup %4372  ;;  %v2106_v50 = vadd.f32 %v5247_v39, %v5236_v22  ;;  %4392 = vpow2.f32 %v2085_v3  ;;  %v2003_v51 = vsub.f32 %v5165_v35, %v1985_v34  ;;  %v2057_v42 = vsub.f32 %v1967_v15, %v1985_v34  ;;  %v5274_v17 = vpop.permute.xlu0 %1686 }
 0x379   : > { %v5257_v55 = vpop.eup %4374  ;;  %4394 = vpow2.f32 %v2029_v21  ;;  %v2153_v56 = vadd.f32 %v2135_v28, %v2117_v45  ;;  %v1988_v57 = vmax.f32 %v5182_v59, %v1970_v43  ;;  %v1987_v37 = vmax.f32 %v5184_v60, %v1969_v44  ;;  %v5276_v21 = vpop.permute.xlu1 %1704 }
 0x37a   : > { %v5261_v49 = vpop.eup %4376  ;;  %4396 = vrcp.f32 %v2106_v50  ;;  %v2033_v41 = vmul.f32 1.442695, %v2003_v51  ;;  %v2087_v19 = vmul.f32 1.442695, %v2057_v42  ;;  %v1972_v63 = vmul.f32 0.35355338, %v4148_v38 }
 0x37b   : > { %v5263_v2 = vpop.eup %4378  ;;  %v2105_v35 = vadd.f32 %v5261_v49, %v5257_v55  ;;  %4398 = vpow2.f32 %v2083_v29  ;;  %v2189_v3 = vmul.f32 %v5215_v52, %v2153_v56  ;;  %v2006_v45 = vsub.f32 %v5182_v59, %v1988_v57 }
 0x37c   : > { %v5269_v4 = vpop.eup %4380  ;;  %4400 = vpow2.f32 %v2035_v31  ;;  %v2060_v24 = vsub.f32 %v1970_v43, %v1988_v57  ;;  %v2005_v9 = vsub.f32 %v5184_v60, %v1987_v37  ;;  %v2059_v11 = vsub.f32 %v1969_v44, %v1987_v37 }
 0x37d   : > { %v5272_v16 = vpop.eup %4382  ;;  %4402 = vrcp.f32 %v2105_v35  ;;  %v2108_v7 = vadd.f32 %v5269_v4, %v5263_v2  ;;  %4157 = vmatprep.mubr.msk.f32.mxu1 %vm1143_vm5, %v2189_v3  ;;  %v2039_v59 = vmul.f32 1.442695, %v2006_v45  ;;  %v1990_v52 = vmax.f32 %v5190_v10, %v1972_v63 }
 0x37e   : > { %v5282_v15 = vpop.eup %4384  ;;  %4404 = vpow2.f32 %v2089_v30  ;;  %v2093_v60 = vmul.f32 1.442695, %v2060_v24  ;;  %4158 = vmatmul.mubr.msk.f32.vlgmr.msra.gmra.mrb[18].mxu1 %vm1143_vm5, %v2190_v14  ;;  %v2037_v27 = vmul.f32 1.442695, %v2005_v9  ;;  %v2091_v29 = vmul.f32 1.442695, %v2059_v11 }
 0x37f   : > { %v5285_v31 = vpop.eup %4386  ;;  %4406 = vrcp.f32 %v2108_v7  ;;  %v2107_v34 = vadd.f32 %v5282_v15, %v5272_v16  ;;  %v2008_v28 = vsub.f32 %v5190_v10, %v1990_v52  ;;  %v2062_v38 = vsub.f32 %v1972_v63, %v1990_v52 }
 0x380   : > { %v5290_v43 = vpop.eup %4388  ;;  %4408 = vpow2.f32 %v2033_v41  ;;  %v1971_v44 = vmul.f32 0.35355338, %v1946_v46  ;;  %v2119_v30 = vmul.f32 %v5195_v18, %v5172_v48  ;;  %v2137_v14 = vmul.f32 %v5201_v25, %v5178_v53  ;;  %v5303_v41 = vpop.permute.xlu0 %1688 }
 0x381   : > { %v4391_v50 = vpop.eup %4390  ;;  %4410 = vrcp.f32 %v2107_v34  ;;  %v2043_v51 = vmul.f32 1.442695, %v2008_v28  ;;  %v2097_v42 = vmul.f32 1.442695, %v2062_v38  ;;  %v2120_v56 = vmul.f32 %v5187_v5, %v5197_v12  ;;  %v5305_v25 = vpop.permute.xlu1 %1706 }
 0x382   : > { %v5298_v57 = vpop.eup %4392  ;;  %4412 = vpow2.f32 %v2087_v19  ;;  %v1989_v10 = vmax.f32 %v5208_v36, %v1971_v44  ;;  %v2155_v37 = vadd.f32 %v2137_v14, %v2119_v30  ;;  %v2138_v46 = vmul.f32 %v5192_v13, %v5203_v26 }
 0x383   : > { %v4395_v18 = vpop.eup %4394  ;;  %v2110_v63 = vadd.f32 %v5298_v57, %v5290_v43  ;;  %4414 = vpow2.f32 %v2039_v59  ;;  %v2121_v5 = vmul.f32 %v5229_v8, %v5217_v54  ;;  %v2139_v19 = vmul.f32 %v5234_v6, %v5223_v62 }
 0x384   : > { %v4397_v35 = vpop.eup %4396  ;;  %4416 = vpow2.f32 %v2093_v60  ;;  %v2007_v3 = vsub.f32 %v5208_v36, %v1989_v10  ;;  %v2061_v13 = vsub.f32 %v1971_v44, %v1989_v10  ;;  %v2191_v45 = vmul.f32 %v5252_v47, %v2155_v37  ;;  %v5327_v30 = vpop.permute.xlu0 %1690 }
 0x385   : > { %v4399_v24 = vpop.eup %4398  ;;  %4418 = vrcp.f32 %v2110_v63  ;;  %v2156_v9 = vadd.f32 %v2138_v46, %v2120_v56  ;;  %v2157_v11 = vadd.f32 %v2139_v19, %v2121_v5  ;;  %v2122_v7 = vmul.f32 %v5221_v58, %v5242_v33 }
 0x386   : > { %v4401_v59 = vpop.eup %4400  ;;  %v2109_v52 = vadd.f32 %v4399_v24, %v4395_v18  ;;  %4420 = vpow2.f32 %v2037_v27  ;;  %v2041_v8 = vmul.f32 1.442695, %v2007_v3  ;;  %v2095_v34 = vmul.f32 1.442695, %v2061_v13  ;;  %4160 = vmatprep.mubr.msk.f32.mxu1 %vm1143_vm5, %v2191_v45 }
 0x387   : > { %v4403_v6 = vpop.eup %4402  ;;  %4422 = vpow2.f32 %v2091_v29  ;;  %v2192_v36 = vmul.f32 %v5240_v32, %v2156_v9  ;;  %v2193_v60 = vmul.f32 %v4391_v50, %v2157_v11  ;;  %v2140_v47 = vmul.f32 %v5226_v1, %v5249_v40  ;;  %v5329_v29 = vpop.permute.xlu1 %1708 }
 0x388   : > { %v4405_v28 = vpop.eup %4404  ;;  %4424 = vrcp.f32 %v2109_v52  ;;  %v2123_v58 = vmul.f32 %v5257_v55, %v5274_v17  ;;  %v2141_v27 = vmul.f32 %v5261_v49, %v5276_v21  ;;  %v2124_v38 = vmul.f32 %v5236_v22, %v5303_v41 }
 0x389   : > { %v4407_v44 = vpop.eup %4406  ;;  %v2112_v32 = vadd.f32 %v4405_v28, %v4401_v59  ;;  %4426 = vpow2.f32 %v2043_v51  ;;  %4161 = vmatmul.mubr.msk.f32.gmra.mrb[20].mxu1 %vm1143_vm5, %v2192_v36  ;;  %v2158_v1 = vadd.f32 %v2140_v47, %v2122_v7  ;;  %v2142_v14 = vmul.f32 %v5247_v39, %v5305_v25 }
 0x38a   : > { %v4409_v55 = vpop.eup %4408  ;;  %4428 = vpow2.f32 %v2097_v42  ;;  %4163 = vmatprep.mubr.msk.f32.mxu1 %vm1143_vm5, %v2193_v60  ;;  %v2159_v49 = vadd.f32 %v2141_v27, %v2123_v58  ;;  %v2125_v22 = vmul.f32 %v5272_v16, %v5327_v30  ;;  %v2143_v50 = vmul.f32 %v5282_v15, %v5329_v29 }
 0x38b   : > { %v4411_v56 = vpop.eup %4410  ;;  %4430 = vrcp.f32 %v2112_v32  ;;  %v2194_v51 = vmul.f32 %v5285_v31, %v2158_v1  ;;  %v2160_v10 = vadd.f32 %v2142_v14, %v2124_v38  ;;  %v2126_v37 = vmul.f32 %v5263_v2, %v5144_v0 }
 0x38c   : > { %v4413_v39 = vpop.eup %4412  ;;  %4432 = vpow2.f32 %v2041_v8  ;;  %v2195_v42 = vmul.f32 %v4403_v6, %v2159_v49  ;;  %v2161_v46 = vadd.f32 %v2143_v50, %v2125_v22  ;;  %v2144_v63 = vmul.f32 %v5269_v4, %v5142_v61 }
 0x38d   : > { %v4415_v5 = vpop.eup %4414  ;;  %v2111_v16 = vadd.f32 %v4413_v39, %v4409_v55  ;;  %4434 = vpow2.f32 %v2095_v34  ;;  %4164 = vmatmul.mubr.msk.f32.gmra.mrb[22].mxu1 %vm1143_vm5, %v2194_v51  ;;  %v2196_v15 = vmul.f32 %v4397_v35, %v2160_v10  ;;  %v2127_v19 = vmul.f32 %v4395_v18, %v5156_v23  ;;  %v5380_v51 = vld [vmem:[%s6171_s4] ss:$0 sm:$0xff]  ;;  %s6174_s4 = scalar_lea.vmem %s6141_s17, %s4697_s23 }
 0x38e   : > { %v4417_v31 = vpop.eup %4416  ;;  %4166 = vmatprep.mubr.msk.f32.mxu1 %vm1143_vm5, %v2195_v42  ;;  %v2197_v3 = vmul.f32 %v4411_v56, %v2161_v46  ;;  %v2162_v0 = vadd.f32 %v2144_v63, %v2126_v37  ;;  %v2145_v2 = vmul.f32 %v4399_v24, %v5152_v20  ;;  %v2128_v13 = vmul.f32 %v5290_v43, %v5178_v53  ;;  %v4518_v46 = vld [vmem:[#allocation2 + $0x8] sm:$0xff] }
 0x38f   : > { %v4419_v45 = vpop.eup %4418  ;;  %4436 = vrcp.f32 %v2111_v16  ;;  %v2114_v61 = vadd.f32 %v4417_v31, %v4415_v5  ;;  %v2146_v4 = vmul.f32 %v5298_v57, %v5172_v48  ;;  %v2129_v35 = vmul.f32 %v4409_v55, %v5203_v26 }
 0x390   : > { %v4421_v9 = vpop.eup %4420  ;;  %v2198_v23 = vmul.f32 %v4407_v44, %v2162_v0  ;;  %v2163_v18 = vadd.f32 %v2145_v2, %v2127_v19  ;;  %v2147_v11 = vmul.f32 %v4413_v39, %v5197_v12  ;;  %v2130_v7 = vmul.f32 %v4401_v59, %v5223_v62 }
 0x391   : > { %v4423_v52 = vpop.eup %4422  ;;  %4438 = vrcp.f32 %v2114_v61  ;;  %4167 = vmatmul.mubr.msk.f32.gmra.mrb[24].mxu1 %vm1143_vm5, %v2196_v15  ;;  %v2164_v20 = vadd.f32 %v2146_v4, %v2128_v13  ;;  %v2148_v53 = vmul.f32 %v4405_v28, %v5217_v54  ;;  %v2131_v43 = vmul.f32 %v4421_v9, %v5249_v40  ;;  %v4520_v13 = vld [vmem:[#allocation2 + $0x10] sm:$0xff] }
 0x392   : > { %v4425_v24 = vpop.eup %4424  ;;  %v2113_v48 = vadd.f32 %v4423_v52, %v4421_v9  ;;  %4169 = vmatprep.mubr.msk.f32.mxu1 %vm1143_vm5, %v2197_v3  ;;  %v2165_v26 = vadd.f32 %v2147_v11, %v2129_v35  ;;  %v2149_v57 = vmul.f32 %v4423_v52, %v5242_v33  ;;  %v2132_v12 = vmul.f32 %v4415_v5, %v5276_v21  ;;  %v4519_v5 = vld [vmem:[#allocation2] sm:$0xff]  ;;  %v4522_v52 = vld [vmem:[#allocation2 + $0x28] sm:$0xff] }
 0x393   : > { %v4427_v8 = vpop.eup %4426  ;;  %v2199_v62 = vmul.f32 %v4425_v24, %v2163_v18  ;;  %v2200_v59 = vmul.f32 %v4419_v45, %v2164_v20  ;;  %v2166_v34 = vadd.f32 %v2148_v53, %v2130_v7  ;;  %v2150_v6 = vmul.f32 %v4417_v31, %v5274_v17  ;;  %v4521_v18 = vld [vmem:[#allocation2 + $0x18] sm:$0xff]  ;;  %v4523_v53 = vld [vmem:[#allocation2 + $0x20] sm:$0xff] }
 0x394   : > { %v4429_v36 = vpop.eup %4428  ;;  %4440 = vrcp.f32 %v2113_v48  ;;  %v2167_v54 = vadd.f32 %v2149_v57, %v2131_v43  ;;  %v2134_v40 = vmul.f32 %v4427_v8, %v5329_v29 }
 0x395   : > { %v4431_v60 = vpop.eup %4430  ;;  %v2116_v47 = vadd.f32 %v4429_v36, %v4427_v8  ;;  %4170 = vmatmul.mubr.msk.f32.gmra.mrb[26].mxu1 %vm1143_vm5, %v2198_v23  ;;  %v2168_v28 = vadd.f32 %v2150_v6, %v2132_v12  ;;  %v2152_v33 = vmul.f32 %v4429_v36, %v5327_v30  ;;  %v4525_v6 = vld [vmem:[#allocation2 + $0x30] sm:$0xff] }
 0x396   : > { %v4433_v58 = vpop.eup %4432  ;;  %4172 = vmatprep.mubr.msk.f32.mxu1 %vm1143_vm5, %v2199_v62  ;;  %v2202_v21 = vmul.f32 %v4431_v60, %v2166_v34 }
 0x397   : > { %v4435_v27 = vpop.eup %4434  ;;  %4442 = vrcp.f32 %v2116_v47  ;;  %v2133_v17 = vmul.f32 %v4433_v58, %v5305_v25  ;;  %v2170_v38 = vadd.f32 %v2152_v33, %v2134_v40 }
 0x398   : > { %v2115_v44 = vadd.f32 %v4435_v27, %v4433_v58  ;;  %v2151_v32 = vmul.f32 %v4435_v27, %v5303_v41  ;;  %v4526_v58 = vld [vmem:[#allocation2 + $0x48] sm:$0xff]  ;;  %v4527_v27 = vld [vmem:[#allocation2 + $0x40] sm:$0xff] }
 0x399   : > { %v4437_v29 = vpop.eup %4436  ;;  %4173 = vmatmul.mubr.msk.f32.gmra.mrb[28].mxu1 %vm1143_vm5, %v2200_v59  ;;  %v4524_v59 = vld [vmem:[#allocation2 + $0x38] sm:$0xff] }
 0x39a   : > { %4444 = vrcp.f32 %v2115_v44  ;;  %v2201_v1 = vmul.f32 %v4437_v29, %v2165_v26  ;;  %v2169_v14 = vadd.f32 %v2151_v32, %v2133_v17 }
 0x39b   : > { %v4439_v30 = vpop.eup %4438 }
 0x39c   : > { %4175 = vmatprep.mubr.msk.f32.mxu1 %vm1143_vm5, %v2201_v1  ;;  %v2204_v55 = vmul.f32 %v4439_v30, %v2168_v28  ;;  %v4528_v30 = vld [vmem:[#allocation2 + $0x58] sm:$0xff] }
 0x39d   : > { %4176 = vmatmul.mubr.msk.f32.gmra.mrb[30].mxu1 %vm1143_vm5, %v2202_v21 }
 0x39e   : > { %v4441_v49 = vpop.eup %4440 }
 0x39f   : > { %v2203_v22 = vmul.f32 %v4441_v49, %v2167_v54  ;;  %v4529_v49 = vld [vmem:[#allocation2 + $0x50] sm:$0xff] }
 0x3a1   : > { %v4443_v25 = vpop.eup %4442  ;;  %4178 = vmatprep.mubr.msk.f32.mxu1 %vm1143_vm5, %v2203_v22 }
 0x3a2   : > { %4179 = vmatmul.mubr.msk.f32.gmra.mrb[32].mxu1 %vm1143_vm5, %v2204_v55  ;;  %v2206_v41 = vmul.f32 %v4443_v25, %v2170_v38 }
 0x3a4   : > { %v4445_v50 = vpop.eup %4444 }
 0x3a5   : > { %v2205_v56 = vmul.f32 %v4445_v50, %v2169_v14 }
 0x3a7   : > { %4181 = vmatprep.mubr.msk.f32.mxu1 %vm1143_vm5, %v2205_v56 }
 0x3a8   : > { %4182 = vmatmul.mubr.msk.f32.gmra.mrb[34].mxu1 %vm1143_vm5, %v2206_v41 }
 0x451   : > { %v4159_v10 = vpop.f32.mrb[18].mxu1 }
 0x452   : > { %v2344_v37 = vadd.f32 %v4159_v10, %v5380_v51  ;;  %v2338_v39 = vpop.f32.mrb[19].mxu1 }
 0x453   : > { %v2339_v42 = vadd.f32 %v5380_v51, %v2338_v39 }
 0x454   : > { %v5384_v63 = vadd.f32 %v4518_v46, %v2344_v37  ;;  %v4530_v37 = vld [vmem:[#allocation2 + $0x68] sm:$0xff] }
 0x455   : > { %v5386_v16 = vadd.f32 %v4519_v5, %v2339_v42  ;;  %v4531_v42 = vld [vmem:[#allocation2 + $0x60] sm:$0xff] }
 0x456   : > { %v2450_v15 = vsel %vm1143_vm5, %v5384_v63, 0.0 }
 0x457   : > { %2451 = vadd.xlane.f32.xlu1 %v2450_v15  ;;  %v2447_v19 = vsel %vm1143_vm5, %v5386_v16, 0.0 }
 0x458   : > { %2448 = vadd.xlane.f32.xlu0 %v2447_v19 }
 0x45c   : > { %v4162_v31 = vpop.f32.mrb[20].mxu1 }
 0x45d   : > { %v2348_v3 = vpop.f32.mrb[21].mxu1  ;;  %v2354_v0 = vadd.f32 %v4162_v31, %v5380_v51 }
 0x45e   : > { %v2349_v2 = vadd.f32 %v5380_v51, %v2348_v3 }
 0x45f   : > { %v5400_v11 = vadd.f32 %v4521_v18, %v2354_v0 }
 0x460   : > { %v5394_v45 = vadd.f32 %v4520_v13, %v2349_v2  ;;  %v4165_v61 = vpop.f32.mrb[22].mxu1  ;;  %v4532_v2 = vld [vmem:[#allocation2 + $0x78] sm:$0xff] }
 0x461   : > { %v2364_v4 = vadd.f32 %v4165_v61, %v5380_v51  ;;  %v2358_v35 = vpop.f32.mrb[23].mxu1  ;;  %v2456_v26 = vsel %vm1143_vm5, %v5400_v11, 0.0  ;;  %v4533_v61 = vld [vmem:[#allocation2 + $0x70] sm:$0xff] }
 0x462   : > { %v2453_v9 = vsel %vm1143_vm5, %v5394_v45, 0.0  ;;  %v2359_v23 = vadd.f32 %v5380_v51, %v2358_v35 }
 0x463   : > { %2454 = vadd.xlane.f32.xlu0 %v2453_v9  ;;  %v5402_v20 = vadd.f32 %v4522_v52, %v2364_v4 }
 0x464   : > { %v4168_v7 = vpop.f32.mrb[24].mxu1  ;;  %v5404_v43 = vadd.f32 %v4523_v53, %v2359_v23  ;;  %v4534_v53 = vld [vmem:[#allocation2 + $0x88] sm:$0xff] }
 0x465   : > { %v2374_v24 = vadd.f32 %v4168_v7, %v5380_v51  ;;  %v2368_v48 = vpop.f32.mrb[25].mxu1  ;;  %v2462_v8 = vsel %vm1143_vm5, %v5402_v20, 0.0 }
 0x466   : > { %v2369_v57 = vadd.f32 %v5380_v51, %v2368_v48  ;;  %v2459_v12 = vsel %vm1143_vm5, %v5404_v43, 0.0  ;;  %v4535_v48 = vld [vmem:[#allocation2 + $0x80] sm:$0xff] }
 0x467   : > { %2457 = vadd.xlane.f32.xlu0 %v2456_v26  ;;  %2460 = vadd.xlane.f32.xlu1 %v2459_v12  ;;  %v5414_v34 = vadd.f32 %v4524_v59, %v2374_v24 }
 0x468   : > { %v4171_v62 = vpop.f32.mrb[26].mxu1  ;;  %v5416_v36 = vadd.f32 %v4525_v6, %v2369_v57 }
 0x469   : > { %v2384_v54 = vadd.f32 %v4171_v62, %v5380_v51  ;;  %v2378_v40 = vpop.f32.mrb[27].mxu1  ;;  %v2468_v28 = vsel %vm1143_vm5, %v5414_v34, 0.0  ;;  %v2731_v62 = vld [vmem:[%s4729_s6 + $0x8] sm:$0xff] }
 0x46a   : > { %v2379_v60 = vadd.f32 %v5380_v51, %v2378_v40  ;;  %v2465_v47 = vsel %vm1143_vm5, %v5416_v36, 0.0 }
 0x46b   : > { %2463 = vadd.xlane.f32.xlu0 %v2462_v8  ;;  %2466 = vadd.xlane.f32.xlu1 %v2465_v47  ;;  %v5424_v21 = vadd.f32 %v4526_v58, %v2384_v54  ;;  %v2730_v8 = vld [vmem:[%s4729_s6] sm:$0xff] }
 0x46c   : > { %v4174_v33 = vpop.f32.mrb[28].mxu1  ;;  %v5426_v17 = vadd.f32 %v4527_v27, %v2379_v60  ;;  %v4294_v59 = vpack.c.bf16 %v2731_v62, %v2730_v8 }
 0x46d   : > { %v2394_v38 = vadd.f32 %v4174_v33, %v5380_v51  ;;  %v2388_v44 = vpop.f32.mrb[29].mxu1  ;;  %v2474_v1 = vsel %vm1143_vm5, %v5424_v21, 0.0 }
 0x46e   : > { %v2389_v32 = vadd.f32 %v5380_v51, %v2388_v44  ;;  %v2471_v29 = vsel %vm1143_vm5, %v5426_v17, 0.0  ;;  %4295 = vmatprep.subr.bf16.mxu0 %v4294_v59 }
 0x46f   : > { %2469 = vadd.xlane.f32.xlu0 %v2468_v28  ;;  %2472 = vadd.xlane.f32.xlu1 %v2471_v29  ;;  %v5434_v55 = vadd.f32 %v4528_v30, %v2394_v38 }
 0x470   : > { %v4177_v14 = vpop.f32.mrb[30].mxu1  ;;  %v5436_v22 = vadd.f32 %v4529_v49, %v2389_v32  ;;  %4297 = vmatpush3.bf16.msra.mxu0 %v4294_v59 }
 0x471   : > { %v2404_v25 = vadd.f32 %v4177_v14, %v5380_v51  ;;  %v2398_v41 = vpop.f32.mrb[31].mxu1  ;;  %v2480_v10 = vsel %vm1143_vm5, %v5434_v55, 0.0 }
 0x472   : > { %v2399_v50 = vadd.f32 %v5380_v51, %v2398_v41  ;;  %v2477_v56 = vsel %vm1143_vm5, %v5436_v22, 0.0 }
 0x473   : > { %2475 = vadd.xlane.f32.xlu0 %v2474_v1  ;;  %2478 = vadd.xlane.f32.xlu1 %v2477_v56  ;;  %v5444_v39 = vadd.f32 %v4530_v37, %v2404_v25 }
 0x474   : > { %v5446_v46 = vadd.f32 %v4531_v42, %v2399_v50 }
 0x475   : > { %v4180_v5 = vpop.f32.mrb[32].mxu1  ;;  %v2486_v0 = vsel %vm1143_vm5, %v5444_v39, 0.0 }
 0x476   : > { %v2414_v15 = vadd.f32 %v4180_v5, %v5380_v51  ;;  %v2408_v19 = vpop.f32.mrb[33].mxu1  ;;  %v2483_v31 = vsel %vm1143_vm5, %v5446_v46, 0.0 }
 0x477   : > { %2481 = vadd.xlane.f32.xlu0 %v2480_v10  ;;  %v2409_v3 = vadd.f32 %v5380_v51, %v2408_v19  ;;  %2484 = vadd.xlane.f32.xlu1 %v2483_v31 }
 0x478   : > { %v5454_v13 = vadd.f32 %v4532_v2, %v2414_v15 }
 0x479   : > { %v5456_v4 = vadd.f32 %v4533_v61, %v2409_v3 }
 0x47a   : > { %v2492_v7 = vsel %vm1143_vm5, %v5454_v13, 0.0 }
 0x47b   : > { %2487 = vadd.xlane.f32.xlu0 %v2486_v0  ;;  %v4183_v35 = vpop.f32.mrb[34].mxu1  ;;  %v2489_v9 = vsel %vm1143_vm5, %v5456_v4, 0.0 }
 0x47c   : > { %v2424_v23 = vadd.f32 %v4183_v35, %v5380_v51  ;;  %v2418_v18 = vpop.f32.mrb[35].mxu1  ;;  %2490 = vadd.xlane.f32.xlu1 %v2489_v9 }
 0x47d   : > { %v2419_v52 = vadd.f32 %v5380_v51, %v2418_v18 }
 0x47e   : > { %v5464_v24 = vadd.f32 %v4534_v53, %v2424_v23 }
 0x47f   : > { %2493 = vadd.xlane.f32.xlu0 %v2492_v7  ;;  %v5466_v26 = vadd.f32 %v4535_v48, %v2419_v52 }
 0x480   : > { %v2498_v57 = vsel %vm1143_vm5, %v5464_v24, 0.0 }
 0x481   : > { %v2495_v12 = vsel %vm1143_vm5, %v5466_v26, 0.0 }
 0x482   : > { %2496 = vadd.xlane.f32.xlu1 %v2495_v12 }
 0x483   : > { %2499 = vadd.xlane.f32.xlu0 %v2498_v57 }
 0x4e4   : > { %v2452_v51 = vpop.xlane.xlu1 %2451 }
 0x4e5   : > { %v2503_v6 = vmul.f32 0.03125, %v2452_v51  ;;  %v2449_v54 = vpop.xlane.xlu0 %2448 }
 0x4e6   : > { %v2502_v40 = vmul.f32 0.03125, %v2449_v54 }
 0x4e7   : > { %v5475_v60 = vsub.f32 %v5384_v63, %v2503_v6 }
 0x4e8   : > { %v5478_v47 = vsub.f32 %v5386_v16, %v2502_v40 }
 0x4e9   : > { %v2539_v28 = vmul.f32 %v5475_v60, %v5475_v60 }
 0x4ea   : > { %v2538_v33 = vmul.f32 %v5478_v47, %v5478_v47 }
 0x4eb   : > { %v2559_v58 = vsel %vm1143_vm5, %v2539_v28, 0.0 }
 0x4ec   : > { %2560 = vadd.xlane.f32.xlu0 %v2559_v58  ;;  %v2556_v27 = vsel %vm1143_vm5, %v2538_v33, 0.0 }
 0x4ed   : > { %2557 = vadd.xlane.f32.xlu1 %v2556_v27 }
 0x4f0   : > { %v2455_v38 = vpop.xlane.xlu0 %2454 }
 0x4f1   : > { %v2504_v44 = vmul.f32 0.03125, %v2455_v38 }
 0x4f3   : > { %v5487_v63 = vsub.f32 %v5394_v45, %v2504_v44 }
 0x4f4   : > { %v2458_v32 = vpop.xlane.xlu0 %2457  ;;  %v2461_v16 = vpop.xlane.xlu1 %2460 }
 0x4f5   : > { %v2505_v29 = vmul.f32 0.03125, %v2458_v32  ;;  %v2506_v1 = vmul.f32 0.03125, %v2461_v16  ;;  %v2540_v14 = vmul.f32 %v5487_v63, %v5487_v63 }
 0x4f7   : > { %v5492_v30 = vsub.f32 %v5400_v11, %v2505_v29  ;;  %v5495_v49 = vsub.f32 %v5404_v43, %v2506_v1  ;;  %v2562_v25 = vsel %vm1143_vm5, %v2540_v14, 0.0 }
 0x4f8   : > { %2563 = vadd.xlane.f32.xlu1 %v2562_v25  ;;  %v2464_v41 = vpop.xlane.xlu0 %2463  ;;  %v2467_v50 = vpop.xlane.xlu1 %2466 }
 0x4f9   : > { %v2507_v45 = vmul.f32 0.03125, %v2464_v41  ;;  %v2508_v56 = vmul.f32 0.03125, %v2467_v50  ;;  %v2541_v10 = vmul.f32 %v5492_v30, %v5492_v30  ;;  %v2542_v37 = vmul.f32 %v5495_v49, %v5495_v49  ;;  %v2732_v41 = vld [vmem:[%s4729_s6 + $0x10] sm:$0xff] }
 0x4fb   : > { %v5503_v42 = vsub.f32 %v5402_v20, %v2507_v45  ;;  %v5506_v11 = vsub.f32 %v5416_v36, %v2508_v56  ;;  %v2565_v43 = vsel %vm1143_vm5, %v2541_v10, 0.0  ;;  %v2568_v5 = vsel %vm1143_vm5, %v2542_v37, 0.0 }
 0x4fc   : > { %2566 = vadd.xlane.f32.xlu0 %v2565_v43  ;;  %v2470_v15 = vpop.xlane.xlu0 %2469  ;;  %2569 = vadd.xlane.f32.xlu1 %v2568_v5  ;;  %v2473_v19 = vpop.xlane.xlu1 %2472 }
 0x4fd   : > { %v2509_v31 = vmul.f32 0.03125, %v2470_v15  ;;  %v2543_v3 = vmul.f32 %v5503_v42, %v5503_v42  ;;  %v2510_v0 = vmul.f32 0.03125, %v2473_v19  ;;  %v2544_v20 = vmul.f32 %v5506_v11, %v5506_v11 }
 0x4ff   : > { %v5515_v2 = vsub.f32 %v5414_v34, %v2509_v31  ;;  %v2571_v36 = vsel %vm1143_vm5, %v2543_v3, 0.0  ;;  %v5519_v61 = vsub.f32 %v5426_v17, %v2510_v0  ;;  %v2574_v35 = vsel %vm1143_vm5, %v2544_v20, 0.0 }
 0x500   : > { %2572 = vadd.xlane.f32.xlu0 %v2571_v36  ;;  %v2476_v9 = vpop.xlane.xlu0 %2475  ;;  %2575 = vadd.xlane.f32.xlu1 %v2574_v35  ;;  %v2479_v23 = vpop.xlane.xlu1 %2478  ;;  %v2968_v36 = vld [vmem:[%s4739_s1] sm:$0xff]  ;;  %v2969_v35 = vld [vmem:[%s4739_s1 + $0x8] sm:$0xff] }
 0x501   : > { %v2511_v18 = vmul.f32 0.03125, %v2476_v9  ;;  %v2545_v7 = vmul.f32 %v5515_v2, %v5515_v2  ;;  %v2512_v52 = vmul.f32 0.03125, %v2479_v23  ;;  %v2546_v34 = vmul.f32 %v5519_v61, %v5519_v61  ;;  %v2971_v23 = vld [vmem:[%s4739_s1 + $0x18] sm:$0xff] }
 0x502   : > { %v4302_v9 = vpack.c.bf16 %v2969_v35, %v2968_v36 }
 0x503   : > { %v5527_v53 = vsub.f32 %v5424_v21, %v2511_v18  ;;  %v2577_v17 = vsel %vm1143_vm5, %v2545_v7, 0.0  ;;  %v5531_v48 = vsub.f32 %v5436_v22, %v2512_v52  ;;  %v2580_v57 = vsel %vm1143_vm5, %v2546_v34, 0.0  ;;  %v2972_v7 = vld [vmem:[%s4739_s1 + $0x20] sm:$0xff]  ;;  %v2973_v52 = vld [vmem:[%s4739_s1 + $0x28] sm:$0xff] }
 0x504   : > { %2578 = vadd.xlane.f32.xlu0 %v2577_v17  ;;  %v2482_v12 = vpop.xlane.xlu0 %2481  ;;  %v2485_v8 = vpop.xlane.xlu1 %2484  ;;  %2581 = vadd.xlane.f32.xlu1 %v2580_v57  ;;  %v4310_v34 = vpack.c.bf16 %v2973_v52, %v2972_v7 }
 0x505   : > { %v2513_v62 = vmul.f32 0.03125, %v2482_v12  ;;  %v2547_v59 = vmul.f32 %v5527_v53, %v5527_v53  ;;  %v2514_v51 = vmul.f32 0.03125, %v2485_v8  ;;  %v2548_v21 = vmul.f32 %v5531_v48, %v5531_v48  ;;  %4303 = vmatprep.subr.bf16.mxu1 %v4302_v9 }
 0x506   : > { %4305 = vmatpush3.bf16.msra.mxu1 %v4302_v9 }
 0x507   : > { %v5539_v6 = vsub.f32 %v5434_v55, %v2513_v62  ;;  %v2583_v22 = vsel %vm1143_vm5, %v2547_v59, 0.0  ;;  %v5543_v54 = vsub.f32 %v5446_v46, %v2514_v51  ;;  %v2586_v40 = vsel %vm1143_vm5, %v2548_v21, 0.0 }
 0x508   : > { %2584 = vadd.xlane.f32.xlu0 %v2583_v22  ;;  %v2488_v28 = vpop.xlane.xlu0 %2487  ;;  %2587 = vadd.xlane.f32.xlu1 %v2586_v40  ;;  %v5595_v40 = vld [vmem:[%s6172_s0] ss:$0 sm:$0xff] }
 0x509   : > { %v2515_v33 = vmul.f32 0.03125, %v2488_v28  ;;  %v2549_v58 = vmul.f32 %v5539_v6, %v5539_v6  ;;  %v2491_v27 = vpop.xlane.xlu1 %2490  ;;  %v2550_v55 = vmul.f32 %v5543_v54, %v5543_v54 }
 0x50a   : > { %v2516_v38 = vmul.f32 0.03125, %v2491_v27 }
 0x50b   : > { %v5551_v44 = vsub.f32 %v5444_v39, %v2515_v33  ;;  %v2589_v46 = vsel %vm1143_vm5, %v2549_v58, 0.0  ;;  %v2592_v32 = vsel %vm1143_vm5, %v2550_v55, 0.0  ;;  %v2733_v39 = vld [vmem:[%s4729_s6 + $0x18] sm:$0xff]  ;;  %s6175_s6 = sld [smem:[#allocation15_spill]] (!%p3854_p5) }
 0x50c   : > { %2590 = vadd.xlane.f32.xlu0 %v2589_v46  ;;  %v2494_v16 = vpop.xlane.xlu0 %2493  ;;  %v5556_v29 = vsub.f32 %v5456_v4, %v2516_v38  ;;  %2593 = vadd.xlane.f32.xlu1 %v2592_v32  ;;  %v4298_v10 = vpack.c.bf16 %v2733_v39, %v2732_v41 }
 0x50d   : > { %v2517_v1 = vmul.f32 0.03125, %v2494_v16  ;;  %v2551_v14 = vmul.f32 %v5551_v44, %v5551_v44  ;;  %v5604_v16 = vld [vmem:[%s6173_s20] ss:$0 sm:$0xff] }
 0x50e   : > { %v2552_v25 = vmul.f32 %v5556_v29, %v5556_v29  ;;  %4299 = vmatprep.subr.bf16.mxu0 %v4298_v10 }
 0x50f   : > { %v5565_v50 = vsub.f32 %v5454_v13, %v2517_v1  ;;  %v2595_v45 = vsel %vm1143_vm5, %v2551_v14, 0.0  ;;  %v2497_v56 = vpop.xlane.xlu1 %2496  ;;  %4301 = vmatpush3.bf16.msra.mxu0 %v4298_v10 }
 0x510   : > { %2596 = vadd.xlane.f32.xlu0 %v2595_v45  ;;  %v2500_v4 = vpop.xlane.xlu0 %2499  ;;  %v2518_v37 = vmul.f32 0.03125, %v2497_v56  ;;  %v2598_v43 = vsel %vm1143_vm5, %v2552_v25, 0.0 }
 0x511   : > { %v2519_v5 = vmul.f32 0.03125, %v2500_v4  ;;  %v2553_v15 = vmul.f32 %v5565_v50, %v5565_v50  ;;  %2599 = vadd.xlane.f32.xlu1 %v2598_v43 }
 0x512   : > { %v5572_v13 = vsub.f32 %v5466_v26, %v2518_v37 }
 0x513   : > { %v5575_v19 = vsub.f32 %v5464_v24, %v2519_v5  ;;  %v2601_v31 = vsel %vm1143_vm5, %v2553_v15, 0.0  ;;  %v2970_v24 = vld [vmem:[%s4739_s1 + $0x10] sm:$0xff] }
 0x514   : > { %2602 = vadd.xlane.f32.xlu0 %v2601_v31  ;;  %v2554_v3 = vmul.f32 %v5572_v13, %v5572_v13  ;;  %v4306_v18 = vpack.c.bf16 %v2971_v23, %v2970_v24 }
 0x515   : > { %v2555_v0 = vmul.f32 %v5575_v19, %v5575_v19 }
 0x516   : > { %v2604_v20 = vsel %vm1143_vm5, %v2554_v3, 0.0  ;;  %4307 = vmatprep.subr.bf16.mxu1 %v4306_v18 }
 0x517   : > { %v2607_v26 = vsel %vm1143_vm5, %v2555_v0, 0.0  ;;  %2605 = vadd.xlane.f32.xlu1 %v2604_v20  ;;  %4309 = vmatpush3.bf16.msra.mxu1 %v4306_v18 }
 0x518   : > { %2608 = vadd.xlane.f32.xlu0 %v2607_v26  ;;  %4311 = vmatprep.subr.bf16.mxu1 %v4310_v34 }
 0x51b   : > { %4313 = vmatpush3.bf16.msra.mxu1 %v4310_v34 }
 0x579   : > { %v2561_v17 = vpop.xlane.xlu0 %2560 }
 0x57a   : > { %v2611_v57 = vmul.f32 0.03125, %v2561_v17  ;;  %v2558_v12 = vpop.xlane.xlu1 %2557 }
 0x57b   : > { %v2610_v8 = vmul.f32 0.03125, %v2558_v12 }
 0x57c   : > { %v2629_v62 = vadd.f32 1e-05, %v2611_v57 }
 0x57d   : > { %v2628_v59 = vadd.f32 1e-05, %v2610_v8 }
 0x57e   : > { %4446 = vrsqrt.f32 %v2629_v62 }
 0x57f   : > { %4448 = vrsqrt.f32 %v2628_v59 }
 0x585   : > { %v2564_v51 = vpop.xlane.xlu1 %2563 }
 0x586   : > { %v2612_v21 = vmul.f32 0.03125, %v2564_v51 }
 0x588   : > { %v4447_v22 = vpop.eup %4446  ;;  %v2630_v28 = vadd.f32 1e-05, %v2612_v21 }
 0x589   : > { %v4449_v33 = vpop.eup %4448  ;;  %v2665_v58 = vmul.f32 %v4447_v22, %v5475_v60  ;;  %v2567_v27 = vpop.xlane.xlu0 %2566 }
 0x58a   : > { %v2570_v55 = vpop.xlane.xlu1 %2569  ;;  %4450 = vrsqrt.f32 %v2630_v28  ;;  %v2613_v38 = vmul.f32 0.03125, %v2567_v27  ;;  %v2664_v32 = vmul.f32 %v4449_v33, %v5478_v47 }
 0x58b   : > { %v2614_v46 = vmul.f32 0.03125, %v2570_v55  ;;  %v2689_v1 = vmul.f32 %v5595_v40, %v2665_v58 }
 0x58c   : > { %v2631_v14 = vadd.f32 1e-05, %v2613_v38  ;;  %v2688_v41 = vmul.f32 %v5595_v40, %v2664_v32 }
 0x58d   : > { %v2632_v25 = vadd.f32 1e-05, %v2614_v46  ;;  %v2573_v60 = vpop.xlane.xlu0 %2572  ;;  %v5612_v47 = vadd.f32 %v5604_v16, %v2689_v1 }
 0x58e   : > { %v2576_v39 = vpop.xlane.xlu1 %2575  ;;  %4452 = vrsqrt.f32 %v2631_v14  ;;  %v2615_v45 = vmul.f32 0.03125, %v2573_v60  ;;  %v5609_v10 = vadd.f32 %v5604_v16, %v2688_v41 }
 0x58f   : > { %v2616_v56 = vmul.f32 0.03125, %v2576_v39  ;;  %4454 = vrsqrt.f32 %v2632_v25 }
 0x590   : > { %v2633_v4 = vadd.f32 1e-05, %v2615_v45  ;;  %4192 = vmatprep.mubr.msk.f32.mxu0 %vm1143_vm5, %v5609_v10 }
 0x591   : > { %v2634_v37 = vadd.f32 1e-05, %v2616_v56  ;;  %v2579_v43 = vpop.xlane.xlu0 %2578  ;;  %4193 = vmatmul.mubr.msk.f32.vlgmr.msra.gmra.mrb[36].mxu0 %vm1143_vm5, %v5612_v47 }
 0x592   : > { %v2582_v5 = vpop.xlane.xlu1 %2581  ;;  %4456 = vrsqrt.f32 %v2633_v4  ;;  %v2617_v15 = vmul.f32 0.03125, %v2579_v43 }
 0x593   : > { %v2618_v31 = vmul.f32 0.03125, %v2582_v5  ;;  %4458 = vrsqrt.f32 %v2634_v37 }
 0x594   : > { %v4451_v3 = vpop.eup %4450  ;;  %v2635_v0 = vadd.f32 1e-05, %v2617_v15 }
 0x595   : > { %v2636_v20 = vadd.f32 1e-05, %v2618_v31  ;;  %v2585_v26 = vpop.xlane.xlu0 %2584  ;;  %v2666_v35 = vmul.f32 %v4451_v3, %v5487_v63 }
 0x596   : > { %v2588_v36 = vpop.xlane.xlu1 %2587  ;;  %4460 = vrsqrt.f32 %v2635_v0  ;;  %v2619_v24 = vmul.f32 0.03125, %v2585_v26 }
 0x597   : > { %v2620_v9 = vmul.f32 0.03125, %v2588_v36  ;;  %4462 = vrsqrt.f32 %v2636_v20  ;;  %v2690_v23 = vmul.f32 %v5595_v40, %v2666_v35 }
 0x598   : > { %v4453_v18 = vpop.eup %4452  ;;  %v2637_v7 = vadd.f32 1e-05, %v2619_v24 }
 0x599   : > { %v2638_v52 = vadd.f32 1e-05, %v2620_v9  ;;  %v4455_v34 = vpop.eup %4454  ;;  %v2591_v17 = vpop.xlane.xlu0 %2590  ;;  %v5621_v57 = vadd.f32 %v5604_v16, %v2690_v23  ;;  %v2667_v8 = vmul.f32 %v4453_v18, %v5492_v30 }
 0x59a   : > { %v2594_v12 = vpop.xlane.xlu1 %2593  ;;  %4464 = vrsqrt.f32 %v2637_v7  ;;  %v2621_v62 = vmul.f32 0.03125, %v2591_v17  ;;  %v2668_v59 = vmul.f32 %v4455_v34, %v5495_v49 }
 0x59b   : > { %v2622_v63 = vmul.f32 0.03125, %v2594_v12  ;;  %4466 = vrsqrt.f32 %v2638_v52  ;;  %4195 = vmatprep.mubr.msk.f32.mxu0 %vm1143_vm5, %v5621_v57  ;;  %v2691_v51 = vmul.f32 %v5595_v40, %v2667_v8 }
 0x59c   : > { %v4457_v21 = vpop.eup %4456  ;;  %v2639_v22 = vadd.f32 1e-05, %v2621_v62  ;;  %v2692_v33 = vmul.f32 %v5595_v40, %v2668_v59 }
 0x59d   : > { %v2640_v28 = vadd.f32 1e-05, %v2622_v63  ;;  %v4459_v58 = vpop.eup %4458  ;;  %v2597_v27 = vpop.xlane.xlu0 %2596  ;;  %v5630_v30 = vadd.f32 %v5604_v16, %v2691_v51  ;;  %v2669_v55 = vmul.f32 %v4457_v21, %v5503_v42 }
 0x59e   : > { %4468 = vrsqrt.f32 %v2639_v22  ;;  %v2623_v49 = vmul.f32 0.03125, %v2597_v27  ;;  %v2600_v38 = vpop.xlane.xlu1 %2599  ;;  %v5634_v46 = vadd.f32 %v5604_v16, %v2692_v33  ;;  %v2670_v32 = vmul.f32 %v4459_v58, %v5506_v11 }
 0x59f   : > { %4470 = vrsqrt.f32 %v2640_v28  ;;  %4196 = vmatmul.mubr.msk.f32.gmra.mrb[38].mxu0 %vm1143_vm5, %v5630_v30  ;;  %v2624_v1 = vmul.f32 0.03125, %v2600_v38  ;;  %v2693_v14 = vmul.f32 %v5595_v40, %v2669_v55 }
 0x5a0   : > { %v4461_v25 = vpop.eup %4460  ;;  %v2641_v41 = vadd.f32 1e-05, %v2623_v49  ;;  %4198 = vmatprep.mubr.msk.f32.mxu0 %vm1143_vm5, %v5634_v46  ;;  %v2694_v42 = vmul.f32 %v5595_v40, %v2670_v32 }
 0x5a1   : > { %v4463_v60 = vpop.eup %4462  ;;  %v2603_v39 = vpop.xlane.xlu0 %2602  ;;  %v2642_v45 = vadd.f32 1e-05, %v2624_v1  ;;  %v5644_v56 = vadd.f32 %v5604_v16, %v2693_v14  ;;  %v2671_v11 = vmul.f32 %v4461_v25, %v5515_v2 }
 0x5a2   : > { %4472 = vrsqrt.f32 %v2641_v41  ;;  %v2625_v4 = vmul.f32 0.03125, %v2603_v39  ;;  %v5648_v37 = vadd.f32 %v5604_v16, %v2694_v42  ;;  %v2672_v43 = vmul.f32 %v4463_v60, %v5519_v61 }
 0x5a3   : > { %4474 = vrsqrt.f32 %v2642_v45  ;;  %4199 = vmatmul.mubr.msk.f32.gmra.mrb[40].mxu0 %vm1143_vm5, %v5644_v56  ;;  %v2695_v5 = vmul.f32 %v5595_v40, %v2671_v11 }
 0x5a4   : > { %v4465_v15 = vpop.eup %4464  ;;  %v2643_v31 = vadd.f32 1e-05, %v2625_v4  ;;  %v2606_v3 = vpop.xlane.xlu1 %2605  ;;  %4201 = vmatprep.mubr.msk.f32.mxu0 %vm1143_vm5, %v5648_v37  ;;  %v2696_v2 = vmul.f32 %v5595_v40, %v2672_v43 }
 0x5a5   : > { %v4467_v0 = vpop.eup %4466  ;;  %v2609_v20 = vpop.xlane.xlu0 %2608  ;;  %v2626_v26 = vmul.f32 0.03125, %v2606_v3  ;;  %v5658_v36 = vadd.f32 %v5604_v16, %v2695_v5  ;;  %v2673_v61 = vmul.f32 %v4465_v15, %v5527_v53 }
 0x5a6   : > { %4476 = vrsqrt.f32 %v2643_v31  ;;  %v2627_v35 = vmul.f32 0.03125, %v2609_v20  ;;  %v5662_v24 = vadd.f32 %v5604_v16, %v2696_v2  ;;  %v2674_v9 = vmul.f32 %v4467_v0, %v5531_v48 }
 0x5a7   : > { %v2644_v23 = vadd.f32 1e-05, %v2626_v26  ;;  %4202 = vmatmul.mubr.msk.f32.gmra.mrb[42].mxu0 %vm1143_vm5, %v5658_v36  ;;  %v2697_v18 = vmul.f32 %v5595_v40, %v2673_v61 }
 0x5a8   : > { %v4469_v7 = vpop.eup %4468  ;;  %v2645_v52 = vadd.f32 1e-05, %v2627_v35  ;;  %4204 = vmatprep.mubr.msk.f32.mxu0 %vm1143_vm5, %v5662_v24  ;;  %v2698_v53 = vmul.f32 %v5595_v40, %v2674_v9 }
 0x5a9   : > { %v4471_v34 = vpop.eup %4470  ;;  %4478 = vrsqrt.f32 %v2644_v23  ;;  %v5672_v17 = vadd.f32 %v5604_v16, %v2697_v18  ;;  %v2675_v48 = vmul.f32 %v4469_v7, %v5539_v6 }
 0x5aa   : > { %4480 = vrsqrt.f32 %v2645_v52  ;;  %v5676_v12 = vadd.f32 %v5604_v16, %v2698_v53  ;;  %v2676_v8 = vmul.f32 %v4471_v34, %v5543_v54 }
 0x5ab   : > { %4205 = vmatmul.mubr.msk.f32.gmra.mrb[44].mxu0 %vm1143_vm5, %v5672_v17  ;;  %v2699_v62 = vmul.f32 %v5595_v40, %v2675_v48 }
 0x5ac   : > { %v4473_v63 = vpop.eup %4472  ;;  %4207 = vmatprep.mubr.msk.f32.mxu0 %vm1143_vm5, %v5676_v12  ;;  %v2700_v59 = vmul.f32 %v5595_v40, %v2676_v8 }
 0x5ad   : > { %v4475_v51 = vpop.eup %4474  ;;  %v5686_v6 = vadd.f32 %v5604_v16, %v2699_v62  ;;  %v2677_v21 = vmul.f32 %v4473_v63, %v5551_v44 }
 0x5ae   : > { %v5690_v22 = vadd.f32 %v5604_v16, %v2700_v59  ;;  %v2678_v54 = vmul.f32 %v4475_v51, %v5556_v29 }
 0x5af   : > { %4208 = vmatmul.mubr.msk.f32.gmra.mrb[46].mxu0 %vm1143_vm5, %v5686_v6  ;;  %v2701_v28 = vmul.f32 %v5595_v40, %v2677_v21 }
 0x5b0   : > { %v4477_v33 = vpop.eup %4476  ;;  %4210 = vmatprep.mubr.msk.f32.mxu0 %vm1143_vm5, %v5690_v22  ;;  %v2702_v58 = vmul.f32 %v5595_v40, %v2678_v54 }
 0x5b1   : > { %v5700_v27 = vadd.f32 %v5604_v16, %v2701_v28  ;;  %v2679_v44 = vmul.f32 %v4477_v33, %v5565_v50 }
 0x5b2   : > { %v5704_v55 = vadd.f32 %v5604_v16, %v2702_v58 }
 0x5b3   : > { %v4479_v29 = vpop.eup %4478  ;;  %4211 = vmatmul.mubr.msk.f32.gmra.mrb[48].mxu0 %vm1143_vm5, %v5700_v27  ;;  %v2703_v49 = vmul.f32 %v5595_v40, %v2679_v44 }
 0x5b4   : > { %v4481_v38 = vpop.eup %4480  ;;  %4213 = vmatprep.mubr.msk.f32.mxu0 %vm1143_vm5, %v5704_v55  ;;  %v2680_v32 = vmul.f32 %v4479_v29, %v5572_v13  ;;  %v2974_v13 = vld [vmem:[%s4739_s1 + $0x30] sm:$0xff] }
 0x5b5   : > { %v5713_v50 = vadd.f32 %v5604_v16, %v2703_v49  ;;  %v2681_v1 = vmul.f32 %v4481_v38, %v5575_v19  ;;  %v2975_v19 = vld [vmem:[%s4739_s1 + $0x38] sm:$0xff] }
 0x5b6   : > { %v2704_v14 = vmul.f32 %v5595_v40, %v2680_v32  ;;  %v4314_v60 = vpack.c.bf16 %v2975_v19, %v2974_v13 }
 0x5b7   : > { %4214 = vmatmul.mubr.msk.f32.gmra.mrb[50].mxu0 %vm1143_vm5, %v5713_v50  ;;  %v2705_v25 = vmul.f32 %v5595_v40, %v2681_v1  ;;  %v5737_v40 = vld [vmem:[%s773_s8] ss:$0 sm:$0xff] }
 0x5b8   : > { %v5721_v41 = vadd.f32 %v5604_v16, %v2704_v14  ;;  %4315 = vmatprep.subr.bf16.mxu1 %v4314_v60 }
 0x5b9   : > { %v5724_v42 = vadd.f32 %v5604_v16, %v2705_v25  ;;  %4317 = vmatpush3.bf16.msra.mxu1 %v4314_v60 }
 0x5ba   : > { %4216 = vmatprep.mubr.msk.f32.mxu0 %vm1143_vm5, %v5721_v41 }
 0x5bb   : > { %4217 = vmatmul.mubr.msk.f32.gmra.mrb[52].mxu0 %vm1143_vm5, %v5724_v42 }
 0x664   : > { %v4194_v39 = vpop.f32.mrb[36].mxu0 }
 0x665   : > { %v2867_v16 = vadd.f32 %v4194_v39, %v5737_v40  ;;  %v2861_v45 = vpop.f32.mrb[37].mxu0 }
 0x666   : > { %v2862_v11 = vadd.f32 %v5737_v40, %v2861_v45 }
 0x667   : > { %v2951_v43 = vmax.f32 %v2867_v16, 0.0 }
 0x668   : > { %v2950_v4 = vmax.f32 %v2862_v11, 0.0 }
 0x66a   : > { %4235 = vmatprep.mubr.msk.f32.mxu1 %vm2983_vm6, %v2950_v4 }
 0x66b   : > { %4236 = vmatmul.mubr.msk.f32.vlgmr.msra.gmra.mrb[36].mxu1 %vm2983_vm6, %v2951_v43 }
 0x672   : > { %v4197_v5 = vpop.f32.mrb[38].mxu0 }
 0x673   : > { %v2877_v15 = vadd.f32 %v4197_v5, %v5737_v40  ;;  %v2871_v31 = vpop.f32.mrb[39].mxu0 }
 0x674   : > { %v2872_v3 = vadd.f32 %v5737_v40, %v2871_v31 }
 0x675   : > { %v2953_v20 = vmax.f32 %v2877_v15, 0.0 }
 0x676   : > { %v2952_v2 = vmax.f32 %v2872_v3, 0.0  ;;  %v4200_v0 = vpop.f32.mrb[40].mxu0  ;;  %v5780_v3 = vld [vmem:[%s781_s2] ss:$0 sm:$0xff] }
 0x677   : > { %v2887_v26 = vadd.f32 %v4200_v0, %v5737_v40  ;;  %v2881_v61 = vpop.f32.mrb[41].mxu0 }
 0x678   : > { %v2882_v35 = vadd.f32 %v5737_v40, %v2881_v61  ;;  %4238 = vmatprep.mubr.msk.f32.mxu1 %vm2983_vm6, %v2952_v2 }
 0x679   : > { %4239 = vmatmul.mubr.msk.f32.gmra.mrb[38].mxu1 %vm2983_vm6, %v2953_v20  ;;  %v2955_v18 = vmax.f32 %v2887_v26, 0.0 }
 0x67a   : > { %v2954_v9 = vmax.f32 %v2882_v35, 0.0  ;;  %v4203_v23 = vpop.f32.mrb[42].mxu0 }
 0x67b   : > { %v2897_v7 = vadd.f32 %v4203_v23, %v5737_v40  ;;  %v2891_v52 = vpop.f32.mrb[43].mxu0 }
 0x67c   : > { %v2892_v53 = vadd.f32 %v5737_v40, %v2891_v52  ;;  %4241 = vmatprep.mubr.msk.f32.mxu1 %vm2983_vm6, %v2954_v9 }
 0x67d   : > { %4242 = vmatmul.mubr.msk.f32.gmra.mrb[40].mxu1 %vm2983_vm6, %v2955_v18  ;;  %v2957_v8 = vmax.f32 %v2897_v7, 0.0 }
 0x67e   : > { %v2956_v34 = vmax.f32 %v2892_v53, 0.0  ;;  %v4206_v48 = vpop.f32.mrb[44].mxu0 }
 0x67f   : > { %v2907_v62 = vadd.f32 %v4206_v48, %v5737_v40  ;;  %v2901_v63 = vpop.f32.mrb[45].mxu0 }
 0x680   : > { %v2902_v59 = vadd.f32 %v5737_v40, %v2901_v63  ;;  %4244 = vmatprep.mubr.msk.f32.mxu1 %vm2983_vm6, %v2956_v34 }
 0x681   : > { %4245 = vmatmul.mubr.msk.f32.gmra.mrb[42].mxu1 %vm2983_vm6, %v2957_v8  ;;  %v2959_v54 = vmax.f32 %v2907_v62, 0.0 }
 0x682   : > { %v2958_v51 = vmax.f32 %v2902_v59, 0.0  ;;  %v4209_v21 = vpop.f32.mrb[46].mxu0 }
 0x683   : > { %v2917_v28 = vadd.f32 %v4209_v21, %v5737_v40  ;;  %v2911_v33 = vpop.f32.mrb[47].mxu0 }
 0x684   : > { %v2912_v58 = vadd.f32 %v5737_v40, %v2911_v33  ;;  %4247 = vmatprep.mubr.msk.f32.mxu1 %vm2983_vm6, %v2958_v51 }
 0x685   : > { %4248 = vmatmul.mubr.msk.f32.gmra.mrb[44].mxu1 %vm2983_vm6, %v2959_v54  ;;  %v2961_v49 = vmax.f32 %v2917_v28, 0.0 }
 0x686   : > { %v2960_v44 = vmax.f32 %v2912_v58, 0.0  ;;  %v4212_v29 = vpop.f32.mrb[48].mxu0 }
 0x687   : > { %v2927_v38 = vadd.f32 %v4212_v29, %v5737_v40  ;;  %v2921_v32 = vpop.f32.mrb[49].mxu0 }
 0x688   : > { %v2922_v1 = vadd.f32 %v5737_v40, %v2921_v32  ;;  %4250 = vmatprep.mubr.msk.f32.mxu1 %vm2983_vm6, %v2960_v44 }
 0x689   : > { %4251 = vmatmul.mubr.msk.f32.gmra.mrb[46].mxu1 %vm2983_vm6, %v2961_v49  ;;  %v2963_v13 = vmax.f32 %v2927_v38, 0.0 }
 0x68a   : > { %v2962_v14 = vmax.f32 %v2922_v1, 0.0  ;;  %v4215_v25 = vpop.f32.mrb[50].mxu0 }
 0x68b   : > { %v2937_v19 = vadd.f32 %v4215_v25, %v5737_v40  ;;  %v2931_v60 = vpop.f32.mrb[51].mxu0 }
 0x68c   : > { %v2932_v39 = vadd.f32 %v5737_v40, %v2931_v60  ;;  %4253 = vmatprep.mubr.msk.f32.mxu1 %vm2983_vm6, %v2962_v14 }
 0x68d   : > { %4254 = vmatmul.mubr.msk.f32.gmra.mrb[48].mxu1 %vm2983_vm6, %v2963_v13  ;;  %v2965_v11 = vmax.f32 %v2937_v19, 0.0 }
 0x68e   : > { %v2964_v16 = vmax.f32 %v2932_v39, 0.0  ;;  %v4218_v45 = vpop.f32.mrb[52].mxu0 }
 0x68f   : > { %v2947_v4 = vadd.f32 %v4218_v45, %v5737_v40  ;;  %v2941_v43 = vpop.f32.mrb[53].mxu0 }
 0x690   : > { %v2942_v5 = vadd.f32 %v5737_v40, %v2941_v43  ;;  %4256 = vmatprep.mubr.msk.f32.mxu1 %vm2983_vm6, %v2964_v16 }
 0x691   : > { %4257 = vmatmul.mubr.msk.f32.gmra.mrb[50].mxu1 %vm2983_vm6, %v2965_v11  ;;  %v2967_v31 = vmax.f32 %v2947_v4, 0.0 }
 0x692   : > { %v2966_v15 = vmax.f32 %v2942_v5, 0.0 }
 0x694   : > { %4259 = vmatprep.mubr.msk.f32.mxu1 %vm2983_vm6, %v2966_v15 }
 0x695   : > { %4260 = vmatmul.mubr.msk.f32.gmra.mrb[52].mxu1 %vm2983_vm6, %v2967_v31 }
 0x73e   : > { %v4237_v2 = vpop.f32.mrb[36].mxu1 }
 0x73f   : > { %v3110_v0 = vadd.f32 %v4237_v2, %v5780_v3  ;;  %v3104_v40 = vpop.f32.mrb[37].mxu1 }
 0x740   : > { %v3105_v20 = vadd.f32 %v5780_v3, %v3104_v40 }
 0x741   : > { %v5785_v26 = vadd.f32 %v3110_v0, %v5612_v47 }
 0x742   : > { %v5788_v61 = vadd.f32 %v3105_v20, %v5609_v10 }
 0x743   : > { %v3216_v35 = vsel %vm1143_vm5, %v5785_v26, 0.0 }
 0x744   : > { %3217 = vadd.xlane.f32.xlu0 %v3216_v35  ;;  %v3213_v9 = vsel %vm1143_vm5, %v5788_v61, 0.0 }
 0x745   : > { %3214 = vadd.xlane.f32.xlu1 %v3213_v9 }
 0x74c   : > { %v4240_v23 = vpop.f32.mrb[38].mxu1 }
 0x74d   : > { %v3120_v18 = vadd.f32 %v4240_v23, %v5780_v3  ;;  %v3114_v7 = vpop.f32.mrb[39].mxu1 }
 0x74e   : > { %v3115_v52 = vadd.f32 %v5780_v3, %v3114_v7 }
 0x74f   : > { %v5797_v47 = vadd.f32 %v3120_v18, %v5630_v30 }
 0x750   : > { %v4243_v53 = vpop.f32.mrb[40].mxu1  ;;  %v5800_v10 = vadd.f32 %v3115_v52, %v5621_v57 }
 0x751   : > { %v3130_v34 = vadd.f32 %v4243_v53, %v5780_v3  ;;  %v3222_v48 = vsel %vm1143_vm5, %v5797_v47, 0.0  ;;  %v3124_v8 = vpop.f32.mrb[41].mxu1 }
 0x752   : > { %3223 = vadd.xlane.f32.xlu0 %v3222_v48  ;;  %v3125_v62 = vadd.f32 %v5780_v3, %v3124_v8  ;;  %v3219_v63 = vsel %vm1143_vm5, %v5800_v10, 0.0 }
 0x753   : > { %3220 = vadd.xlane.f32.xlu1 %v3219_v63  ;;  %v5809_v30 = vadd.f32 %v3130_v34, %v5644_v56 }
 0x754   : > { %v4246_v59 = vpop.f32.mrb[42].mxu1  ;;  %v5812_v57 = vadd.f32 %v3125_v62, %v5634_v46 }
 0x755   : > { %v3140_v51 = vadd.f32 %v4246_v59, %v5780_v3  ;;  %v3134_v21 = vpop.f32.mrb[43].mxu1  ;;  %v3228_v54 = vsel %vm1143_vm5, %v5809_v30, 0.0 }
 0x756   : > { %v3135_v28 = vadd.f32 %v5780_v3, %v3134_v21  ;;  %3229 = vadd.xlane.f32.xlu0 %v3228_v54  ;;  %v3225_v33 = vsel %vm1143_vm5, %v5812_v57, 0.0 }
 0x757   : > { %3226 = vadd.xlane.f32.xlu1 %v3225_v33  ;;  %v5821_v56 = vadd.f32 %v3140_v51, %v5658_v36 }
 0x758   : > { %v4249_v58 = vpop.f32.mrb[44].mxu1  ;;  %v5824_v46 = vadd.f32 %v3135_v28, %v5648_v37 }
 0x759   : > { %v3150_v44 = vadd.f32 %v4249_v58, %v5780_v3  ;;  %v3234_v29 = vsel %vm1143_vm5, %v5821_v56, 0.0  ;;  %v3144_v49 = vpop.f32.mrb[45].mxu1 }
 0x75a   : > { %3235 = vadd.xlane.f32.xlu0 %v3234_v29  ;;  %v3145_v38 = vadd.f32 %v5780_v3, %v3144_v49  ;;  %v3231_v32 = vsel %vm1143_vm5, %v5824_v46, 0.0 }
 0x75b   : > { %3232 = vadd.xlane.f32.xlu1 %v3231_v32  ;;  %v5833_v36 = vadd.f32 %v3150_v44, %v5672_v17 }
 0x75c   : > { %v4252_v1 = vpop.f32.mrb[46].mxu1  ;;  %v5836_v37 = vadd.f32 %v3145_v38, %v5662_v24 }
 0x75d   : > { %v3160_v14 = vadd.f32 %v4252_v1, %v5780_v3  ;;  %v3154_v25 = vpop.f32.mrb[47].mxu1  ;;  %v3240_v13 = vsel %vm1143_vm5, %v5833_v36, 0.0 }
 0x75e   : > { %v3155_v19 = vadd.f32 %v5780_v3, %v3154_v25  ;;  %3241 = vadd.xlane.f32.xlu0 %v3240_v13  ;;  %v3237_v60 = vsel %vm1143_vm5, %v5836_v37, 0.0 }
 0x75f   : > { %3238 = vadd.xlane.f32.xlu1 %v3237_v60  ;;  %v5845_v17 = vadd.f32 %v3160_v14, %v5686_v6 }
 0x760   : > { %v4255_v39 = vpop.f32.mrb[48].mxu1  ;;  %v5848_v24 = vadd.f32 %v3155_v19, %v5676_v12 }
 0x761   : > { %v3170_v16 = vadd.f32 %v4255_v39, %v5780_v3  ;;  %v3164_v45 = vpop.f32.mrb[49].mxu1  ;;  %v3246_v11 = vsel %vm1143_vm5, %v5845_v17, 0.0 }
 0x762   : > { %v3165_v4 = vadd.f32 %v5780_v3, %v3164_v45  ;;  %3247 = vadd.xlane.f32.xlu0 %v3246_v11  ;;  %v3243_v43 = vsel %vm1143_vm5, %v5848_v24, 0.0 }
 0x763   : > { %3244 = vadd.xlane.f32.xlu1 %v3243_v43  ;;  %v5857_v6 = vadd.f32 %v3170_v16, %v5700_v27 }
 0x764   : > { %v4258_v5 = vpop.f32.mrb[50].mxu1  ;;  %v5860_v12 = vadd.f32 %v3165_v4, %v5690_v22 }
 0x765   : > { %v3180_v15 = vadd.f32 %v4258_v5, %v5780_v3  ;;  %v3174_v31 = vpop.f32.mrb[51].mxu1  ;;  %v3252_v2 = vsel %vm1143_vm5, %v5857_v6, 0.0 }
 0x766   : > { %v3175_v0 = vadd.f32 %v5780_v3, %v3174_v31  ;;  %3253 = vadd.xlane.f32.xlu0 %v3252_v2  ;;  %v3249_v40 = vsel %vm1143_vm5, %v5860_v12, 0.0 }
 0x767   : > { %3250 = vadd.xlane.f32.xlu1 %v3249_v40  ;;  %v5869_v27 = vadd.f32 %v3180_v15, %v5713_v50 }
 0x768   : > { %v4261_v20 = vpop.f32.mrb[52].mxu1  ;;  %v5872_v22 = vadd.f32 %v3175_v0, %v5704_v55 }
 0x769   : > { %v3190_v35 = vadd.f32 %v4261_v20, %v5780_v3  ;;  %v3184_v9 = vpop.f32.mrb[53].mxu1  ;;  %v3258_v23 = vsel %vm1143_vm5, %v5869_v27, 0.0 }
 0x76a   : > { %v3185_v18 = vadd.f32 %v5780_v3, %v3184_v9  ;;  %3259 = vadd.xlane.f32.xlu0 %v3258_v23  ;;  %v3255_v7 = vsel %vm1143_vm5, %v5872_v22, 0.0 }
 0x76b   : > { %3256 = vadd.xlane.f32.xlu1 %v3255_v7  ;;  %v5881_v50 = vadd.f32 %v3190_v35, %v5724_v42 }
 0x76c   : > { %v5884_v52 = vadd.f32 %v3185_v18, %v5721_v41 }
 0x76d   : > { %v3264_v55 = vsel %vm1143_vm5, %v5881_v50, 0.0 }
 0x76e   : > { %3265 = vadd.xlane.f32.xlu0 %v3264_v55  ;;  %v3261_v53 = vsel %vm1143_vm5, %v5884_v52, 0.0 }
 0x76f   : > { %3262 = vadd.xlane.f32.xlu1 %v3261_v53 }
 0x7d1   : > { %v3218_v3 = vpop.xlane.xlu0 %3217 }
 0x7d2   : > { %v3268_v34 = vmul.f32 0.03125, %v3218_v3  ;;  %v3215_v48 = vpop.xlane.xlu1 %3214 }
 0x7d3   : > { %v3267_v8 = vmul.f32 0.03125, %v3215_v48 }
 0x7d4   : > { %v5891_v62 = vsub.f32 %v5785_v26, %v3268_v34 }
 0x7d5   : > { %v5894_v42 = vsub.f32 %v5788_v61, %v3267_v8 }
 0x7d6   : > { %v3304_v41 = vmul.f32 %v5891_v62, %v5891_v62 }
 0x7d7   : > { %v3303_v63 = vmul.f32 %v5894_v42, %v5894_v42 }
 0x7d8   : > { %v3324_v59 = vsel %vm1143_vm5, %v3304_v41, 0.0 }
 0x7d9   : > { %3325 = vadd.xlane.f32.xlu0 %v3324_v59  ;;  %v3321_v51 = vsel %vm1143_vm5, %v3303_v63, 0.0 }
 0x7da   : > { %3322 = vadd.xlane.f32.xlu1 %v3321_v51 }
 0x7df   : > { %v3224_v21 = vpop.xlane.xlu0 %3223 }
 0x7e0   : > { %v3270_v54 = vmul.f32 0.03125, %v3224_v21  ;;  %v3221_v28 = vpop.xlane.xlu1 %3220 }
 0x7e1   : > { %v3269_v26 = vmul.f32 0.03125, %v3221_v28 }
 0x7e2   : > { %v5903_v33 = vsub.f32 %v5797_v47, %v3270_v54 }
 0x7e3   : > { %v5906_v61 = vsub.f32 %v5800_v10, %v3269_v26  ;;  %v3230_v58 = vpop.xlane.xlu0 %3229 }
 0x7e4   : > { %v3272_v44 = vmul.f32 0.03125, %v3230_v58  ;;  %v3227_v29 = vpop.xlane.xlu1 %3226  ;;  %v3306_v49 = vmul.f32 %v5903_v33, %v5903_v33 }
 0x7e5   : > { %v3271_v38 = vmul.f32 0.03125, %v3227_v29  ;;  %v3305_v32 = vmul.f32 %v5906_v61, %v5906_v61 }
 0x7e6   : > { %v5913_v1 = vsub.f32 %v5809_v30, %v3272_v44  ;;  %v3330_v14 = vsel %vm1143_vm5, %v3306_v49, 0.0 }
 0x7e7   : > { %v5917_v47 = vsub.f32 %v5812_v57, %v3271_v38  ;;  %3331 = vadd.xlane.f32.xlu0 %v3330_v14  ;;  %v3327_v10 = vsel %vm1143_vm5, %v3305_v32, 0.0  ;;  %v3236_v25 = vpop.xlane.xlu0 %3235 }
 0x7e8   : > { %3328 = vadd.xlane.f32.xlu1 %v3327_v10  ;;  %v3274_v13 = vmul.f32 0.03125, %v3236_v25  ;;  %v3233_v19 = vpop.xlane.xlu1 %3232  ;;  %v3308_v60 = vmul.f32 %v5913_v1, %v5913_v1 }
 0x7e9   : > { %v3273_v39 = vmul.f32 0.03125, %v3233_v19  ;;  %v3307_v30 = vmul.f32 %v5917_v47, %v5917_v47 }
 0x7ea   : > { %v5925_v16 = vsub.f32 %v5821_v56, %v3274_v13  ;;  %v3336_v57 = vsel %vm1143_vm5, %v3308_v60, 0.0 }
 0x7eb   : > { %v5929_v45 = vsub.f32 %v5824_v46, %v3273_v39  ;;  %3337 = vadd.xlane.f32.xlu0 %v3336_v57  ;;  %v3333_v11 = vsel %vm1143_vm5, %v3307_v30, 0.0  ;;  %v3242_v4 = vpop.xlane.xlu0 %3241 }
 0x7ec   : > { %3334 = vadd.xlane.f32.xlu1 %v3333_v11  ;;  %v3276_v43 = vmul.f32 0.03125, %v3242_v4  ;;  %v3239_v5 = vpop.xlane.xlu1 %3238  ;;  %v3310_v15 = vmul.f32 %v5925_v16, %v5925_v16 }
 0x7ed   : > { %v3275_v31 = vmul.f32 0.03125, %v3239_v5  ;;  %v3309_v56 = vmul.f32 %v5929_v45, %v5929_v45 }
 0x7ee   : > { %v5937_v2 = vsub.f32 %v5833_v36, %v3276_v43  ;;  %v3342_v46 = vsel %vm1143_vm5, %v3310_v15, 0.0 }
 0x7ef   : > { %v5941_v0 = vsub.f32 %v5836_v37, %v3275_v31  ;;  %3343 = vadd.xlane.f32.xlu0 %v3342_v46  ;;  %v3339_v40 = vsel %vm1143_vm5, %v3309_v56, 0.0  ;;  %v3248_v20 = vpop.xlane.xlu0 %3247  ;;  %v6003_v46 = vld [vmem:[%s784_s26] ss:$0 sm:$0xff] }
 0x7f0   : > { %3340 = vadd.xlane.f32.xlu1 %v3339_v40  ;;  %v3278_v35 = vmul.f32 0.03125, %v3248_v20  ;;  %v3245_v9 = vpop.xlane.xlu1 %3244  ;;  %v3312_v23 = vmul.f32 %v5937_v2, %v5937_v2 }
 0x7f1   : > { %v3277_v18 = vmul.f32 0.03125, %v3245_v9  ;;  %v3311_v36 = vmul.f32 %v5941_v0, %v5941_v0 }
 0x7f2   : > { %v5949_v7 = vsub.f32 %v5845_v17, %v3278_v35  ;;  %v3348_v37 = vsel %vm1143_vm5, %v3312_v23, 0.0 }
 0x7f3   : > { %v5953_v55 = vsub.f32 %v5848_v24, %v3277_v18  ;;  %3349 = vadd.xlane.f32.xlu0 %v3348_v37  ;;  %v3254_v53 = vpop.xlane.xlu0 %3253  ;;  %v3345_v3 = vsel %vm1143_vm5, %v3311_v36, 0.0  ;;  %v6011_v18 = vld [vmem:[%s6174_s4] ss:$0 sm:$0xff] }
 0x7f4   : > { %v3280_v34 = vmul.f32 0.03125, %v3254_v53  ;;  %v3251_v48 = vpop.xlane.xlu1 %3250  ;;  %3346 = vadd.xlane.f32.xlu1 %v3345_v3  ;;  %v3314_v8 = vmul.f32 %v5949_v7, %v5949_v7 }
 0x7f5   : > { %v3279_v41 = vmul.f32 0.03125, %v3251_v48  ;;  %v3313_v17 = vmul.f32 %v5953_v55, %v5953_v55 }
 0x7f6   : > { %v5961_v63 = vsub.f32 %v5857_v6, %v3280_v34  ;;  %v3354_v24 = vsel %vm1143_vm5, %v3314_v8, 0.0 }
 0x7f7   : > { %v5965_v59 = vsub.f32 %v5860_v12, %v3279_v41  ;;  %3355 = vadd.xlane.f32.xlu0 %v3354_v24  ;;  %v3260_v51 = vpop.xlane.xlu0 %3259  ;;  %v3351_v21 = vsel %vm1143_vm5, %v3313_v17, 0.0 }
 0x7f8   : > { %v3282_v54 = vmul.f32 0.03125, %v3260_v51  ;;  %v3257_v28 = vpop.xlane.xlu1 %3256  ;;  %3352 = vadd.xlane.f32.xlu1 %v3351_v21  ;;  %v3316_v26 = vmul.f32 %v5961_v63, %v5961_v63 }
 0x7f9   : > { %v3281_v58 = vmul.f32 0.03125, %v3257_v28  ;;  %v3315_v6 = vmul.f32 %v5965_v59, %v5965_v59 }
 0x7fa   : > { %v5973_v44 = vsub.f32 %v5869_v27, %v3282_v54  ;;  %v3360_v12 = vsel %vm1143_vm5, %v3316_v26, 0.0 }
 0x7fb   : > { %v5977_v29 = vsub.f32 %v5872_v22, %v3281_v58  ;;  %3361 = vadd.xlane.f32.xlu0 %v3360_v12  ;;  %v3266_v49 = vpop.xlane.xlu0 %3265  ;;  %v3357_v38 = vsel %vm1143_vm5, %v3315_v6, 0.0 }
 0x7fc   : > { %v3284_v32 = vmul.f32 0.03125, %v3266_v49  ;;  %3358 = vadd.xlane.f32.xlu1 %v3357_v38  ;;  %v3263_v14 = vpop.xlane.xlu1 %3262  ;;  %v3318_v10 = vmul.f32 %v5973_v44, %v5973_v44 }
 0x7fd   : > { %v3283_v25 = vmul.f32 0.03125, %v3263_v14  ;;  %v3317_v27 = vmul.f32 %v5977_v29, %v5977_v29 }
 0x7fe   : > { %v5985_v13 = vsub.f32 %v5881_v50, %v3284_v32  ;;  %v3366_v22 = vsel %vm1143_vm5, %v3318_v10, 0.0 }
 0x7ff   : > { %v5989_v19 = vsub.f32 %v5884_v52, %v3283_v25  ;;  %3367 = vadd.xlane.f32.xlu0 %v3366_v22  ;;  %v3363_v60 = vsel %vm1143_vm5, %v3317_v27, 0.0 }
 0x800   : > { %3364 = vadd.xlane.f32.xlu1 %v3363_v60  ;;  %v3320_v39 = vmul.f32 %v5985_v13, %v5985_v13 }
 0x801   : > { %v3319_v30 = vmul.f32 %v5989_v19, %v5989_v19 }
 0x802   : > { %v3372_v57 = vsel %vm1143_vm5, %v3320_v39, 0.0 }
 0x803   : > { %3373 = vadd.xlane.f32.xlu0 %v3372_v57  ;;  %v3369_v50 = vsel %vm1143_vm5, %v3319_v30, 0.0 }
 0x804   : > { %3370 = vadd.xlane.f32.xlu1 %v3369_v50 }
 0x866   : > { %v3326_v11 = vpop.xlane.xlu0 %3325 }
 0x867   : > { %v3376_v52 = vmul.f32 0.03125, %v3326_v11  ;;  %v3323_v4 = vpop.xlane.xlu1 %3322 }
 0x868   : > { %v3375_v43 = vmul.f32 0.03125, %v3323_v4 }
 0x869   : > { %v3394_v5 = vadd.f32 1e-05, %v3376_v52 }
 0x86a   : > { %v3393_v15 = vadd.f32 1e-05, %v3375_v43 }
 0x86b   : > { %4482 = vrsqrt.f32 %v3394_v5 }
 0x86c   : > { %4484 = vrsqrt.f32 %v3393_v15 }
 0x874   : > { %v3332_v31 = vpop.xlane.xlu0 %3331 }
 0x875   : > { %v4483_v56 = vpop.eup %4482  ;;  %v3378_v40 = vmul.f32 0.03125, %v3332_v31  ;;  %v3329_v20 = vpop.xlane.xlu1 %3328 }
 0x876   : > { %v4485_v35 = vpop.eup %4484  ;;  %v3430_v9 = vmul.f32 %v4483_v56, %v5891_v62  ;;  %v3377_v23 = vmul.f32 0.03125, %v3329_v20 }
 0x877   : > { %v3429_v36 = vmul.f32 %v4485_v35, %v5894_v42  ;;  %v3396_v37 = vadd.f32 1e-05, %v3378_v40 }
 0x878   : > { %v3454_v53 = vmul.f32 %v6003_v46, %v3430_v9  ;;  %v3395_v3 = vadd.f32 1e-05, %v3377_v23  ;;  %v3338_v34 = vpop.xlane.xlu0 %3337 }
 0x879   : > { %v3453_v48 = vmul.f32 %v6003_v46, %v3429_v36  ;;  %4486 = vrsqrt.f32 %v3396_v37  ;;  %v3380_v8 = vmul.f32 0.03125, %v3338_v34  ;;  %v3335_v41 = vpop.xlane.xlu1 %3334 }
 0x87a   : > { %v3478_v62 = vadd.f32 %v6011_v18, %v3454_v53  ;;  %4488 = vrsqrt.f32 %v3395_v3  ;;  %v3379_v17 = vmul.f32 0.03125, %v3335_v41 }
 0x87b   : > { %v6018_v24 = vadd.f32 %v6011_v18, %v3453_v48  ;;  %v3398_v51 = vadd.f32 1e-05, %v3380_v8 }
 0x87c   : > { %3496 = vst.msk [vmem:[#allocation2 + $0x8] sm:$0xff] %vm1143_vm5, %v3478_v62  ;;  %v3397_v42 = vadd.f32 1e-05, %v3379_v17  ;;  %v3344_v21 = vpop.xlane.xlu0 %3343 }
 0x87d   : > { %3495 = vst.msk [vmem:[#allocation2] sm:$0xff] %vm1143_vm5, %v6018_v24  ;;  %4490 = vrsqrt.f32 %v3398_v51  ;;  %v3382_v54 = vmul.f32 0.03125, %v3344_v21  ;;  %v3341_v28 = vpop.xlane.xlu1 %3340 }
 0x87e   : > { %4492 = vrsqrt.f32 %v3397_v42  ;;  %v3381_v26 = vmul.f32 0.03125, %v3341_v28 }
 0x87f   : > { %v3400_v58 = vadd.f32 1e-05, %v3382_v54 }
 0x880   : > { %v3399_v6 = vadd.f32 1e-05, %v3381_v26  ;;  %v3350_v12 = vpop.xlane.xlu0 %3349 }
 0x881   : > { %4494 = vrsqrt.f32 %v3400_v58  ;;  %v3384_v49 = vmul.f32 0.03125, %v3350_v12  ;;  %v3347_v38 = vpop.xlane.xlu1 %3346 }
 0x882   : > { %4496 = vrsqrt.f32 %v3399_v6  ;;  %v3383_v32 = vmul.f32 0.03125, %v3347_v38 }
 0x883   : > { %v4487_v14 = vpop.eup %4486  ;;  %v3402_v10 = vadd.f32 1e-05, %v3384_v49 }
 0x884   : > { %v4489_v25 = vpop.eup %4488  ;;  %v3432_v27 = vmul.f32 %v4487_v14, %v5903_v33  ;;  %v3401_v22 = vadd.f32 1e-05, %v3383_v32  ;;  %v3356_v60 = vpop.xlane.xlu0 %3355 }
 0x885   : > { %v3431_v39 = vmul.f32 %v4489_v25, %v5906_v61  ;;  %4498 = vrsqrt.f32 %v3402_v10  ;;  %v3386_v30 = vmul.f32 0.03125, %v3356_v60  ;;  %v3353_v57 = vpop.xlane.xlu1 %3352 }
 0x886   : > { %v3456_v50 = vmul.f32 %v6003_v46, %v3432_v27  ;;  %4500 = vrsqrt.f32 %v3401_v22  ;;  %v3385_v11 = vmul.f32 0.03125, %v3353_v57 }
 0x887   : > { %v4491_v52 = vpop.eup %4490  ;;  %v3455_v4 = vmul.f32 %v6003_v46, %v3431_v39  ;;  %v3404_v43 = vadd.f32 1e-05, %v3386_v30 }
 0x888   : > { %v4493_v5 = vpop.eup %4492  ;;  %v3480_v15 = vadd.f32 %v6011_v18, %v3456_v50  ;;  %v3434_v33 = vmul.f32 %v4491_v52, %v5913_v1  ;;  %v3403_v31 = vadd.f32 1e-05, %v3385_v11  ;;  %v3362_v56 = vpop.xlane.xlu0 %3361 }
 0x889   : > { %v3479_v61 = vadd.f32 %v6011_v18, %v3455_v4  ;;  %v3433_v40 = vmul.f32 %v4493_v5, %v5917_v47  ;;  %4502 = vrsqrt.f32 %v3404_v43  ;;  %v3388_v20 = vmul.f32 0.03125, %v3362_v56  ;;  %v3359_v35 = vpop.xlane.xlu1 %3358 }
 0x88a   : > { %3498 = vst.msk [vmem:[#allocation2 + $0x18] sm:$0xff] %vm1143_vm5, %v3480_v15  ;;  %v3458_v9 = vmul.f32 %v6003_v46, %v3434_v33  ;;  %4504 = vrsqrt.f32 %v3403_v31  ;;  %v3387_v23 = vmul.f32 0.03125, %v3359_v35 }
 0x88b   : > { %v4495_v36 = vpop.eup %4494  ;;  %3497 = vst.msk [vmem:[#allocation2 + $0x10] sm:$0xff] %vm1143_vm5, %v3479_v61  ;;  %v3457_v1 = vmul.f32 %v6003_v46, %v3433_v40  ;;  %v3406_v37 = vadd.f32 1e-05, %v3388_v20 }
 0x88c   : > { %v4497_v53 = vpop.eup %4496  ;;  %v3482_v3 = vadd.f32 %v6011_v18, %v3458_v9  ;;  %v3436_v47 = vmul.f32 %v4495_v36, %v5925_v16  ;;  %v3405_v34 = vadd.f32 1e-05, %v3387_v23  ;;  %v3368_v48 = vpop.xlane.xlu0 %3367 }
 0x88d   : > { %v3481_v8 = vadd.f32 %v6011_v18, %v3457_v1  ;;  %v3435_v41 = vmul.f32 %v4497_v53, %v5929_v45  ;;  %4506 = vrsqrt.f32 %v3406_v37  ;;  %v3390_v62 = vmul.f32 0.03125, %v3368_v48  ;;  %v3365_v17 = vpop.xlane.xlu1 %3364 }
 0x88e   : > { %3500 = vst.msk [vmem:[#allocation2 + $0x28] sm:$0xff] %vm1143_vm5, %v3482_v3  ;;  %v3460_v51 = vmul.f32 %v6003_v46, %v3436_v47  ;;  %4508 = vrsqrt.f32 %v3405_v34  ;;  %v3389_v42 = vmul.f32 0.03125, %v3365_v17 }
 0x88f   : > { %v4499_v21 = vpop.eup %4498  ;;  %3499 = vst.msk [vmem:[#allocation2 + $0x20] sm:$0xff] %vm1143_vm5, %v3481_v8  ;;  %v3459_v16 = vmul.f32 %v6003_v46, %v3435_v41  ;;  %v3408_v54 = vadd.f32 1e-05, %v3390_v62 }
 0x890   : > { %v4501_v28 = vpop.eup %4500  ;;  %v3484_v26 = vadd.f32 %v6011_v18, %v3460_v51  ;;  %v3438_v45 = vmul.f32 %v4499_v21, %v5937_v2  ;;  %v3407_v58 = vadd.f32 1e-05, %v3389_v42  ;;  %v3374_v6 = vpop.xlane.xlu0 %3373  ;;  %v3855_v21 = vld [vmem:[%s6175_s6] ss:$0 sm:$0xff] (!%p3854_p5) }
 0x891   : > { %v3483_v12 = vadd.f32 %v6011_v18, %v3459_v16  ;;  %v3437_v49 = vmul.f32 %v4501_v28, %v5941_v0  ;;  %4510 = vrsqrt.f32 %v3408_v54  ;;  %v3392_v38 = vmul.f32 0.03125, %v3374_v6  ;;  %v3371_v32 = vpop.xlane.xlu1 %3370  ;;  %v3856_v16 = vld [vmem:[%s6176_s30] ss:$0 sm:$0xff] (!%p3854_p5) }
 0x892   : > { %3502 = vst.msk [vmem:[#allocation2 + $0x38] sm:$0xff] %vm1143_vm5, %v3484_v26  ;;  %v3462_v14 = vmul.f32 %v6003_v46, %v3438_v45  ;;  %4512 = vrsqrt.f32 %v3407_v58  ;;  %v3391_v10 = vmul.f32 0.03125, %v3371_v32 }
 0x893   : > { %v4503_v25 = vpop.eup %4502  ;;  %3501 = vst.msk [vmem:[#allocation2 + $0x30] sm:$0xff] %vm1143_vm5, %v3483_v12  ;;  %v3461_v2 = vmul.f32 %v6003_v46, %v3437_v49  ;;  %v3410_v27 = vadd.f32 1e-05, %v3392_v38 }
 0x894   : > { %v4505_v22 = vpop.eup %4504  ;;  %v3486_v60 = vadd.f32 %v6011_v18, %v3462_v14  ;;  %v3440_v0 = vmul.f32 %v4503_v25, %v5949_v7  ;;  %v3409_v39 = vadd.f32 1e-05, %v3391_v10 }
 0x895   : > { %v3485_v30 = vadd.f32 %v6011_v18, %v3461_v2  ;;  %v3439_v57 = vmul.f32 %v4505_v22, %v5953_v55  ;;  %4514 = vrsqrt.f32 %v3410_v27 }
 0x896   : > { %3504 = vst.msk [vmem:[#allocation2 + $0x48] sm:$0xff] %vm1143_vm5, %v3486_v60  ;;  %v3464_v50 = vmul.f32 %v6003_v46, %v3440_v0  ;;  %4516 = vrsqrt.f32 %v3409_v39 }
 0x897   : > { %v4507_v11 = vpop.eup %4506  ;;  %3503 = vst.msk [vmem:[#allocation2 + $0x40] sm:$0xff] %vm1143_vm5, %v3485_v30  ;;  %v3463_v52 = vmul.f32 %v6003_v46, %v3439_v57 }
 0x898   : > { %v4509_v4 = vpop.eup %4508  ;;  %v3488_v43 = vadd.f32 %v6011_v18, %v3464_v50  ;;  %v3442_v7 = vmul.f32 %v4507_v11, %v5961_v63 }
 0x899   : > { %v3487_v5 = vadd.f32 %v6011_v18, %v3463_v52  ;;  %v3441_v55 = vmul.f32 %v4509_v4, %v5965_v59 }
 0x89a   : > { %3506 = vst.msk [vmem:[#allocation2 + $0x58] sm:$0xff] %vm1143_vm5, %v3488_v43  ;;  %v3466_v15 = vmul.f32 %v6003_v46, %v3442_v7 }
 0x89b   : > { %v4511_v33 = vpop.eup %4510  ;;  %3505 = vst.msk [vmem:[#allocation2 + $0x50] sm:$0xff] %vm1143_vm5, %v3487_v5  ;;  %v3465_v31 = vmul.f32 %v6003_v46, %v3441_v55 }
 0x89c   : > { %v4513_v56 = vpop.eup %4512  ;;  %v3490_v61 = vadd.f32 %v6011_v18, %v3466_v15  ;;  %v3444_v40 = vmul.f32 %v4511_v33, %v5973_v44 }
 0x89d   : > { %v3489_v63 = vadd.f32 %v6011_v18, %v3465_v31  ;;  %v3443_v20 = vmul.f32 %v4513_v56, %v5977_v29 }
 0x89e   : > { %3508 = vst.msk [vmem:[#allocation2 + $0x68] sm:$0xff] %vm1143_vm5, %v3490_v61  ;;  %v3468_v59 = vmul.f32 %v6003_v46, %v3444_v40 }
 0x89f   : > { %v4515_v35 = vpop.eup %4514  ;;  %3507 = vst.msk [vmem:[#allocation2 + $0x60] sm:$0xff] %vm1143_vm5, %v3489_v63  ;;  %v3467_v9 = vmul.f32 %v6003_v46, %v3443_v20 }
 0x8a0   : > { %v4517_v23 = vpop.eup %4516  ;;  %v3492_v36 = vadd.f32 %v6011_v18, %v3468_v59  ;;  %v3446_v1 = vmul.f32 %v4515_v35, %v5985_v13  ;;  %v3518_v13 = vrot.slane (!%p3854_p5), %v3486_v60, 7 }
 0x8a1   : > { %v3491_v44 = vadd.f32 %v6011_v18, %v3467_v9  ;;  %v3445_v37 = vmul.f32 %v4517_v23, %v5989_v19  ;;  %3516 = sbr.rel (%p3854_p5) target bundleno = 2525 (0x9dd), region = 108 }
 0x8a2   : > { %3510 = vst.msk [vmem:[#allocation2 + $0x78] sm:$0xff] %vm1143_vm5, %v3492_v36  ;;  %v3470_v29 = vmul.f32 %v6003_v46, %v3446_v1  ;;  %v3521_v19 = vsel (!%p3854_p5), %vm3520_vm7, %v6018_v24, %v3518_v13 }
 0x8a3   : > { %3509 = vst.msk [vmem:[#allocation2 + $0x70] sm:$0xff] %vm1143_vm5, %v3491_v44  ;;  %v3469_v53 = vmul.f32 %v6003_v46, %v3445_v37  ;;  %v3525_v34 = vsel (!%p3854_p5), %vm3524_vm8, %v3521_v19, 0.0 }
 0x8a4   : > { %v3494_v3 = vadd.f32 %v6011_v18, %v3470_v29  ;;  %3526 = vadd.xlane.f32.xlu0 (!%p3854_p5), %v3525_v34 }
 0x8a5   : > { %v3493_v47 = vadd.f32 %v6011_v18, %v3469_v53 }
 0x8a6   : > { %3512 = vst.msk [vmem:[#allocation2 + $0x88] sm:$0xff] %vm1143_vm5, %v3494_v3 }
 0x8a7   : > { %3511 = vst.msk [vmem:[#allocation2 + $0x80] sm:$0xff] %vm1143_vm5, %v3493_v47 }
 0x931   : > { %v3527_v46 = vpop.xlane.xlu0 %3526 }
 0x932   : > { %v3528_v48 = vmul.f32 0.03125, %v3527_v46 }
 0x934   : > { %v3529_v8 = vsub.f32 %v3521_v19, %v3528_v48 }
 0x936   : > { %v3530_v41 = vmul.f32 %v3529_v8, %v3529_v8 }
 0x938   : > { %v3531_v18 = vsel %vm3524_vm8, %v3530_v41, 0.0 }
 0x939   : > { %3532 = vadd.xlane.f32.xlu0 %v3531_v18 }
 0x9c6   : > { %v3533_v62 = vpop.xlane.xlu0 %3532 }
 0x9c7   : > { %v3534_v17 = vmul.f32 0.03125, %v3533_v62 }
 0x9c9   : > { %v3535_v51 = vadd.f32 1e-05, %v3534_v17 }
 0x9cb   : > { %4536 = vrsqrt.f32 %v3535_v51 }
 0x9d5   : > { %v4537_v42 = vpop.eup %4536 }
 0x9d6   : > { %v3537_v24 = vmul.f32 %v4537_v42, %v3529_v8 }
 0x9d8   : > { %v3544_v54 = vmul.f32 %v3855_v21, %v3537_v24 }
 0x9da   : > { %v3551_v28 = vadd.f32 %v3856_v16, %v3544_v54 }
 0x9dc   : > { %3552 = vst.msk [vmem:[#allocation3] sm:$0x3] %vm3524_vm8, %v3551_v28 }
 0x9dd PF: > { %p4324_p6 = scmp.eq.s32.totalorder %s4691_s22, 1  ;;  %s4579_s21 = smov [#allocation3]  }
 0x9de   : > { %s3560_s20 = sshll.u32 %s4579_s21, 4  ;;  %s3561_s20 = int_to_ptr.vmem [resolvable:$true] %s3560_s20 }
 0x9df   : > { %s4538_s28 = scalar_lea.vmem %s3561_s20, 32  ;;  %p4545_p10 = scmp.lt.s32.totalorder %s3561_s20, %s3561_s20 }
 0x9e0   : > { %p4539_p7 = scmp.ne.s32.totalorder %s3561_s20, %s4538_s28  ;;  %p4546_p11 = scmp.lt.s32.totalorder %s4538_s28, %s4538_s28 }
 0x9e2   : > { %p4540_p8 = pnand %p4539_p7, %p4324_p6  ;;  %p4547_p12 = por %p4546_p11, %p4545_p10 }
 0x9e4   : > { %p4541_p9 = pneg %p4540_p8 }
 0x9e6   : > { %p4548_p13 = pnand %p4547_p12, %p4541_p9 }
 0x9e8   : > { %4551 = shalt.err (!%p4548_p13)
}
 0x9e9   : > { %s6177_s1 = sld [smem:[#allocation17_spill]] }
 0x9ef   : > { %s6178_s2 = smov %s6177_s1  ;;  %s4552_s25 = scalar_lea.hbm %s6177_s1, 32 }
 0x9f0   : > { %p4553_p0 = scmp.ne.s32.totalorder %s6178_s2, %s4552_s25  ;;  %p4558_p3 = scmp.lt.u32.totalorder %s4552_s25, %s6178_s2 }
 0x9f2   : > { %p4554_p1 = pnand %p4553_p0, %p4324_p6 }
 0x9f4   : > { %p4555_p2 = pneg %p4554_p1 }
 0x9f6   : > { %p4560_p4 = pnand %p4558_p3, %p4555_p2 }
 0x9f8   : > { %4563 = shalt.err (!%p4560_p4)
}
 0x9f9   : > { %4321 = dma.vmem_to_hbm [thread:$0]  (%p4324_p6), %s3561_s20, 32, %s6178_s2, [#allocation4]  }
 0x9fa   : > { %4569 = dma.done.wait (%p4324_p6), [#allocation4], 32  }
 0x9fb   : > { %4571 = vsyncadd (%p4324_p6), [#allocation4], 4294967264 }
 0x9fc PF: > { %s6179_s29 = sld [smem:[#allocation6_spill]] }
 0xa02   : > { %s31_s1 = sadd.s32 1, %s6179_s29  }
 0xa03   : > { %p28_p5 = scmp.ge.s32.totalorder %s31_s1, 4  }
 0xa05   :  { %30 = sbr.rel (!%p28_p5) target bundleno = 12 (0xc), region = 168 }
 0xa0c   :  { %3573 = vsyncpa [#allocation4], 1 }
 0xa0d   :  { %3575 = vsyncpa [#allocation4 + $0x1], 1 }

</bundles_post_ra>
